<compile_context>
chip_gen: v7x
topology: tpu7x:2x2x1
jax: 0.10.0
libtpu: 0.0.40
codegen_flags: <defaults>
</compile_context>

<pallas_src>
import jax
import jax.numpy as jnp
from jax import lax
from jax.experimental import pallas as pl
from jax.experimental.pallas import tpu as pltpu


# Interior of each padded scratch starts at this W offset (sublane-aligned for
# f32) so activation writes are aligned stores; the 3x3 taps read at offsets
# _PAD_W0-1 .. _PAD_W0+1 (unaligned reads are supported and cheap).
_PAD_W0 = 8


def _conv3x3_from_padded(pad_ref, w_ref, b_ref, H, W, C, relu, compute_dtype):
    """3x3 stride-1 'same' conv read from a zero-padded VMEM scratch.

    pad_ref : (H+2, W+2*_PAD_W0, C) VMEM; data at [1:H+1, _PAD_W0:_PAD_W0+W, :],
              zeros everywhere else in the read window.
    w_ref   : (9, C, Cout) ref, tap-major (t = dy*3 + dx).
    b_ref   : (1, Cout) f32 ref.
    returns : (H*W, Cout) f32 value.
    """
    partials = []
    for dy in range(3):
        for dx in range(3):
            t = dy * 3 + dx
            w0 = _PAD_W0 - 1 + dx
            tap = pad_ref[dy:dy + H, w0:w0 + W, :]          # (H, W, C)
            tap = tap.reshape(H * W, C).astype(compute_dtype)
            partials.append(
                jnp.dot(tap, w_ref[t], preferred_element_type=jnp.float32))
    # Balanced tree-sum of the 9 tap contributions (all f32).
    while len(partials) > 1:
        nxt = [partials[i] + partials[i + 1]
               for i in range(0, len(partials) - 1, 2)]
        if len(partials) % 2:
            nxt.append(partials[-1])
        partials = nxt
    acc = partials[0] + b_ref[...]                          # f32 epilogue
    if relu:
        acc = jnp.maximum(acc, 0.0)
    return acc


def _make_fused_kernel(H, W, Cin, F, AC, compute_dtype):
    """conv1 -> ReLU -> conv2 -> ReLU -> output conv, fully VMEM-resident."""

    def kernel(x_ref, w1_ref, b1_ref, w2_ref, b2_ref, wo_ref, bo_ref,
               out_ref, xpad_ref, hpad_ref):
        # ---- in-kernel zero padding of the input (no HBM padded copy) -----
        xpad_ref[...] = jnp.zeros(xpad_ref.shape, xpad_ref.dtype)
        xpad_ref[pl.ds(1, H), pl.ds(_PAD_W0, W), :] = x_ref[0]

        # ---- conv1 + ReLU (intermediate stays in VMEM) ---------------------
        h1 = _conv3x3_from_padded(xpad_ref, w1_ref, b1_ref, H, W, Cin,
                                  relu=True, compute_dtype=compute_dtype)
        hpad_ref[...] = jnp.zeros(hpad_ref.shape, hpad_ref.dtype)
        hpad_ref[pl.ds(1, H), pl.ds(_PAD_W0, W), :] = h1.reshape(H, W, F)

        # ---- conv2 + ReLU (reuse padded scratch; halo stays zero) ----------
        h2 = _conv3x3_from_padded(hpad_ref, w2_ref, b2_ref, H, W, F,
                                  relu=True, compute_dtype=compute_dtype)
        hpad_ref[pl.ds(1, H), pl.ds(_PAD_W0, W), :] = h2.reshape(H, W, F)

        # ---- output conv (forward() applies no activation here) ------------
        o = _conv3x3_from_padded(hpad_ref, wo_ref, bo_ref, H, W, F,
                                 relu=False, compute_dtype=compute_dtype)
        out_ref[...] = o.reshape(1, H * W, AC).astype(out_ref.dtype)

    return kernel


def init_params(key, num_features_in, feature_size, num_anchor_points, num_classes):
    """Deterministic synthetic parameters (shapes match the torch module)."""
    ks = jax.random.split(key, 6)
    A_C = num_anchor_points * num_classes

    def w_init(k, cin, cout):
        scale = 1.0 / jnp.sqrt(jnp.float32(cin * 9))
        return jax.random.normal(k, (3, 3, cin, cout), jnp.float32) * scale

    return {
        "w1": w_init(ks[0], num_features_in, feature_size),
        "b1": jax.random.normal(ks[1], (feature_size,), jnp.float32) * 0.01,
        "w2": w_init(ks[2], feature_size, feature_size),
        "b2": jax.random.normal(ks[3], (feature_size,), jnp.float32) * 0.01,
        "wo": w_init(ks[4], feature_size, A_C),
        "bo": jax.random.normal(ks[5], (A_C,), jnp.float32) * 0.01,
    }


def classification_model_forward(x_nchw, params, num_anchor_points, num_classes,
                                 *, compute_dtype=jnp.float32):
    """Matches ClassificationModel.forward (conv3/conv4/sigmoid unused there).

    compute_dtype=jnp.bfloat16 is recommended on v6e/v7x (f32 accumulation is
    kept inside the kernel either way).
    """
    x = jnp.transpose(x_nchw, (0, 2, 3, 1)).astype(jnp.float32)   # NCHW -> NHWC
    B, H, W, Cin = x.shape
    F = params["w1"].shape[-1]
    AC = num_anchor_points * num_classes

    # Host-side weight prep: tap-major (9, Cin, Cout); MXU operands in
    # compute_dtype, biases stay f32.
    w1 = params["w1"].reshape(9, Cin, F).astype(compute_dtype)
    w2 = params["w2"].reshape(9, F, F).astype(compute_dtype)
    wo = params["wo"].reshape(9, F, AC).astype(compute_dtype)
    b1 = params["b1"].reshape(1, F).astype(jnp.float32)
    b2 = params["b2"].reshape(1, F).astype(jnp.float32)
    bo = params["bo"].reshape(1, AC).astype(jnp.float32)

    kernel = _make_fused_kernel(H, W, Cin, F, AC, compute_dtype)
    wpad = W + 2 * _PAD_W0

    out = pl.pallas_call(
        kernel,
        out_shape=jax.ShapeDtypeStruct((B, H * W, AC), jnp.float32),
        grid_spec=pltpu.PrefetchScalarGridSpec(
            num_scalar_prefetch=0,
            grid=(B,),                       # one image per grid step
            in_specs=[
                pl.BlockSpec((1, H, W, Cin), lambda b: (b, 0, 0, 0)),
                pl.BlockSpec((9, Cin, F), lambda b: (0, 0, 0)),
                pl.BlockSpec((1, F), lambda b: (0, 0)),
                pl.BlockSpec((9, F, F), lambda b: (0, 0, 0)),
                pl.BlockSpec((1, F), lambda b: (0, 0)),
                pl.BlockSpec((9, F, AC), lambda b: (0, 0, 0)),
                pl.BlockSpec((1, AC), lambda b: (0, 0)),
            ],
            out_specs=pl.BlockSpec((1, H * W, AC), lambda b: (b, 0, 0)),
            scratch_shapes=[
                pltpu.VMEM((H + 2, wpad, Cin), jnp.float32),   # padded input
                pltpu.VMEM((H + 2, wpad, F), jnp.float32),     # padded hidden
            ],
        ),
        compiler_params=pltpu.CompilerParams(
            dimension_semantics=("parallel",),   # one image per TC on v7x
        ),
    )(x, w1, b1, w2, b2, wo, bo)

    # Row-major (B, H*W, A*C) -> (B, H*W*A, C); identical to torch's
    # permute(0,2,3,1).view(B, H, W, A, C).view(B, -1, C).
    return out.reshape(B, H * W * num_anchor_points, num_classes)


def _reference_forward(x_nchw, params, num_anchor_points, num_classes):
    """Pure-JAX reference (lax.conv) for a sanity check."""
    def conv(x, w, b, relu):
        y = lax.conv_general_dilated(
            x, w, window_strides=(1, 1), padding="SAME",
            dimension_numbers=("NHWC", "HWIO", "NHWC"),
        ) + b
        return jnp.maximum(y, 0.0) if relu else y

    x = jnp.transpose(x_nchw, (0, 2, 3, 1))
    h = conv(x, params["w1"], params["b1"], True)
    h = conv(h, params["w2"], params["b2"], True)
    out = conv(h, params["wo"], params["bo"], False)
    B, H, W, _ = out.shape
    return out.reshape(B, H * W * num_anchor_points, num_classes)


if __name__ == "__main__":
    # Small shapes consistent with the module's forward.
    B = 2
    num_features_in = 4
    H = W = 16
    feature_size = 32
    num_anchor_points = 4
    num_classes = 8

    key = jax.random.PRNGKey(0)
    k_x, k_p = jax.random.split(key)
    x = jax.random.normal(k_x, (B, num_features_in, H, W), jnp.float32)  # NCHW
    params = init_params(k_p, num_features_in, feature_size,
                         num_anchor_points, num_classes)

    # f32 compute path.
    out = classification_model_forward(x, params, num_anchor_points, num_classes)
    out = jax.block_until_ready(out)
    assert out.shape == (B, H * W * num_anchor_points, num_classes), out.shape

    ref = jax.block_until_ready(
        _reference_forward(x, params, num_anchor_points, num_classes))
    assert jnp.allclose(out, ref, atol=5e-2, rtol=5e-2), (
        float(jnp.max(jnp.abs(out - ref))))

    # bf16 MXU path (recommended on v6e/v7x); f32 accumulation + f32 epilogue.
    out_bf16 = jax.block_until_ready(
        classification_model_forward(x, params, num_anchor_points, num_classes,
                                     compute_dtype=jnp.bfloat16))
    assert jnp.allclose(out_bf16, ref, atol=1e-1, rtol=1e-1), (
        float(jnp.max(jnp.abs(out_bf16 - ref))))

    print("KERNEL_OK")
</pallas_src>

<mosaic_0001>
module attributes {stable_mosaic.version = 11 : i64} {
  func.func @kernel(%arg0: i32, %arg1: memref<1x16x16x4xf32, #tpu.memory_space<vmem>>, %arg2: memref<9x4x32xf32, #tpu.memory_space<vmem>>, %arg3: memref<1x32xf32, #tpu.memory_space<vmem>>, %arg4: memref<9x32x32xf32, #tpu.memory_space<vmem>>, %arg5: memref<1x32xf32, #tpu.memory_space<vmem>>, %arg6: memref<9x32x32xf32, #tpu.memory_space<vmem>>, %arg7: memref<1x32xf32, #tpu.memory_space<vmem>>, %arg8: memref<1x256x32xf32, #tpu.memory_space<vmem>>, %arg9: memref<18x32x4xf32, #tpu.memory_space<vmem>>, %arg10: memref<18x32x32xf32, #tpu.memory_space<vmem>>) attributes {dimension_semantics = [#tpu.dimension_semantics<parallel>], iteration_bounds = array<i64: 2>, scalar_prefetch = 0 : i64, scratch_operands = 2 : i64, tpu.core_type = #tpu.core_type<tc>, window_params = [{transform_indices = @transform_0, window_bounds = array<i64: 1, 16, 16, 4>}, {pipeline_mode = #tpu.pipeline_mode<synchronous>, transform_indices = @transform_1, window_bounds = array<i64: 9, 4, 32>}, {pipeline_mode = #tpu.pipeline_mode<synchronous>, transform_indices = @transform_2, window_bounds = array<i64: 1, 32>}, {pipeline_mode = #tpu.pipeline_mode<synchronous>, transform_indices = @transform_3, window_bounds = array<i64: 9, 32, 32>}, {pipeline_mode = #tpu.pipeline_mode<synchronous>, transform_indices = @transform_4, window_bounds = array<i64: 1, 32>}, {pipeline_mode = #tpu.pipeline_mode<synchronous>, transform_indices = @transform_5, window_bounds = array<i64: 9, 32, 32>}, {pipeline_mode = #tpu.pipeline_mode<synchronous>, transform_indices = @transform_6, window_bounds = array<i64: 1, 32>}, {transform_indices = @transform_7, window_bounds = array<i64: 1, 256, 32>}]} {
    %cst = arith.constant 0.000000e+00 : f32
    %0 = vector.broadcast %cst : f32 to vector<18x32x4xf32>
    %c0 = arith.constant 0 : index
    %c0_0 = arith.constant 0 : index
    %c0_1 = arith.constant 0 : index
    %1 = vector.load %arg9[%c0, %c0_0, %c0_1] : memref<18x32x4xf32, #tpu.memory_space<vmem>>, vector<18x32x4xf32>
    tpu.vector_store %arg9[%c0, %c0_0, %c0_1], %0 {strides = array<i32>} : memref<18x32x4xf32, #tpu.memory_space<vmem>>, vector<18x32x4xf32>,
    %c0_2 = arith.constant 0 : index
    %c0_3 = arith.constant 0 : index
    %c0_4 = arith.constant 0 : index
    %c0_5 = arith.constant 0 : index
    %2 = vector.load %arg1[%c0_2, %c0_3, %c0_4, %c0_5] : memref<1x16x16x4xf32, #tpu.memory_space<vmem>>, vector<1x16x16x4xf32>
    %3 = vector.shape_cast %2 : vector<1x16x16x4xf32> to vector<16x16x4xf32>
    %c1 = arith.constant 1 : index
    %c8 = arith.constant 8 : index
    %c0_6 = arith.constant 0 : index
    %4 = vector.load %arg9[%c1, %c8, %c0_6] : memref<18x32x4xf32, #tpu.memory_space<vmem>>, vector<16x16x4xf32>
    tpu.vector_store %arg9[%c1, %c8, %c0_6], %3 {strides = array<i32>} : memref<18x32x4xf32, #tpu.memory_space<vmem>>, vector<16x16x4xf32>,
    %c0_7 = arith.constant 0 : index
    %c7 = arith.constant 7 : index
    %c0_8 = arith.constant 0 : index
    %5 = vector.load %arg9[%c0_7, %c7, %c0_8] : memref<18x32x4xf32, #tpu.memory_space<vmem>>, vector<16x16x4xf32>
    %6 = vector.shape_cast %5 : vector<16x16x4xf32> to vector<256x4xf32>
    %c0_9 = arith.constant 0 : index
    %c0_10 = arith.constant 0 : index
    %c0_11 = arith.constant 0 : index
    %7 = vector.load %arg2[%c0_9, %c0_10, %c0_11] : memref<9x4x32xf32, #tpu.memory_space<vmem>>, vector<1x4x32xf32>
    %8 = vector.shape_cast %7 : vector<1x4x32xf32> to vector<4x32xf32>
    %cst_12 = arith.constant dense<0.000000e+00> : vector<256x32xf32>
    %9 = tpu.matmul %6, %8, %cst_12 {dimension_numbers = #tpu.dot_dimension_numbers<[1], [0], [0], [1], [0, 0, 1, 1], [], []>} : vector<256x4xf32>, vector<4x32xf32>, vector<256x32xf32> -> vector<256x32xf32>
    %c0_13 = arith.constant 0 : index
    %c8_14 = arith.constant 8 : index
    %c0_15 = arith.constant 0 : index
    %10 = vector.load %arg9[%c0_13, %c8_14, %c0_15] : memref<18x32x4xf32, #tpu.memory_space<vmem>>, vector<16x16x4xf32>
    %11 = vector.shape_cast %10 : vector<16x16x4xf32> to vector<256x4xf32>
    %c1_16 = arith.constant 1 : index
    %c0_17 = arith.constant 0 : index
    %c0_18 = arith.constant 0 : index
    %12 = vector.load %arg2[%c1_16, %c0_17, %c0_18] : memref<9x4x32xf32, #tpu.memory_space<vmem>>, vector<1x4x32xf32>
    %13 = vector.shape_cast %12 : vector<1x4x32xf32> to vector<4x32xf32>
    %cst_19 = arith.constant dense<0.000000e+00> : vector<256x32xf32>
    %14 = tpu.matmul %11, %13, %cst_19 {dimension_numbers = #tpu.dot_dimension_numbers<[1], [0], [0], [1], [0, 0, 1, 1], [], []>} : vector<256x4xf32>, vector<4x32xf32>, vector<256x32xf32> -> vector<256x32xf32>
    %c0_20 = arith.constant 0 : index
    %c9 = arith.constant 9 : index
    %c0_21 = arith.constant 0 : index
    %15 = vector.load %arg9[%c0_20, %c9, %c0_21] : memref<18x32x4xf32, #tpu.memory_space<vmem>>, vector<16x16x4xf32>
    %16 = vector.shape_cast %15 : vector<16x16x4xf32> to vector<256x4xf32>
    %c2 = arith.constant 2 : index
    %c0_22 = arith.constant 0 : index
    %c0_23 = arith.constant 0 : index
    %17 = vector.load %arg2[%c2, %c0_22, %c0_23] : memref<9x4x32xf32, #tpu.memory_space<vmem>>, vector<1x4x32xf32>
    %18 = vector.shape_cast %17 : vector<1x4x32xf32> to vector<4x32xf32>
    %cst_24 = arith.constant dense<0.000000e+00> : vector<256x32xf32>
    %19 = tpu.matmul %16, %18, %cst_24 {dimension_numbers = #tpu.dot_dimension_numbers<[1], [0], [0], [1], [0, 0, 1, 1], [], []>} : vector<256x4xf32>, vector<4x32xf32>, vector<256x32xf32> -> vector<256x32xf32>
    %c1_25 = arith.constant 1 : index
    %c7_26 = arith.constant 7 : index
    %c0_27 = arith.constant 0 : index
    %20 = vector.load %arg9[%c1_25, %c7_26, %c0_27] : memref<18x32x4xf32, #tpu.memory_space<vmem>>, vector<16x16x4xf32>
    %21 = vector.shape_cast %20 : vector<16x16x4xf32> to vector<256x4xf32>
    %c3 = arith.constant 3 : index
    %c0_28 = arith.constant 0 : index
    %c0_29 = arith.constant 0 : index
    %22 = vector.load %arg2[%c3, %c0_28, %c0_29] : memref<9x4x32xf32, #tpu.memory_space<vmem>>, vector<1x4x32xf32>
    %23 = vector.shape_cast %22 : vector<1x4x32xf32> to vector<4x32xf32>
    %cst_30 = arith.constant dense<0.000000e+00> : vector<256x32xf32>
    %24 = tpu.matmul %21, %23, %cst_30 {dimension_numbers = #tpu.dot_dimension_numbers<[1], [0], [0], [1], [0, 0, 1, 1], [], []>} : vector<256x4xf32>, vector<4x32xf32>, vector<256x32xf32> -> vector<256x32xf32>
    %c1_31 = arith.constant 1 : index
    %c8_32 = arith.constant 8 : index
    %c0_33 = arith.constant 0 : index
    %25 = vector.load %arg9[%c1_31, %c8_32, %c0_33] : memref<18x32x4xf32, #tpu.memory_space<vmem>>, vector<16x16x4xf32>
    %26 = vector.shape_cast %25 : vector<16x16x4xf32> to vector<256x4xf32>
    %c4 = arith.constant 4 : index
    %c0_34 = arith.constant 0 : index
    %c0_35 = arith.constant 0 : index
    %27 = vector.load %arg2[%c4, %c0_34, %c0_35] : memref<9x4x32xf32, #tpu.memory_space<vmem>>, vector<1x4x32xf32>
    %28 = vector.shape_cast %27 : vector<1x4x32xf32> to vector<4x32xf32>
    %cst_36 = arith.constant dense<0.000000e+00> : vector<256x32xf32>
    %29 = tpu.matmul %26, %28, %cst_36 {dimension_numbers = #tpu.dot_dimension_numbers<[1], [0], [0], [1], [0, 0, 1, 1], [], []>} : vector<256x4xf32>, vector<4x32xf32>, vector<256x32xf32> -> vector<256x32xf32>
    %c1_37 = arith.constant 1 : index
    %c9_38 = arith.constant 9 : index
    %c0_39 = arith.constant 0 : index
    %30 = vector.load %arg9[%c1_37, %c9_38, %c0_39] : memref<18x32x4xf32, #tpu.memory_space<vmem>>, vector<16x16x4xf32>
    %31 = vector.shape_cast %30 : vector<16x16x4xf32> to vector<256x4xf32>
    %c5 = arith.constant 5 : index
    %c0_40 = arith.constant 0 : index
    %c0_41 = arith.constant 0 : index
    %32 = vector.load %arg2[%c5, %c0_40, %c0_41] : memref<9x4x32xf32, #tpu.memory_space<vmem>>, vector<1x4x32xf32>
    %33 = vector.shape_cast %32 : vector<1x4x32xf32> to vector<4x32xf32>
    %cst_42 = arith.constant dense<0.000000e+00> : vector<256x32xf32>
    %34 = tpu.matmul %31, %33, %cst_42 {dimension_numbers = #tpu.dot_dimension_numbers<[1], [0], [0], [1], [0, 0, 1, 1], [], []>} : vector<256x4xf32>, vector<4x32xf32>, vector<256x32xf32> -> vector<256x32xf32>
    %c2_43 = arith.constant 2 : index
    %c7_44 = arith.constant 7 : index
    %c0_45 = arith.constant 0 : index
    %35 = vector.load %arg9[%c2_43, %c7_44, %c0_45] : memref<18x32x4xf32, #tpu.memory_space<vmem>>, vector<16x16x4xf32>
    %36 = vector.shape_cast %35 : vector<16x16x4xf32> to vector<256x4xf32>
    %c6 = arith.constant 6 : index
    %c0_46 = arith.constant 0 : index
    %c0_47 = arith.constant 0 : index
    %37 = vector.load %arg2[%c6, %c0_46, %c0_47] : memref<9x4x32xf32, #tpu.memory_space<vmem>>, vector<1x4x32xf32>
    %38 = vector.shape_cast %37 : vector<1x4x32xf32> to vector<4x32xf32>
    %cst_48 = arith.constant dense<0.000000e+00> : vector<256x32xf32>
    %39 = tpu.matmul %36, %38, %cst_48 {dimension_numbers = #tpu.dot_dimension_numbers<[1], [0], [0], [1], [0, 0, 1, 1], [], []>} : vector<256x4xf32>, vector<4x32xf32>, vector<256x32xf32> -> vector<256x32xf32>
    %c2_49 = arith.constant 2 : index
    %c8_50 = arith.constant 8 : index
    %c0_51 = arith.constant 0 : index
    %40 = vector.load %arg9[%c2_49, %c8_50, %c0_51] : memref<18x32x4xf32, #tpu.memory_space<vmem>>, vector<16x16x4xf32>
    %41 = vector.shape_cast %40 : vector<16x16x4xf32> to vector<256x4xf32>
    %c7_52 = arith.constant 7 : index
    %c0_53 = arith.constant 0 : index
    %c0_54 = arith.constant 0 : index
    %42 = vector.load %arg2[%c7_52, %c0_53, %c0_54] : memref<9x4x32xf32, #tpu.memory_space<vmem>>, vector<1x4x32xf32>
    %43 = vector.shape_cast %42 : vector<1x4x32xf32> to vector<4x32xf32>
    %cst_55 = arith.constant dense<0.000000e+00> : vector<256x32xf32>
    %44 = tpu.matmul %41, %43, %cst_55 {dimension_numbers = #tpu.dot_dimension_numbers<[1], [0], [0], [1], [0, 0, 1, 1], [], []>} : vector<256x4xf32>, vector<4x32xf32>, vector<256x32xf32> -> vector<256x32xf32>
    %c2_56 = arith.constant 2 : index
    %c9_57 = arith.constant 9 : index
    %c0_58 = arith.constant 0 : index
    %45 = vector.load %arg9[%c2_56, %c9_57, %c0_58] : memref<18x32x4xf32, #tpu.memory_space<vmem>>, vector<16x16x4xf32>
    %46 = vector.shape_cast %45 : vector<16x16x4xf32> to vector<256x4xf32>
    %c8_59 = arith.constant 8 : index
    %c0_60 = arith.constant 0 : index
    %c0_61 = arith.constant 0 : index
    %47 = vector.load %arg2[%c8_59, %c0_60, %c0_61] : memref<9x4x32xf32, #tpu.memory_space<vmem>>, vector<1x4x32xf32>
    %48 = vector.shape_cast %47 : vector<1x4x32xf32> to vector<4x32xf32>
    %cst_62 = arith.constant dense<0.000000e+00> : vector<256x32xf32>
    %49 = tpu.matmul %46, %48, %cst_62 {dimension_numbers = #tpu.dot_dimension_numbers<[1], [0], [0], [1], [0, 0, 1, 1], [], []>} : vector<256x4xf32>, vector<4x32xf32>, vector<256x32xf32> -> vector<256x32xf32>
    %50 = arith.addf %9, %14 : vector<256x32xf32>
    %51 = arith.addf %19, %24 : vector<256x32xf32>
    %52 = arith.addf %29, %34 : vector<256x32xf32>
    %53 = arith.addf %39, %44 : vector<256x32xf32>
    %54 = arith.addf %50, %51 : vector<256x32xf32>
    %55 = arith.addf %52, %53 : vector<256x32xf32>
    %56 = arith.addf %54, %55 : vector<256x32xf32>
    %57 = arith.addf %56, %49 : vector<256x32xf32>
    %c0_63 = arith.constant 0 : index
    %c0_64 = arith.constant 0 : index
    %58 = vector.load %arg3[%c0_63, %c0_64] : memref<1x32xf32, #tpu.memory_space<vmem>>, vector<1x32xf32>
    %59 = vector.broadcast %58 : vector<1x32xf32> to vector<256x32xf32>
    %60 = arith.addf %57, %59 : vector<256x32xf32>
    %cst_65 = arith.constant 0.000000e+00 : f32
    %61 = vector.broadcast %cst_65 : f32 to vector<256x32xf32>
    %62 = arith.maximumf %60, %61 : vector<256x32xf32>
    %cst_66 = arith.constant 0.000000e+00 : f32
    %63 = vector.broadcast %cst_66 : f32 to vector<18x32x32xf32>
    %c0_67 = arith.constant 0 : index
    %c0_68 = arith.constant 0 : index
    %c0_69 = arith.constant 0 : index
    %64 = vector.load %arg10[%c0_67, %c0_68, %c0_69] : memref<18x32x32xf32, #tpu.memory_space<vmem>>, vector<18x32x32xf32>
    tpu.vector_store %arg10[%c0_67, %c0_68, %c0_69], %63 {strides = array<i32>} : memref<18x32x32xf32, #tpu.memory_space<vmem>>, vector<18x32x32xf32>,
    %65 = vector.shape_cast %62 : vector<256x32xf32> to vector<16x16x32xf32>
    %c1_70 = arith.constant 1 : index
    %c8_71 = arith.constant 8 : index
    %c0_72 = arith.constant 0 : index
    %66 = vector.load %arg10[%c1_70, %c8_71, %c0_72] : memref<18x32x32xf32, #tpu.memory_space<vmem>>, vector<16x16x32xf32>
    tpu.vector_store %arg10[%c1_70, %c8_71, %c0_72], %65 {strides = array<i32>} : memref<18x32x32xf32, #tpu.memory_space<vmem>>, vector<16x16x32xf32>,
    %c0_73 = arith.constant 0 : index
    %c7_74 = arith.constant 7 : index
    %c0_75 = arith.constant 0 : index
    %67 = vector.load %arg10[%c0_73, %c7_74, %c0_75] : memref<18x32x32xf32, #tpu.memory_space<vmem>>, vector<16x16x32xf32>
    %68 = vector.shape_cast %67 : vector<16x16x32xf32> to vector<256x32xf32>
    %c0_76 = arith.constant 0 : index
    %c0_77 = arith.constant 0 : index
    %c0_78 = arith.constant 0 : index
    %69 = vector.load %arg4[%c0_76, %c0_77, %c0_78] : memref<9x32x32xf32, #tpu.memory_space<vmem>>, vector<1x32x32xf32>
    %70 = vector.shape_cast %69 : vector<1x32x32xf32> to vector<32x32xf32>
    %cst_79 = arith.constant dense<0.000000e+00> : vector<256x32xf32>
    %71 = tpu.matmul %68, %70, %cst_79 {dimension_numbers = #tpu.dot_dimension_numbers<[1], [0], [0], [1], [0, 0, 1, 1], [], []>} : vector<256x32xf32>, vector<32x32xf32>, vector<256x32xf32> -> vector<256x32xf32>
    %c0_80 = arith.constant 0 : index
    %c8_81 = arith.constant 8 : index
    %c0_82 = arith.constant 0 : index
    %72 = vector.load %arg10[%c0_80, %c8_81, %c0_82] : memref<18x32x32xf32, #tpu.memory_space<vmem>>, vector<16x16x32xf32>
    %73 = vector.shape_cast %72 : vector<16x16x32xf32> to vector<256x32xf32>
    %c1_83 = arith.constant 1 : index
    %c0_84 = arith.constant 0 : index
    %c0_85 = arith.constant 0 : index
    %74 = vector.load %arg4[%c1_83, %c0_84, %c0_85] : memref<9x32x32xf32, #tpu.memory_space<vmem>>, vector<1x32x32xf32>
    %75 = vector.shape_cast %74 : vector<1x32x32xf32> to vector<32x32xf32>
    %cst_86 = arith.constant dense<0.000000e+00> : vector<256x32xf32>
    %76 = tpu.matmul %73, %75, %cst_86 {dimension_numbers = #tpu.dot_dimension_numbers<[1], [0], [0], [1], [0, 0, 1, 1], [], []>} : vector<256x32xf32>, vector<32x32xf32>, vector<256x32xf32> -> vector<256x32xf32>
    %c0_87 = arith.constant 0 : index
    %c9_88 = arith.constant 9 : index
    %c0_89 = arith.constant 0 : index
    %77 = vector.load %arg10[%c0_87, %c9_88, %c0_89] : memref<18x32x32xf32, #tpu.memory_space<vmem>>, vector<16x16x32xf32>
    %78 = vector.shape_cast %77 : vector<16x16x32xf32> to vector<256x32xf32>
    %c2_90 = arith.constant 2 : index
    %c0_91 = arith.constant 0 : index
    %c0_92 = arith.constant 0 : index
    %79 = vector.load %arg4[%c2_90, %c0_91, %c0_92] : memref<9x32x32xf32, #tpu.memory_space<vmem>>, vector<1x32x32xf32>
    %80 = vector.shape_cast %79 : vector<1x32x32xf32> to vector<32x32xf32>
    %cst_93 = arith.constant dense<0.000000e+00> : vector<256x32xf32>
    %81 = tpu.matmul %78, %80, %cst_93 {dimension_numbers = #tpu.dot_dimension_numbers<[1], [0], [0], [1], [0, 0, 1, 1], [], []>} : vector<256x32xf32>, vector<32x32xf32>, vector<256x32xf32> -> vector<256x32xf32>
    %c1_94 = arith.constant 1 : index
    %c7_95 = arith.constant 7 : index
    %c0_96 = arith.constant 0 : index
    %82 = vector.load %arg10[%c1_94, %c7_95, %c0_96] : memref<18x32x32xf32, #tpu.memory_space<vmem>>, vector<16x16x32xf32>
    %83 = vector.shape_cast %82 : vector<16x16x32xf32> to vector<256x32xf32>
    %c3_97 = arith.constant 3 : index
    %c0_98 = arith.constant 0 : index
    %c0_99 = arith.constant 0 : index
    %84 = vector.load %arg4[%c3_97, %c0_98, %c0_99] : memref<9x32x32xf32, #tpu.memory_space<vmem>>, vector<1x32x32xf32>
    %85 = vector.shape_cast %84 : vector<1x32x32xf32> to vector<32x32xf32>
    %cst_100 = arith.constant dense<0.000000e+00> : vector<256x32xf32>
    %86 = tpu.matmul %83, %85, %cst_100 {dimension_numbers = #tpu.dot_dimension_numbers<[1], [0], [0], [1], [0, 0, 1, 1], [], []>} : vector<256x32xf32>, vector<32x32xf32>, vector<256x32xf32> -> vector<256x32xf32>
    %c1_101 = arith.constant 1 : index
    %c8_102 = arith.constant 8 : index
    %c0_103 = arith.constant 0 : index
    %87 = vector.load %arg10[%c1_101, %c8_102, %c0_103] : memref<18x32x32xf32, #tpu.memory_space<vmem>>, vector<16x16x32xf32>
    %88 = vector.shape_cast %87 : vector<16x16x32xf32> to vector<256x32xf32>
    %c4_104 = arith.constant 4 : index
    %c0_105 = arith.constant 0 : index
    %c0_106 = arith.constant 0 : index
    %89 = vector.load %arg4[%c4_104, %c0_105, %c0_106] : memref<9x32x32xf32, #tpu.memory_space<vmem>>, vector<1x32x32xf32>
    %90 = vector.shape_cast %89 : vector<1x32x32xf32> to vector<32x32xf32>
    %cst_107 = arith.constant dense<0.000000e+00> : vector<256x32xf32>
    %91 = tpu.matmul %88, %90, %cst_107 {dimension_numbers = #tpu.dot_dimension_numbers<[1], [0], [0], [1], [0, 0, 1, 1], [], []>} : vector<256x32xf32>, vector<32x32xf32>, vector<256x32xf32> -> vector<256x32xf32>
    %c1_108 = arith.constant 1 : index
    %c9_109 = arith.constant 9 : index
    %c0_110 = arith.constant 0 : index
    %92 = vector.load %arg10[%c1_108, %c9_109, %c0_110] : memref<18x32x32xf32, #tpu.memory_space<vmem>>, vector<16x16x32xf32>
    %93 = vector.shape_cast %92 : vector<16x16x32xf32> to vector<256x32xf32>
    %c5_111 = arith.constant 5 : index
    %c0_112 = arith.constant 0 : index
    %c0_113 = arith.constant 0 : index
    %94 = vector.load %arg4[%c5_111, %c0_112, %c0_113] : memref<9x32x32xf32, #tpu.memory_space<vmem>>, vector<1x32x32xf32>
    %95 = vector.shape_cast %94 : vector<1x32x32xf32> to vector<32x32xf32>
    %cst_114 = arith.constant dense<0.000000e+00> : vector<256x32xf32>
    %96 = tpu.matmul %93, %95, %cst_114 {dimension_numbers = #tpu.dot_dimension_numbers<[1], [0], [0], [1], [0, 0, 1, 1], [], []>} : vector<256x32xf32>, vector<32x32xf32>, vector<256x32xf32> -> vector<256x32xf32>
    %c2_115 = arith.constant 2 : index
    %c7_116 = arith.constant 7 : index
    %c0_117 = arith.constant 0 : index
    %97 = vector.load %arg10[%c2_115, %c7_116, %c0_117] : memref<18x32x32xf32, #tpu.memory_space<vmem>>, vector<16x16x32xf32>
    %98 = vector.shape_cast %97 : vector<16x16x32xf32> to vector<256x32xf32>
    %c6_118 = arith.constant 6 : index
    %c0_119 = arith.constant 0 : index
    %c0_120 = arith.constant 0 : index
    %99 = vector.load %arg4[%c6_118, %c0_119, %c0_120] : memref<9x32x32xf32, #tpu.memory_space<vmem>>, vector<1x32x32xf32>
    %100 = vector.shape_cast %99 : vector<1x32x32xf32> to vector<32x32xf32>
    %cst_121 = arith.constant dense<0.000000e+00> : vector<256x32xf32>
    %101 = tpu.matmul %98, %100, %cst_121 {dimension_numbers = #tpu.dot_dimension_numbers<[1], [0], [0], [1], [0, 0, 1, 1], [], []>} : vector<256x32xf32>, vector<32x32xf32>, vector<256x32xf32> -> vector<256x32xf32>
    %c2_122 = arith.constant 2 : index
    %c8_123 = arith.constant 8 : index
    %c0_124 = arith.constant 0 : index
    %102 = vector.load %arg10[%c2_122, %c8_123, %c0_124] : memref<18x32x32xf32, #tpu.memory_space<vmem>>, vector<16x16x32xf32>
    %103 = vector.shape_cast %102 : vector<16x16x32xf32> to vector<256x32xf32>
    %c7_125 = arith.constant 7 : index
    %c0_126 = arith.constant 0 : index
    %c0_127 = arith.constant 0 : index
    %104 = vector.load %arg4[%c7_125, %c0_126, %c0_127] : memref<9x32x32xf32, #tpu.memory_space<vmem>>, vector<1x32x32xf32>
    %105 = vector.shape_cast %104 : vector<1x32x32xf32> to vector<32x32xf32>
    %cst_128 = arith.constant dense<0.000000e+00> : vector<256x32xf32>
    %106 = tpu.matmul %103, %105, %cst_128 {dimension_numbers = #tpu.dot_dimension_numbers<[1], [0], [0], [1], [0, 0, 1, 1], [], []>} : vector<256x32xf32>, vector<32x32xf32>, vector<256x32xf32> -> vector<256x32xf32>
    %c2_129 = arith.constant 2 : index
    %c9_130 = arith.constant 9 : index
    %c0_131 = arith.constant 0 : index
    %107 = vector.load %arg10[%c2_129, %c9_130, %c0_131] : memref<18x32x32xf32, #tpu.memory_space<vmem>>, vector<16x16x32xf32>
    %108 = vector.shape_cast %107 : vector<16x16x32xf32> to vector<256x32xf32>
    %c8_132 = arith.constant 8 : index
    %c0_133 = arith.constant 0 : index
    %c0_134 = arith.constant 0 : index
    %109 = vector.load %arg4[%c8_132, %c0_133, %c0_134] : memref<9x32x32xf32, #tpu.memory_space<vmem>>, vector<1x32x32xf32>
    %110 = vector.shape_cast %109 : vector<1x32x32xf32> to vector<32x32xf32>
    %cst_135 = arith.constant dense<0.000000e+00> : vector<256x32xf32>
    %111 = tpu.matmul %108, %110, %cst_135 {dimension_numbers = #tpu.dot_dimension_numbers<[1], [0], [0], [1], [0, 0, 1, 1], [], []>} : vector<256x32xf32>, vector<32x32xf32>, vector<256x32xf32> -> vector<256x32xf32>
    %112 = arith.addf %71, %76 : vector<256x32xf32>
    %113 = arith.addf %81, %86 : vector<256x32xf32>
    %114 = arith.addf %91, %96 : vector<256x32xf32>
    %115 = arith.addf %101, %106 : vector<256x32xf32>
    %116 = arith.addf %112, %113 : vector<256x32xf32>
    %117 = arith.addf %114, %115 : vector<256x32xf32>
    %118 = arith.addf %116, %117 : vector<256x32xf32>
    %119 = arith.addf %118, %111 : vector<256x32xf32>
    %c0_136 = arith.constant 0 : index
    %c0_137 = arith.constant 0 : index
    %120 = vector.load %arg5[%c0_136, %c0_137] : memref<1x32xf32, #tpu.memory_space<vmem>>, vector<1x32xf32>
    %121 = vector.broadcast %120 : vector<1x32xf32> to vector<256x32xf32>
    %122 = arith.addf %119, %121 : vector<256x32xf32>
    %cst_138 = arith.constant 0.000000e+00 : f32
    %123 = vector.broadcast %cst_138 : f32 to vector<256x32xf32>
    %124 = arith.maximumf %122, %123 : vector<256x32xf32>
    %125 = vector.shape_cast %124 : vector<256x32xf32> to vector<16x16x32xf32>
    %c1_139 = arith.constant 1 : index
    %c8_140 = arith.constant 8 : index
    %c0_141 = arith.constant 0 : index
    %126 = vector.load %arg10[%c1_139, %c8_140, %c0_141] : memref<18x32x32xf32, #tpu.memory_space<vmem>>, vector<16x16x32xf32>
    tpu.vector_store %arg10[%c1_139, %c8_140, %c0_141], %125 {strides = array<i32>} : memref<18x32x32xf32, #tpu.memory_space<vmem>>, vector<16x16x32xf32>,
    %c0_142 = arith.constant 0 : index
    %c7_143 = arith.constant 7 : index
    %c0_144 = arith.constant 0 : index
    %127 = vector.load %arg10[%c0_142, %c7_143, %c0_144] : memref<18x32x32xf32, #tpu.memory_space<vmem>>, vector<16x16x32xf32>
    %128 = vector.shape_cast %127 : vector<16x16x32xf32> to vector<256x32xf32>
    %c0_145 = arith.constant 0 : index
    %c0_146 = arith.constant 0 : index
    %c0_147 = arith.constant 0 : index
    %129 = vector.load %arg6[%c0_145, %c0_146, %c0_147] : memref<9x32x32xf32, #tpu.memory_space<vmem>>, vector<1x32x32xf32>
    %130 = vector.shape_cast %129 : vector<1x32x32xf32> to vector<32x32xf32>
    %cst_148 = arith.constant dense<0.000000e+00> : vector<256x32xf32>
    %131 = tpu.matmul %128, %130, %cst_148 {dimension_numbers = #tpu.dot_dimension_numbers<[1], [0], [0], [1], [0, 0, 1, 1], [], []>} : vector<256x32xf32>, vector<32x32xf32>, vector<256x32xf32> -> vector<256x32xf32>
    %c0_149 = arith.constant 0 : index
    %c8_150 = arith.constant 8 : index
    %c0_151 = arith.constant 0 : index
    %132 = vector.load %arg10[%c0_149, %c8_150, %c0_151] : memref<18x32x32xf32, #tpu.memory_space<vmem>>, vector<16x16x32xf32>
    %133 = vector.shape_cast %132 : vector<16x16x32xf32> to vector<256x32xf32>
    %c1_152 = arith.constant 1 : index
    %c0_153 = arith.constant 0 : index
    %c0_154 = arith.constant 0 : index
    %134 = vector.load %arg6[%c1_152, %c0_153, %c0_154] : memref<9x32x32xf32, #tpu.memory_space<vmem>>, vector<1x32x32xf32>
    %135 = vector.shape_cast %134 : vector<1x32x32xf32> to vector<32x32xf32>
    %cst_155 = arith.constant dense<0.000000e+00> : vector<256x32xf32>
    %136 = tpu.matmul %133, %135, %cst_155 {dimension_numbers = #tpu.dot_dimension_numbers<[1], [0], [0], [1], [0, 0, 1, 1], [], []>} : vector<256x32xf32>, vector<32x32xf32>, vector<256x32xf32> -> vector<256x32xf32>
    %c0_156 = arith.constant 0 : index
    %c9_157 = arith.constant 9 : index
    %c0_158 = arith.constant 0 : index
    %137 = vector.load %arg10[%c0_156, %c9_157, %c0_158] : memref<18x32x32xf32, #tpu.memory_space<vmem>>, vector<16x16x32xf32>
    %138 = vector.shape_cast %137 : vector<16x16x32xf32> to vector<256x32xf32>
    %c2_159 = arith.constant 2 : index
    %c0_160 = arith.constant 0 : index
    %c0_161 = arith.constant 0 : index
    %139 = vector.load %arg6[%c2_159, %c0_160, %c0_161] : memref<9x32x32xf32, #tpu.memory_space<vmem>>, vector<1x32x32xf32>
    %140 = vector.shape_cast %139 : vector<1x32x32xf32> to vector<32x32xf32>
    %cst_162 = arith.constant dense<0.000000e+00> : vector<256x32xf32>
    %141 = tpu.matmul %138, %140, %cst_162 {dimension_numbers = #tpu.dot_dimension_numbers<[1], [0], [0], [1], [0, 0, 1, 1], [], []>} : vector<256x32xf32>, vector<32x32xf32>, vector<256x32xf32> -> vector<256x32xf32>
    %c1_163 = arith.constant 1 : index
    %c7_164 = arith.constant 7 : index
    %c0_165 = arith.constant 0 : index
    %142 = vector.load %arg10[%c1_163, %c7_164, %c0_165] : memref<18x32x32xf32, #tpu.memory_space<vmem>>, vector<16x16x32xf32>
    %143 = vector.shape_cast %142 : vector<16x16x32xf32> to vector<256x32xf32>
    %c3_166 = arith.constant 3 : index
    %c0_167 = arith.constant 0 : index
    %c0_168 = arith.constant 0 : index
    %144 = vector.load %arg6[%c3_166, %c0_167, %c0_168] : memref<9x32x32xf32, #tpu.memory_space<vmem>>, vector<1x32x32xf32>
    %145 = vector.shape_cast %144 : vector<1x32x32xf32> to vector<32x32xf32>
    %cst_169 = arith.constant dense<0.000000e+00> : vector<256x32xf32>
    %146 = tpu.matmul %143, %145, %cst_169 {dimension_numbers = #tpu.dot_dimension_numbers<[1], [0], [0], [1], [0, 0, 1, 1], [], []>} : vector<256x32xf32>, vector<32x32xf32>, vector<256x32xf32> -> vector<256x32xf32>
    %c1_170 = arith.constant 1 : index
    %c8_171 = arith.constant 8 : index
    %c0_172 = arith.constant 0 : index
    %147 = vector.load %arg10[%c1_170, %c8_171, %c0_172] : memref<18x32x32xf32, #tpu.memory_space<vmem>>, vector<16x16x32xf32>
    %148 = vector.shape_cast %147 : vector<16x16x32xf32> to vector<256x32xf32>
    %c4_173 = arith.constant 4 : index
    %c0_174 = arith.constant 0 : index
    %c0_175 = arith.constant 0 : index
    %149 = vector.load %arg6[%c4_173, %c0_174, %c0_175] : memref<9x32x32xf32, #tpu.memory_space<vmem>>, vector<1x32x32xf32>
    %150 = vector.shape_cast %149 : vector<1x32x32xf32> to vector<32x32xf32>
    %cst_176 = arith.constant dense<0.000000e+00> : vector<256x32xf32>
    %151 = tpu.matmul %148, %150, %cst_176 {dimension_numbers = #tpu.dot_dimension_numbers<[1], [0], [0], [1], [0, 0, 1, 1], [], []>} : vector<256x32xf32>, vector<32x32xf32>, vector<256x32xf32> -> vector<256x32xf32>
    %c1_177 = arith.constant 1 : index
    %c9_178 = arith.constant 9 : index
    %c0_179 = arith.constant 0 : index
    %152 = vector.load %arg10[%c1_177, %c9_178, %c0_179] : memref<18x32x32xf32, #tpu.memory_space<vmem>>, vector<16x16x32xf32>
    %153 = vector.shape_cast %152 : vector<16x16x32xf32> to vector<256x32xf32>
    %c5_180 = arith.constant 5 : index
    %c0_181 = arith.constant 0 : index
    %c0_182 = arith.constant 0 : index
    %154 = vector.load %arg6[%c5_180, %c0_181, %c0_182] : memref<9x32x32xf32, #tpu.memory_space<vmem>>, vector<1x32x32xf32>
    %155 = vector.shape_cast %154 : vector<1x32x32xf32> to vector<32x32xf32>
    %cst_183 = arith.constant dense<0.000000e+00> : vector<256x32xf32>
    %156 = tpu.matmul %153, %155, %cst_183 {dimension_numbers = #tpu.dot_dimension_numbers<[1], [0], [0], [1], [0, 0, 1, 1], [], []>} : vector<256x32xf32>, vector<32x32xf32>, vector<256x32xf32> -> vector<256x32xf32>
    %c2_184 = arith.constant 2 : index
    %c7_185 = arith.constant 7 : index
    %c0_186 = arith.constant 0 : index
    %157 = vector.load %arg10[%c2_184, %c7_185, %c0_186] : memref<18x32x32xf32, #tpu.memory_space<vmem>>, vector<16x16x32xf32>
    %158 = vector.shape_cast %157 : vector<16x16x32xf32> to vector<256x32xf32>
    %c6_187 = arith.constant 6 : index
    %c0_188 = arith.constant 0 : index
    %c0_189 = arith.constant 0 : index
    %159 = vector.load %arg6[%c6_187, %c0_188, %c0_189] : memref<9x32x32xf32, #tpu.memory_space<vmem>>, vector<1x32x32xf32>
    %160 = vector.shape_cast %159 : vector<1x32x32xf32> to vector<32x32xf32>
    %cst_190 = arith.constant dense<0.000000e+00> : vector<256x32xf32>
    %161 = tpu.matmul %158, %160, %cst_190 {dimension_numbers = #tpu.dot_dimension_numbers<[1], [0], [0], [1], [0, 0, 1, 1], [], []>} : vector<256x32xf32>, vector<32x32xf32>, vector<256x32xf32> -> vector<256x32xf32>
    %c2_191 = arith.constant 2 : index
    %c8_192 = arith.constant 8 : index
    %c0_193 = arith.constant 0 : index
    %162 = vector.load %arg10[%c2_191, %c8_192, %c0_193] : memref<18x32x32xf32, #tpu.memory_space<vmem>>, vector<16x16x32xf32>
    %163 = vector.shape_cast %162 : vector<16x16x32xf32> to vector<256x32xf32>
    %c7_194 = arith.constant 7 : index
    %c0_195 = arith.constant 0 : index
    %c0_196 = arith.constant 0 : index
    %164 = vector.load %arg6[%c7_194, %c0_195, %c0_196] : memref<9x32x32xf32, #tpu.memory_space<vmem>>, vector<1x32x32xf32>
    %165 = vector.shape_cast %164 : vector<1x32x32xf32> to vector<32x32xf32>
    %cst_197 = arith.constant dense<0.000000e+00> : vector<256x32xf32>
    %166 = tpu.matmul %163, %165, %cst_197 {dimension_numbers = #tpu.dot_dimension_numbers<[1], [0], [0], [1], [0, 0, 1, 1], [], []>} : vector<256x32xf32>, vector<32x32xf32>, vector<256x32xf32> -> vector<256x32xf32>
    %c2_198 = arith.constant 2 : index
    %c9_199 = arith.constant 9 : index
    %c0_200 = arith.constant 0 : index
    %167 = vector.load %arg10[%c2_198, %c9_199, %c0_200] : memref<18x32x32xf32, #tpu.memory_space<vmem>>, vector<16x16x32xf32>
    %168 = vector.shape_cast %167 : vector<16x16x32xf32> to vector<256x32xf32>
    %c8_201 = arith.constant 8 : index
    %c0_202 = arith.constant 0 : index
    %c0_203 = arith.constant 0 : index
    %169 = vector.load %arg6[%c8_201, %c0_202, %c0_203] : memref<9x32x32xf32, #tpu.memory_space<vmem>>, vector<1x32x32xf32>
    %170 = vector.shape_cast %169 : vector<1x32x32xf32> to vector<32x32xf32>
    %cst_204 = arith.constant dense<0.000000e+00> : vector<256x32xf32>
    %171 = tpu.matmul %168, %170, %cst_204 {dimension_numbers = #tpu.dot_dimension_numbers<[1], [0], [0], [1], [0, 0, 1, 1], [], []>} : vector<256x32xf32>, vector<32x32xf32>, vector<256x32xf32> -> vector<256x32xf32>
    %172 = arith.addf %131, %136 : vector<256x32xf32>
    %173 = arith.addf %141, %146 : vector<256x32xf32>
    %174 = arith.addf %151, %156 : vector<256x32xf32>
    %175 = arith.addf %161, %166 : vector<256x32xf32>
    %176 = arith.addf %172, %173 : vector<256x32xf32>
    %177 = arith.addf %174, %175 : vector<256x32xf32>
    %178 = arith.addf %176, %177 : vector<256x32xf32>
    %179 = arith.addf %178, %171 : vector<256x32xf32>
    %c0_205 = arith.constant 0 : index
    %c0_206 = arith.constant 0 : index
    %180 = vector.load %arg7[%c0_205, %c0_206] : memref<1x32xf32, #tpu.memory_space<vmem>>, vector<1x32xf32>
    %181 = vector.broadcast %180 : vector<1x32xf32> to vector<256x32xf32>
    %182 = arith.addf %179, %181 : vector<256x32xf32>
    %183 = vector.shape_cast %182 : vector<256x32xf32> to vector<1x256x32xf32>
    %c0_207 = arith.constant 0 : index
    %c0_208 = arith.constant 0 : index
    %c0_209 = arith.constant 0 : index
    %184 = vector.load %arg8[%c0_207, %c0_208, %c0_209] : memref<1x256x32xf32, #tpu.memory_space<vmem>>, vector<1x256x32xf32>
    tpu.vector_store %arg8[%c0_207, %c0_208, %c0_209], %183 {strides = array<i32>} : memref<1x256x32xf32, #tpu.memory_space<vmem>>, vector<1x256x32xf32>,
    return
  }
  func.func @transform_0(%arg0: i32) -> (i32, i32, i32, i32) {
    %c0_i32 = arith.constant 0 : i32
    %c0_i32_0 = arith.constant 0 : i32
    %c0_i32_1 = arith.constant 0 : i32
    %c0_i32_2 = arith.constant 0 : i32
    return %arg0, %c0_i32, %c0_i32_0, %c0_i32_1 : i32, i32, i32, i32
  }
  func.func @transform_1(%arg0: i32) -> (i32, i32, i32) {
    %c0_i32 = arith.constant 0 : i32
    %c0_i32_0 = arith.constant 0 : i32
    %c0_i32_1 = arith.constant 0 : i32
    %c0_i32_2 = arith.constant 0 : i32
    return %c0_i32, %c0_i32_0, %c0_i32_1 : i32, i32, i32
  }
  func.func @transform_2(%arg0: i32) -> (i32, i32) {
    %c0_i32 = arith.constant 0 : i32
    %c0_i32_0 = arith.constant 0 : i32
    %c0_i32_1 = arith.constant 0 : i32
    return %c0_i32, %c0_i32_0 : i32, i32
  }
  func.func @transform_3(%arg0: i32) -> (i32, i32, i32) {
    %c0_i32 = arith.constant 0 : i32
    %c0_i32_0 = arith.constant 0 : i32
    %c0_i32_1 = arith.constant 0 : i32
    %c0_i32_2 = arith.constant 0 : i32
    return %c0_i32, %c0_i32_0, %c0_i32_1 : i32, i32, i32
  }
  func.func @transform_4(%arg0: i32) -> (i32, i32) {
    %c0_i32 = arith.constant 0 : i32
    %c0_i32_0 = arith.constant 0 : i32
    %c0_i32_1 = arith.constant 0 : i32
    return %c0_i32, %c0_i32_0 : i32, i32
  }
  func.func @transform_5(%arg0: i32) -> (i32, i32, i32) {
    %c0_i32 = arith.constant 0 : i32
    %c0_i32_0 = arith.constant 0 : i32
    %c0_i32_1 = arith.constant 0 : i32
    %c0_i32_2 = arith.constant 0 : i32
    return %c0_i32, %c0_i32_0, %c0_i32_1 : i32, i32, i32
  }
  func.func @transform_6(%arg0: i32) -> (i32, i32) {
    %c0_i32 = arith.constant 0 : i32
    %c0_i32_0 = arith.constant 0 : i32
    %c0_i32_1 = arith.constant 0 : i32
    return %c0_i32, %c0_i32_0 : i32, i32
  }
  func.func @transform_7(%arg0: i32) -> (i32, i32, i32) {
    %c0_i32 = arith.constant 0 : i32
    %c0_i32_0 = arith.constant 0 : i32
    %c0_i32_1 = arith.constant 0 : i32
    return %arg0, %c0_i32, %c0_i32_0 : i32, i32, i32
  }
}

</mosaic_0001>

<bundles_post_ra>
// kernel: tpu_custom_call.1
= control target key start
LH: loop header
LB: loop body
LE: loop exit
PB: predicated region body
PF: predicated region fallthrough
CT: control target
= control target key end

     0   :  { %s15209_s24 = smov 0   ;;  %s18346_s0 = inlined_call_operand.vmem [shape: f32[2,16,16,4], index: 0, kind: input, shape index: {}]   ;;  %s18347_s1 = inlined_call_operand.vmem [shape: f32[9,4,32], index: 1, kind: input, shape index: {}]   ;;  %s18348_s2 = inlined_call_operand.vmem [shape: f32[1,32], index: 2, kind: input, shape index: {}]   ;;  %s18349_s3 = inlined_call_operand.vmem [shape: f32[9,32,32], index: 3, kind: input, shape index: {}]   ;;  %s18350_s4 = inlined_call_operand.vmem [shape: f32[1,32], index: 4, kind: input, shape index: {}]   ;;  %s18351_s5 = inlined_call_operand.vmem [shape: f32[9,32,32], index: 5, kind: input, shape index: {}]   ;;  %s18352_s6 = inlined_call_operand.vmem [shape: f32[1,32], index: 6, kind: input, shape index: {}]   ;;  %s18353_s7 = inlined_call_operand.vmem [shape: f32[2,256,32], index: 7, kind: output, shape index: {}]  }
   0x1 LB: > { %s10873_s25 = sadd.s32 4294967295, %s15166_s24   ;;  %p10877_p0 = scmp.ge.s32.totalorder %s15166_s24, 1  ;;  %s15166_s24 = sphi %s15209_s24, %s17_s24  }
   0x2   : > { %p237_p1 = scmp.lt.s32.totalorder %s15166_s24, 3 }
   0x4   : > { %p238_p2 = pnand %p10877_p0, %p237_p1 }
   0x6   : > { %241 = sbr.rel (%p238_p2) target bundleno = 2030 (0x7ee), region = 48 }
   0xd   : > { %v15220_v0 = vld [vmem:[%s18347_s1 + $0x4] sm:$0xf]  ;;  %vm580_vm0 = vcmask 1043456   ;;  %vm279_vm1 = vcmask 31744   ;;  %p15224_p3 = scmp.lt.s32.totalorder %s10873_s25, 1  ;;  %v18354_v1 = vmov 0.0  }
   0xe   : > { %12779 = vmatprep.subr.msk.mxu1 %vm580_vm0, %v15220_v0  ;;  %281 = vst.msk [vmem:[#allocation2 + $0x8] sm:$0xff] %vm279_vm1, %v18354_v1  ;;  %280 = vst.msk [vmem:[#allocation2] sm:$0xff] %vm279_vm1, %v18354_v1  ;;  %v15377_v2 = vld [vmem:[%s18347_s1 + $0x20] sm:$0xf]  ;;  %v10917_v3 = vld [vmem:[%s18347_s1 + $0xc] sm:$0xf] }
   0xf   : > { %282 = vst.msk [vmem:[#allocation2 + $0x10] sm:$0xff] %vm279_vm1, %v18354_v1  ;;  %283 = vst.msk [vmem:[#allocation2 + $0x18] sm:$0xff] %vm279_vm1, %v18354_v1  ;;  %v15385_v4 = vld [vmem:[%s18347_s1] sm:$0xf]  ;;  %12780 = vmatpush3.msk.msra.mxu1 %vm580_vm0, %v15220_v0  ;;  %12979 = vmatprep.subr.msk.mxu0 %vm580_vm0, %v15377_v2  ;;  %s18691_s25 = smov (!%p15224_p3, %s10873_s25), 1  ;;  %vm3839_vm2 = vcmask 261120  }
  0x10   : > { %284 = vst.msk [vmem:[#allocation2 + $0x20] sm:$0xff] %vm279_vm1, %v18354_v1  ;;  %285 = vst.msk [vmem:[#allocation2 + $0x28] sm:$0xff] %vm279_vm1, %v18354_v1  ;;  %12980 = vmatpush3.msk.msra.mxu0 %vm580_vm0, %v15377_v2  ;;  %12829 = vmatprep.subr.msk.mxu1 %vm580_vm0, %v10917_v3  ;;  %s11832_s12 = sshll.u32 %s18691_s25, 8  ;;  %v15422_v11 = vld [vmem:[%s18347_s1 + $0x14] sm:$0xf] }
  0x11   : > { %286 = vst.msk [vmem:[#allocation2 + $0x30] sm:$0xff] %vm279_vm1, %v18354_v1  ;;  %287 = vst.msk [vmem:[#allocation2 + $0x38] sm:$0xff] %vm279_vm1, %v18354_v1  ;;  %13029 = vmatprep.subr.msk.mxu0 %vm580_vm0, %v15385_v4  ;;  %s15408_s15 = scalar_lea.vmem %s18346_s0, %s11832_s12  ;;  %v15459_v26 = vld [vmem:[%s18347_s1 + $0x8] sm:$0xf]  ;;  %s18245_s18 = scalar_lea.vmem %s18353_s7, %s11832_s12 }
  0x12   : > { %288 = vst.msk [vmem:[#allocation2 + $0x40] sm:$0xff] %vm279_vm1, %v18354_v1  ;;  %289 = vst.msk [vmem:[#allocation2 + $0x48] sm:$0xff] %vm279_vm1, %v18354_v1  ;;  %v352_v5 = vld [vmem:[%s15408_s15] sm:$0xff]  ;;  %v354_v6 = vld [vmem:[%s15408_s15 + $0x10] sm:$0xff] }
  0x13   : > { %290 = vst.msk [vmem:[#allocation2 + $0x50] sm:$0xff] %vm279_vm1, %v18354_v1  ;;  %291 = vst.msk [vmem:[#allocation2 + $0x58] sm:$0xff] %vm279_vm1, %v18354_v1  ;;  %v355_v7 = vld [vmem:[%s15408_s15 + $0x18] sm:$0xff]  ;;  %v353_v8 = vld [vmem:[%s15408_s15 + $0x8] sm:$0xff] }
  0x14   : > { %292 = vst.msk [vmem:[#allocation2 + $0x60] sm:$0xff] %vm279_vm1, %v18354_v1  ;;  %293 = vst.msk [vmem:[#allocation2 + $0x68] sm:$0xff] %vm279_vm1, %v18354_v1  ;;  %v356_v9 = vld [vmem:[%s15408_s15 + $0x20] sm:$0xff]  ;;  %v357_v10 = vld [vmem:[%s15408_s15 + $0x28] sm:$0xff] }
  0x15   : > { %294 = vst.msk [vmem:[#allocation2 + $0x70] sm:$0xff] %vm279_vm1, %v18354_v1  ;;  %295 = vst.msk [vmem:[#allocation2 + $0x78] sm:$0xff] %vm279_vm1, %v18354_v1  ;;  %v450_v12 = vld [vmem:[#allocation2 + $0x8] sm:$0xff]  ;;  %v358_v14 = vld [vmem:[%s15408_s15 + $0x30] sm:$0xff] }
  0x16   : > { %296 = vst.msk [vmem:[#allocation2 + $0x80] sm:$0xff] %vm279_vm1, %v18354_v1  ;;  %297 = vst.msk [vmem:[#allocation2 + $0x88] sm:$0xff] %vm279_vm1, %v18354_v1  ;;  %v451_v13 = vld [vmem:[#allocation2 + $0x10] sm:$0xff]  ;;  %12781 = vmatprep.mubr.msk.f32.mxu1 %vm279_vm1, %v450_v12  ;;  %v359_v15 = vld [vmem:[%s15408_s15 + $0x38] sm:$0xff] }
  0x17   : > { %298 = vst.msk [vmem:[#allocation2 + $0x90] sm:$0xff] %vm279_vm1, %v18354_v1  ;;  %299 = vst.msk [vmem:[#allocation2 + $0x98] sm:$0xff] %vm279_vm1, %v18354_v1  ;;  %v360_v16 = vld [vmem:[%s15408_s15 + $0x40] sm:$0xff]  ;;  %v361_v17 = vld [vmem:[%s15408_s15 + $0x48] sm:$0xff]  ;;  %12782 = vmatmul.mubr.msk.f32.vlgmr.msra.gmra.mrb[0].mxu1 %vm279_vm1, %v451_v13 }
  0x18   : > { %300 = vst.msk [vmem:[#allocation2 + $0xa0] sm:$0xff] %vm279_vm1, %v18354_v1  ;;  %301 = vst.msk [vmem:[#allocation2 + $0xa8] sm:$0xff] %vm279_vm1, %v18354_v1  ;;  %v362_v18 = vld [vmem:[%s15408_s15 + $0x50] sm:$0xff]  ;;  %v363_v19 = vld [vmem:[%s15408_s15 + $0x58] sm:$0xff]  ;;  %12830 = vmatpush3.msk.msra.mxu1 %vm580_vm0, %v10917_v3 }
  0x19   : > { %302 = vst.msk [vmem:[#allocation2 + $0xb0] sm:$0xff] %vm279_vm1, %v18354_v1  ;;  %303 = vst.msk [vmem:[#allocation2 + $0xb8] sm:$0xff] %vm279_vm1, %v18354_v1  ;;  %v364_v20 = vld [vmem:[%s15408_s15 + $0x60] sm:$0xff]  ;;  %v365_v21 = vld [vmem:[%s15408_s15 + $0x68] sm:$0xff]  ;;  %12879 = vmatprep.subr.msk.mxu1 %vm580_vm0, %v15422_v11 }
  0x1a   : > { %304 = vst.msk [vmem:[#allocation2 + $0xc0] sm:$0xff] %vm279_vm1, %v18354_v1  ;;  %305 = vst.msk [vmem:[#allocation2 + $0xc8] sm:$0xff] %vm279_vm1, %v18354_v1  ;;  %v366_v22 = vld [vmem:[%s15408_s15 + $0x70] sm:$0xff]  ;;  %v367_v23 = vld [vmem:[%s15408_s15 + $0x78] sm:$0xff] }
  0x1b   : > { %306 = vst.msk [vmem:[#allocation2 + $0xd0] sm:$0xff] %vm279_vm1, %v18354_v1  ;;  %307 = vst.msk [vmem:[#allocation2 + $0xd8] sm:$0xff] %vm279_vm1, %v18354_v1  ;;  %v368_v24 = vld [vmem:[%s15408_s15 + $0x80] sm:$0xff]  ;;  %v369_v25 = vld [vmem:[%s15408_s15 + $0x88] sm:$0xff] }
  0x1c   : > { %308 = vst.msk [vmem:[#allocation2 + $0xe0] sm:$0xff] %vm279_vm1, %v18354_v1  ;;  %309 = vst.msk [vmem:[#allocation2 + $0xe8] sm:$0xff] %vm279_vm1, %v18354_v1  ;;  %v370_v27 = vld [vmem:[%s15408_s15 + $0x90] sm:$0xff]  ;;  %v371_v28 = vld [vmem:[%s15408_s15 + $0x98] sm:$0xff] }
  0x1d   : > { %310 = vst.msk [vmem:[#allocation2 + $0xf0] sm:$0xff] %vm279_vm1, %v18354_v1  ;;  %311 = vst.msk [vmem:[#allocation2 + $0xf8] sm:$0xff] %vm279_vm1, %v18354_v1  ;;  %v372_v47 = vld [vmem:[%s15408_s15 + $0xa0] sm:$0xff]  ;;  %v373_v48 = vld [vmem:[%s15408_s15 + $0xa8] sm:$0xff] }
  0x1e   : > { %312 = vst.msk [vmem:[#allocation2 + $0x100] sm:$0xff] %vm279_vm1, %v18354_v1  ;;  %313 = vst.msk [vmem:[#allocation2 + $0x108] sm:$0xff] %vm279_vm1, %v18354_v1  ;;  %v374_v50 = vld [vmem:[%s15408_s15 + $0xb0] sm:$0xff]  ;;  %v375_v51 = vld [vmem:[%s15408_s15 + $0xb8] sm:$0xff] }
  0x1f   : > { %314 = vst.msk [vmem:[#allocation2 + $0x110] sm:$0xff] %vm279_vm1, %v18354_v1  ;;  %315 = vst.msk [vmem:[#allocation2 + $0x118] sm:$0xff] %vm279_vm1, %v18354_v1  ;;  %v376_v54 = vld [vmem:[%s15408_s15 + $0xc0] sm:$0xff]  ;;  %v377_v56 = vld [vmem:[%s15408_s15 + $0xc8] sm:$0xff] }
  0x20   : > { %316 = vst.msk [vmem:[#allocation2 + $0x120] sm:$0xff] %vm279_vm1, %v18354_v1  ;;  %317 = vst.msk [vmem:[#allocation2 + $0x128] sm:$0xff] %vm279_vm1, %v18354_v1  ;;  %v378_v57 = vld [vmem:[%s15408_s15 + $0xd0] sm:$0xff]  ;;  %v379_v58 = vld [vmem:[%s15408_s15 + $0xd8] sm:$0xff] }
  0x21   : > { %318 = vst.msk [vmem:[#allocation2 + $0x130] sm:$0xff] %vm279_vm1, %v18354_v1  ;;  %319 = vst.msk [vmem:[#allocation2 + $0x138] sm:$0xff] %vm279_vm1, %v18354_v1  ;;  %v380_v59 = vld [vmem:[%s15408_s15 + $0xe0] sm:$0xff]  ;;  %v381_v60 = vld [vmem:[%s15408_s15 + $0xe8] sm:$0xff] }
  0x22   : > { %320 = vst.msk [vmem:[#allocation2 + $0x140] sm:$0xff] %vm279_vm1, %v18354_v1  ;;  %321 = vst.msk [vmem:[#allocation2 + $0x148] sm:$0xff] %vm279_vm1, %v18354_v1  ;;  %v382_v12 = vld [vmem:[%s15408_s15 + $0xf0] sm:$0xff]  ;;  %v383_v13 = vld [vmem:[%s15408_s15 + $0xf8] sm:$0xff] }
  0x23   : > { %322 = vst.msk [vmem:[#allocation2 + $0x150] sm:$0xff] %vm279_vm1, %v18354_v1  ;;  %323 = vst.msk [vmem:[#allocation2 + $0x158] sm:$0xff] %vm279_vm1, %v18354_v1 }
  0x24   : > { %324 = vst.msk [vmem:[#allocation2 + $0x160] sm:$0xff] %vm279_vm1, %v18354_v1  ;;  %325 = vst.msk [vmem:[#allocation2 + $0x168] sm:$0xff] %vm279_vm1, %v18354_v1 }
  0x25   : > { %326 = vst.msk [vmem:[#allocation2 + $0x170] sm:$0xff] %vm279_vm1, %v18354_v1  ;;  %327 = vst.msk [vmem:[#allocation2 + $0x178] sm:$0xff] %vm279_vm1, %v18354_v1 }
  0x26   : > { %328 = vst.msk [vmem:[#allocation2 + $0x180] sm:$0xff] %vm279_vm1, %v18354_v1  ;;  %329 = vst.msk [vmem:[#allocation2 + $0x188] sm:$0xff] %vm279_vm1, %v18354_v1 }
  0x27   : > { %330 = vst.msk [vmem:[#allocation2 + $0x190] sm:$0xff] %vm279_vm1, %v18354_v1  ;;  %331 = vst.msk [vmem:[#allocation2 + $0x198] sm:$0xff] %vm279_vm1, %v18354_v1 }
  0x28   : > { %332 = vst.msk [vmem:[#allocation2 + $0x1a0] sm:$0xff] %vm279_vm1, %v18354_v1  ;;  %333 = vst.msk [vmem:[#allocation2 + $0x1a8] sm:$0xff] %vm279_vm1, %v18354_v1 }
  0x29   : > { %334 = vst.msk [vmem:[#allocation2 + $0x1b0] sm:$0xff] %vm279_vm1, %v18354_v1  ;;  %335 = vst.msk [vmem:[#allocation2 + $0x1b8] sm:$0xff] %vm279_vm1, %v18354_v1 }
  0x2a   : > { %336 = vst.msk [vmem:[#allocation2 + $0x1c0] sm:$0xff] %vm279_vm1, %v18354_v1  ;;  %337 = vst.msk [vmem:[#allocation2 + $0x1c8] sm:$0xff] %vm279_vm1, %v18354_v1 }
  0x2b   : > { %338 = vst.msk [vmem:[#allocation2 + $0x1d0] sm:$0xff] %vm279_vm1, %v18354_v1  ;;  %339 = vst.msk [vmem:[#allocation2 + $0x1d8] sm:$0xff] %vm279_vm1, %v18354_v1 }
  0x2c   : > { %340 = vst.msk [vmem:[#allocation2 + $0x1e0] sm:$0xff] %vm279_vm1, %v18354_v1  ;;  %341 = vst.msk [vmem:[#allocation2 + $0x1e8] sm:$0xff] %vm279_vm1, %v18354_v1 }
  0x2d   : > { %342 = vst.msk [vmem:[#allocation2 + $0x1f0] sm:$0xff] %vm279_vm1, %v18354_v1  ;;  %343 = vst.msk [vmem:[#allocation2 + $0x1f8] sm:$0xff] %vm279_vm1, %v18354_v1 }
  0x2e   : > { %344 = vst.msk [vmem:[#allocation2 + $0x200] sm:$0xff] %vm279_vm1, %v18354_v1  ;;  %345 = vst.msk [vmem:[#allocation2 + $0x208] sm:$0xff] %vm279_vm1, %v18354_v1 }
  0x2f   : > { %346 = vst.msk [vmem:[#allocation2 + $0x210] sm:$0xff] %vm279_vm1, %v18354_v1  ;;  %347 = vst.msk [vmem:[#allocation2 + $0x218] sm:$0xff] %vm279_vm1, %v18354_v1 }
  0x30   : > { %348 = vst.msk [vmem:[#allocation2 + $0x220] sm:$0xff] %vm279_vm1, %v18354_v1  ;;  %349 = vst.msk [vmem:[#allocation2 + $0x228] sm:$0xff] %vm279_vm1, %v18354_v1 }
  0x31   : > { %350 = vst.msk [vmem:[#allocation2 + $0x230] sm:$0xff] %vm279_vm1, %v18354_v1  ;;  %351 = vst.msk [vmem:[#allocation2 + $0x238] sm:$0xff] %vm279_vm1, %v18354_v1 }
  0x32   : > { %385 = vst.msk [vmem:[#allocation2 + $0x28] sm:$0xff] %vm279_vm1, %v352_v5  ;;  %387 = vst.msk [vmem:[#allocation2 + $0x48] sm:$0xff] %vm279_vm1, %v354_v6 }
  0x33   : > { %388 = vst.msk [vmem:[#allocation2 + $0x50] sm:$0xff] %vm279_vm1, %v355_v7  ;;  %386 = vst.msk [vmem:[#allocation2 + $0x30] sm:$0xff] %vm279_vm1, %v353_v8 }
  0x34   : > { %389 = vst.msk [vmem:[#allocation2 + $0x68] sm:$0xff] %vm279_vm1, %v356_v9  ;;  %390 = vst.msk [vmem:[#allocation2 + $0x70] sm:$0xff] %vm279_vm1, %v357_v10  ;;  %v417_v10 = vld [vmem:[#allocation2 + $0x7] sm:$0xff] }
  0x35   : > { %391 = vst.msk [vmem:[#allocation2 + $0x88] sm:$0xff] %vm279_vm1, %v358_v14  ;;  %392 = vst.msk [vmem:[#allocation2 + $0x90] sm:$0xff] %vm279_vm1, %v359_v15  ;;  %v418_v15 = vld [vmem:[#allocation2 + $0xf] sm:$0xff] }
  0x36   : > { %393 = vst.msk [vmem:[#allocation2 + $0xa8] sm:$0xff] %vm279_vm1, %v360_v16  ;;  %394 = vst.msk [vmem:[#allocation2 + $0xb0] sm:$0xff] %vm279_vm1, %v361_v17 }
  0x37   : > { %395 = vst.msk [vmem:[#allocation2 + $0xc8] sm:$0xff] %vm279_vm1, %v362_v18  ;;  %396 = vst.msk [vmem:[#allocation2 + $0xd0] sm:$0xff] %vm279_vm1, %v363_v19  ;;  %v15633_v18 = vld [vmem:[%s18347_s1 + $0x10] sm:$0xf] }
  0x38   : > { %397 = vst.msk [vmem:[#allocation2 + $0xe8] sm:$0xff] %vm279_vm1, %v364_v20  ;;  %398 = vst.msk [vmem:[#allocation2 + $0xf0] sm:$0xff] %vm279_vm1, %v365_v21 }
  0x39   : > { %399 = vst.msk [vmem:[#allocation2 + $0x108] sm:$0xff] %vm279_vm1, %v366_v22  ;;  %400 = vst.msk [vmem:[#allocation2 + $0x110] sm:$0xff] %vm279_vm1, %v367_v23  ;;  %v15463_v29 = vld [vmem:[#allocation2 + $0x28] sm:$0xff] }
  0x3a   : > { %401 = vst.msk [vmem:[#allocation2 + $0x128] sm:$0xff] %vm279_vm1, %v368_v24  ;;  %402 = vst.msk [vmem:[#allocation2 + $0x130] sm:$0xff] %vm279_vm1, %v369_v25  ;;  %v15465_v30 = vld [vmem:[#allocation2 + $0x49] sm:$0xff]  ;;  %v15467_v31 = vld [vmem:[#allocation2 + $0x51] sm:$0xff]  ;;  %12784 = vmatprep.mubr.msk.f32.mxu1 %vm279_vm1, %v15463_v29 }
  0x3b   : > { %403 = vst.msk [vmem:[#allocation2 + $0x148] sm:$0xff] %vm279_vm1, %v370_v27  ;;  %404 = vst.msk [vmem:[#allocation2 + $0x150] sm:$0xff] %vm279_vm1, %v371_v28  ;;  %12981 = vmatprep.mubr.msk.f32.mxu0 %vm279_vm1, %v15465_v30  ;;  %v15475_v32 = vld [vmem:[#allocation2 + $0x30] sm:$0xff]  ;;  %v15477_v33 = vld [vmem:[#allocation2 + $0x48] sm:$0xff] }
  0x3c   : > { %v15479_v34 = vld [vmem:[#allocation2 + $0x69] sm:$0xff]  ;;  %12785 = vmatmul.mubr.msk.f32.gmra.mrb[2].mxu1 %vm279_vm1, %v15475_v32  ;;  %12982 = vmatmul.mubr.msk.f32.vlgmr.msra.gmra.mrb[0].mxu0 %vm279_vm1, %v15467_v31  ;;  %v15491_v36 = vld [vmem:[#allocation2 + $0x71] sm:$0xff]  ;;  %405 = vst.msk [vmem:[#allocation2 + $0x168] sm:$0xff] %vm279_vm1, %v372_v47  ;;  %406 = vst.msk [vmem:[#allocation2 + $0x170] sm:$0xff] %vm279_vm1, %v373_v48 }
  0x3d   : > { %13030 = vmatpush3.msk.msra.mxu0 %vm580_vm0, %v15385_v4  ;;  %12787 = vmatprep.mubr.msk.f32.mxu1 %vm279_vm1, %v15477_v33  ;;  %v15489_v35 = vld [vmem:[#allocation2 + $0x50] sm:$0xff]  ;;  %v15495_v37 = vld [vmem:[#allocation2 + $0x68] sm:$0xff]  ;;  %407 = vst.msk [vmem:[#allocation2 + $0x188] sm:$0xff] %vm279_vm1, %v374_v50  ;;  %408 = vst.msk [vmem:[#allocation2 + $0x190] sm:$0xff] %vm279_vm1, %v375_v51 }
  0x3e   : > { %12984 = vmatprep.mubr.msk.f32.mxu0 %vm279_vm1, %v15479_v34  ;;  %v15497_v38 = vld [vmem:[#allocation2 + $0x89] sm:$0xff]  ;;  %13079 = vmatprep.subr.msk.mxu0 %vm580_vm0, %v15459_v26  ;;  %v15511_v40 = vld [vmem:[#allocation2 + $0x91] sm:$0xff]  ;;  %409 = vst.msk [vmem:[#allocation2 + $0x1a8] sm:$0xff] %vm279_vm1, %v376_v54  ;;  %410 = vst.msk [vmem:[#allocation2 + $0x1b0] sm:$0xff] %vm279_vm1, %v377_v56 }
  0x3f   : > { %v15509_v39 = vld [vmem:[#allocation2 + $0x70] sm:$0xff]  ;;  %v15513_v41 = vld [vmem:[#allocation2 + $0x88] sm:$0xff]  ;;  %411 = vst.msk [vmem:[#allocation2 + $0x1c8] sm:$0xff] %vm279_vm1, %v378_v57  ;;  %412 = vst.msk [vmem:[#allocation2 + $0x1d0] sm:$0xff] %vm279_vm1, %v379_v58 }
  0x40   : > { %12788 = vmatmul.mubr.msk.f32.gmra.mrb[4].mxu1 %vm279_vm1, %v15489_v35  ;;  %12985 = vmatmul.mubr.msk.f32.gmra.mrb[2].mxu0 %vm279_vm1, %v15491_v36  ;;  %v15515_v42 = vld [vmem:[#allocation2 + $0xa9] sm:$0xff]  ;;  %v15527_v44 = vld [vmem:[#allocation2 + $0xb1] sm:$0xff]  ;;  %413 = vst.msk [vmem:[#allocation2 + $0x1e8] sm:$0xff] %vm279_vm1, %v380_v59  ;;  %414 = vst.msk [vmem:[#allocation2 + $0x1f0] sm:$0xff] %vm279_vm1, %v381_v60 }
  0x41   : > { %12790 = vmatprep.mubr.msk.f32.mxu1 %vm279_vm1, %v15495_v37  ;;  %12987 = vmatprep.mubr.msk.f32.mxu0 %vm279_vm1, %v15497_v38  ;;  %v15525_v43 = vld [vmem:[#allocation2 + $0x90] sm:$0xff]  ;;  %v15529_v45 = vld [vmem:[#allocation2 + $0xa8] sm:$0xff]  ;;  %415 = vst.msk [vmem:[#allocation2 + $0x208] sm:$0xff] %vm279_vm1, %v382_v12  ;;  %416 = vst.msk [vmem:[#allocation2 + $0x210] sm:$0xff] %vm279_vm1, %v383_v13 }
  0x42   : > { %v15531_v46 = vld [vmem:[#allocation2 + $0xc9] sm:$0xff]  ;;  %v15549_v52 = vld [vmem:[#allocation2 + $0xd1] sm:$0xff] }
  0x43   : > { %v15540_v49 = vld [vmem:[#allocation2 + $0xb0] sm:$0xff]  ;;  %v15551_v53 = vld [vmem:[#allocation2 + $0xc8] sm:$0xff] }
  0x44   : > { %12791 = vmatmul.mubr.msk.f32.gmra.mrb[6].mxu1 %vm279_vm1, %v15509_v39  ;;  %12988 = vmatmul.mubr.msk.f32.gmra.mrb[4].mxu0 %vm279_vm1, %v15511_v40  ;;  %v15556_v55 = vld [vmem:[#allocation2 + $0xe9] sm:$0xff]  ;;  %v15577_v62 = vld [vmem:[#allocation2 + $0xf1] sm:$0xff] }
  0x45   : > { %12793 = vmatprep.mubr.msk.f32.mxu1 %vm279_vm1, %v15513_v41  ;;  %12990 = vmatprep.mubr.msk.f32.mxu0 %vm279_vm1, %v15515_v42  ;;  %v15575_v61 = vld [vmem:[#allocation2 + $0xd0] sm:$0xff]  ;;  %v15581_v63 = vld [vmem:[#allocation2 + $0xe8] sm:$0xff] }
  0x46   : > { %v15583_v0 = vld [vmem:[#allocation2 + $0x109] sm:$0xff]  ;;  %v15595_v4 = vld [vmem:[#allocation2 + $0x111] sm:$0xff] }
  0x47   : > { %v15593_v3 = vld [vmem:[#allocation2 + $0xf0] sm:$0xff]  ;;  %v15597_v5 = vld [vmem:[#allocation2 + $0x108] sm:$0xff] }
  0x48   : > { %12794 = vmatmul.mubr.msk.f32.gmra.mrb[8].mxu1 %vm279_vm1, %v15525_v43  ;;  %12991 = vmatmul.mubr.msk.f32.gmra.mrb[6].mxu0 %vm279_vm1, %v15527_v44  ;;  %v15599_v6 = vld [vmem:[#allocation2 + $0x129] sm:$0xff]  ;;  %v15611_v8 = vld [vmem:[#allocation2 + $0x131] sm:$0xff] }
  0x49   : > { %12796 = vmatprep.mubr.msk.f32.mxu1 %vm279_vm1, %v15529_v45  ;;  %12993 = vmatprep.mubr.msk.f32.mxu0 %vm279_vm1, %v15531_v46  ;;  %v15609_v7 = vld [vmem:[#allocation2 + $0x110] sm:$0xff]  ;;  %v15613_v9 = vld [vmem:[#allocation2 + $0x128] sm:$0xff] }
  0x4a   : > { %v15624_v14 = vld [vmem:[#allocation2 + $0x130] sm:$0xff]  ;;  %v15628_v16 = vld [vmem:[#allocation2 + $0x148] sm:$0xff] }
  0x4b   : > { %v419_v17 = vld [vmem:[#allocation2 + $0x27] sm:$0xff]  ;;  %v15642_v19 = vld [vmem:[#allocation2 + $0x150] sm:$0xff] }
  0x4c   : > { %12797 = vmatmul.mubr.msk.f32.gmra.mrb[10].mxu1 %vm279_vm1, %v15540_v49  ;;  %12994 = vmatmul.mubr.msk.f32.gmra.mrb[8].mxu0 %vm279_vm1, %v15549_v52  ;;  %v420_v20 = vld [vmem:[#allocation2 + $0x2f] sm:$0xff]  ;;  %v15647_v22 = vld [vmem:[#allocation2 + $0x47] sm:$0xff] }
  0x4d   : > { %12799 = vmatprep.mubr.msk.f32.mxu1 %vm279_vm1, %v15551_v53  ;;  %12996 = vmatprep.mubr.msk.f32.mxu0 %vm279_vm1, %v15556_v55  ;;  %v15645_v21 = vld [vmem:[#allocation2 + $0x168] sm:$0xff]  ;;  %18503 = vst [vmem:[#allocation4_spill] sm:$0xff] %v15647_v22  ;;  %v15658_v23 = vld [vmem:[#allocation2 + $0x170] sm:$0xff] }
  0x4e   : > { %v15660_v24 = vld [vmem:[#allocation2 + $0x4f] sm:$0xff]  ;;  %v15680_v48 = vld [vmem:[#allocation2 + $0x87] sm:$0xff] }
  0x4f   : > { %18504 = vst [vmem:[#allocation5_spill] sm:$0xff] %v15660_v24  ;;  %v15662_v25 = vld [vmem:[#allocation2 + $0x188] sm:$0xff]  ;;  %v15674_v27 = vld [vmem:[#allocation2 + $0x190] sm:$0xff]  ;;  %18507 = vst [vmem:[#allocation8_spill] sm:$0xff] %v15680_v48 }
  0x50   : > { %12800 = vmatmul.mubr.msk.f32.gmra.mrb[12].mxu1 %vm279_vm1, %v15575_v61  ;;  %12997 = vmatmul.mubr.msk.f32.gmra.mrb[10].mxu0 %vm279_vm1, %v15577_v62  ;;  %v15676_v28 = vld [vmem:[#allocation2 + $0x6f] sm:$0xff]  ;;  %v15696_v56 = vld [vmem:[#allocation2 + $0xa7] sm:$0xff] }
  0x51   : > { %12802 = vmatprep.mubr.msk.f32.mxu1 %vm279_vm1, %v15581_v63  ;;  %12999 = vmatprep.mubr.msk.f32.mxu0 %vm279_vm1, %v15583_v0  ;;  %18506 = vst [vmem:[#allocation7_spill] sm:$0xff] %v15676_v28  ;;  %v15678_v47 = vld [vmem:[#allocation2 + $0x1a8] sm:$0xff]  ;;  %v15690_v50 = vld [vmem:[#allocation2 + $0x1b0] sm:$0xff]  ;;  %18509 = vst [vmem:[#allocation10_spill] sm:$0xff] %v15696_v56 }
  0x52   : > { %v15692_v51 = vld [vmem:[#allocation2 + $0x8f] sm:$0xff]  ;;  %v15712_v60 = vld [vmem:[#allocation2 + $0xc7] sm:$0xff] }
  0x53   : > { %18508 = vst [vmem:[#allocation9_spill] sm:$0xff] %v15692_v51  ;;  %v15694_v54 = vld [vmem:[#allocation2 + $0x1c8] sm:$0xff]  ;;  %v15706_v57 = vld [vmem:[#allocation2 + $0x1d0] sm:$0xff]  ;;  %18512 = vst [vmem:[#allocation13_spill] sm:$0xff] %v15712_v60 }
  0x54   : > { %12803 = vmatmul.mubr.msk.f32.gmra.mrb[14].mxu1 %vm279_vm1, %v15593_v3  ;;  %13000 = vmatmul.mubr.msk.f32.gmra.mrb[12].mxu0 %vm279_vm1, %v15595_v4  ;;  %v15708_v58 = vld [vmem:[#allocation2 + $0xaf] sm:$0xff]  ;;  %v15726_v13 = vld [vmem:[#allocation2 + $0xe7] sm:$0xff] }
  0x55   : > { %12805 = vmatprep.mubr.msk.f32.mxu1 %vm279_vm1, %v15597_v5  ;;  %13002 = vmatprep.mubr.msk.f32.mxu0 %vm279_vm1, %v15599_v6  ;;  %18510 = vst [vmem:[#allocation11_spill] sm:$0xff] %v15708_v58  ;;  %v15710_v59 = vld [vmem:[#allocation2 + $0x1e8] sm:$0xff]  ;;  %18515 = vst [vmem:[#allocation16_spill] sm:$0xff] %v15726_v13 }
  0x56   : > { %18511 = vst [vmem:[#allocation12_spill] sm:$0xff] %v15710_v59  ;;  %v15724_v12 = vld [vmem:[#allocation2 + $0xcf] sm:$0xff]  ;;  %v15737_v1 = vld [vmem:[#allocation2 + $0x107] sm:$0xff] }
  0x57   : > { %18514 = vst [vmem:[#allocation15_spill] sm:$0xff] %v15724_v12  ;;  %18517 = vst [vmem:[#allocation18_spill] sm:$0xff] %v15737_v1 }
  0x58   : > { %12806 = vmatmul.mubr.msk.f32.gmra.mrb[16].mxu1 %vm279_vm1, %v15609_v7  ;;  %13003 = vmatmul.mubr.msk.f32.gmra.mrb[14].mxu0 %vm279_vm1, %v15611_v8 }
  0x59   : > { %12808 = vmatprep.mubr.msk.f32.mxu1 %vm279_vm1, %v15613_v9  ;;  %13031 = vmatprep.mubr.msk.f32.mxu0 %vm279_vm1, %v417_v10  ;;  %v15722_v10 = vld [vmem:[#allocation2 + $0x1f0] sm:$0xff] }
  0x5a   : > { %18513 = vst [vmem:[#allocation14_spill] sm:$0xff] %v15722_v10 }
  0x5c   : > { %12809 = vmatmul.mubr.msk.f32.gmra.mrb[18].mxu1 %vm279_vm1, %v15624_v14  ;;  %13032 = vmatmul.mubr.msk.f32.vlgmr.msra.gmra.mrb[0].mxu0 %vm279_vm1, %v418_v15  ;;  %v15735_v15 = vld [vmem:[#allocation2 + $0xef] sm:$0xff] }
  0x5d   : > { %13080 = vmatpush3.msk.msra.mxu0 %vm580_vm0, %v15459_v26  ;;  %12811 = vmatprep.mubr.msk.f32.mxu1 %vm279_vm1, %v15628_v16  ;;  %v15664_v26 = vld [vmem:[#allocation2 + $0x67] sm:$0xff]  ;;  %18516 = vst [vmem:[#allocation17_spill] sm:$0xff] %v15735_v15 }
  0x5e   : > { %13034 = vmatprep.mubr.msk.f32.mxu0 %vm279_vm1, %v419_v17  ;;  %13129 = vmatprep.subr.msk.mxu0 %vm580_vm0, %v15633_v18  ;;  %18505 = vst [vmem:[#allocation6_spill] sm:$0xff] %v15664_v26 }
  0x60   : > { %12812 = vmatmul.mubr.msk.f32.gmra.mrb[20].mxu1 %vm279_vm1, %v15642_v19  ;;  %13035 = vmatmul.mubr.msk.f32.gmra.mrb[2].mxu0 %vm279_vm1, %v420_v20 }
  0x61   : > { %12814 = vmatprep.mubr.msk.f32.mxu1 %vm279_vm1, %v15645_v21  ;;  %13037 = vmatprep.mubr.msk.f32.mxu0 %vm279_vm1, %v15647_v22 }
  0x64   : > { %12815 = vmatmul.mubr.msk.f32.gmra.mrb[22].mxu1 %vm279_vm1, %v15658_v23  ;;  %13038 = vmatmul.mubr.msk.f32.gmra.mrb[4].mxu0 %vm279_vm1, %v15660_v24 }
  0x65   : > { %12817 = vmatprep.mubr.msk.f32.mxu1 %vm279_vm1, %v15662_v25  ;;  %13040 = vmatprep.mubr.msk.f32.mxu0 %vm279_vm1, %v15664_v26 }
  0x68   : > { %12818 = vmatmul.mubr.msk.f32.gmra.mrb[24].mxu1 %vm279_vm1, %v15674_v27  ;;  %13041 = vmatmul.mubr.msk.f32.gmra.mrb[6].mxu0 %vm279_vm1, %v15676_v28 }
  0x69   : > { %12820 = vmatprep.mubr.msk.f32.mxu1 %vm279_vm1, %v15678_v47  ;;  %13043 = vmatprep.mubr.msk.f32.mxu0 %vm279_vm1, %v15680_v48 }
  0x6c   : > { %12821 = vmatmul.mubr.msk.f32.gmra.mrb[26].mxu1 %vm279_vm1, %v15690_v50  ;;  %13044 = vmatmul.mubr.msk.f32.gmra.mrb[8].mxu0 %vm279_vm1, %v15692_v51 }
  0x6d   : > { %12823 = vmatprep.mubr.msk.f32.mxu1 %vm279_vm1, %v15694_v54  ;;  %13046 = vmatprep.mubr.msk.f32.mxu0 %vm279_vm1, %v15696_v56 }
  0x70   : > { %12824 = vmatmul.mubr.msk.f32.gmra.mrb[28].mxu1 %vm279_vm1, %v15706_v57  ;;  %13047 = vmatmul.mubr.msk.f32.gmra.mrb[10].mxu0 %vm279_vm1, %v15708_v58 }
  0x71   : > { %12826 = vmatprep.mubr.msk.f32.mxu1 %vm279_vm1, %v15710_v59  ;;  %13049 = vmatprep.mubr.msk.f32.mxu0 %vm279_vm1, %v15712_v60  ;;  %v811_v59 = vld [vmem:[#allocation2 + $0x29] sm:$0xff] }
  0x74   : > { %12827 = vmatmul.mubr.msk.f32.gmra.mrb[30].mxu1 %vm279_vm1, %v15722_v10  ;;  %13050 = vmatmul.mubr.msk.f32.gmra.mrb[12].mxu0 %vm279_vm1, %v15724_v12  ;;  %v15745_v10 = vld [vmem:[%s18347_s1 + $0x1c] sm:$0xf] }
  0x75   : > { %12831 = vmatprep.mubr.msk.f32.mxu1 %vm279_vm1, %v419_v17  ;;  %13052 = vmatprep.mubr.msk.f32.mxu0 %vm279_vm1, %v15726_v13  ;;  %v15751_v17 = vld [vmem:[#allocation2 + $0x10f] sm:$0xff] }
  0x76   : > { %18518 = vst [vmem:[#allocation19_spill] sm:$0xff] %v15751_v17 }
  0x78   : > { %12832 = vmatmul.mubr.msk.f32.vlgmr.msra.gmra.mrb[0].mxu1 %vm279_vm1, %v420_v20  ;;  %13053 = vmatmul.mubr.msk.f32.gmra.mrb[14].mxu0 %vm279_vm1, %v15735_v15  ;;  %v15755_v20 = vld [vmem:[#allocation2 + $0x127] sm:$0xff] }
  0x79   : > { %12834 = vmatprep.mubr.msk.f32.mxu1 %vm279_vm1, %v15647_v22  ;;  %13055 = vmatprep.mubr.msk.f32.mxu0 %vm279_vm1, %v15737_v1  ;;  %18519 = vst [vmem:[#allocation20_spill] sm:$0xff] %v15755_v20  ;;  %v15767_v22 = vld [vmem:[#allocation2 + $0x12f] sm:$0xff] }
  0x7a   : > { %12880 = vmatpush3.msk.msra.mxu1 %vm580_vm0, %v15422_v11  ;;  %v15769_v11 = vld [vmem:[#allocation2 + $0x147] sm:$0xff] }
  0x7b   : > { %12929 = vmatprep.subr.msk.mxu1 %vm580_vm0, %v15745_v10  ;;  %18520 = vst [vmem:[#allocation21_spill] sm:$0xff] %v15769_v11 }
  0x7c   : > { %12835 = vmatmul.mubr.msk.f32.gmra.mrb[2].mxu1 %vm279_vm1, %v15660_v24  ;;  %13056 = vmatmul.mubr.msk.f32.gmra.mrb[16].mxu0 %vm279_vm1, %v15751_v17  ;;  %v15781_v24 = vld [vmem:[#allocation2 + $0x167] sm:$0xff] }
  0x7d   : > { %12837 = vmatprep.mubr.msk.f32.mxu1 %vm279_vm1, %v15664_v26  ;;  %13058 = vmatprep.mubr.msk.f32.mxu0 %vm279_vm1, %v15755_v20  ;;  %v15779_v26 = vld [vmem:[#allocation2 + $0x14f] sm:$0xff] }
  0x80   : > { %12838 = vmatmul.mubr.msk.f32.gmra.mrb[4].mxu1 %vm279_vm1, %v15676_v28  ;;  %13059 = vmatmul.mubr.msk.f32.gmra.mrb[18].mxu0 %vm279_vm1, %v15767_v22  ;;  %v15793_v28 = vld [vmem:[#allocation2 + $0x187] sm:$0xff] }
  0x81   : > { %12840 = vmatprep.mubr.msk.f32.mxu1 %vm279_vm1, %v15680_v48  ;;  %13061 = vmatprep.mubr.msk.f32.mxu0 %vm279_vm1, %v15769_v11  ;;  %v15791_v48 = vld [vmem:[#allocation2 + $0x16f] sm:$0xff] }
  0x84   : > { %12841 = vmatmul.mubr.msk.f32.gmra.mrb[6].mxu1 %vm279_vm1, %v15692_v51  ;;  %13062 = vmatmul.mubr.msk.f32.gmra.mrb[20].mxu0 %vm279_vm1, %v15779_v26  ;;  %v15805_v51 = vld [vmem:[#allocation2 + $0x1a7] sm:$0xff] }
  0x85   : > { %12843 = vmatprep.mubr.msk.f32.mxu1 %vm279_vm1, %v15696_v56  ;;  %13064 = vmatprep.mubr.msk.f32.mxu0 %vm279_vm1, %v15781_v24  ;;  %v15803_v56 = vld [vmem:[#allocation2 + $0x18f] sm:$0xff] }
  0x88   : > { %12844 = vmatmul.mubr.msk.f32.gmra.mrb[8].mxu1 %vm279_vm1, %v15708_v58  ;;  %13065 = vmatmul.mubr.msk.f32.gmra.mrb[22].mxu0 %vm279_vm1, %v15791_v48  ;;  %v15817_v58 = vld [vmem:[#allocation2 + $0x1c7] sm:$0xff] }
  0x89   : > { %12846 = vmatprep.mubr.msk.f32.mxu1 %vm279_vm1, %v15712_v60  ;;  %13067 = vmatprep.mubr.msk.f32.mxu0 %vm279_vm1, %v15793_v28  ;;  %v15815_v60 = vld [vmem:[#allocation2 + $0x1af] sm:$0xff] }
  0x8c   : > { %12847 = vmatmul.mubr.msk.f32.gmra.mrb[10].mxu1 %vm279_vm1, %v15724_v12  ;;  %13068 = vmatmul.mubr.msk.f32.gmra.mrb[24].mxu0 %vm279_vm1, %v15803_v56  ;;  %v15829_v12 = vld [vmem:[#allocation2 + $0x1e7] sm:$0xff] }
  0x8d   : > { %12849 = vmatprep.mubr.msk.f32.mxu1 %vm279_vm1, %v15726_v13  ;;  %13070 = vmatprep.mubr.msk.f32.mxu0 %vm279_vm1, %v15805_v51  ;;  %v15827_v13 = vld [vmem:[#allocation2 + $0x1cf] sm:$0xff] }
  0x90   : > { %12850 = vmatmul.mubr.msk.f32.gmra.mrb[12].mxu1 %vm279_vm1, %v15735_v15  ;;  %13071 = vmatmul.mubr.msk.f32.gmra.mrb[26].mxu0 %vm279_vm1, %v15815_v60  ;;  %v809_v15 = vld [vmem:[#allocation2 + $0x9] sm:$0xff] }
  0x91   : > { %12852 = vmatprep.mubr.msk.f32.mxu1 %vm279_vm1, %v15737_v1  ;;  %13073 = vmatprep.mubr.msk.f32.mxu0 %vm279_vm1, %v15817_v58  ;;  %v15839_v1 = vld [vmem:[#allocation2 + $0x1ef] sm:$0xff] }
  0x94   : > { %12853 = vmatmul.mubr.msk.f32.gmra.mrb[14].mxu1 %vm279_vm1, %v15751_v17  ;;  %13074 = vmatmul.mubr.msk.f32.gmra.mrb[28].mxu0 %vm279_vm1, %v15827_v13  ;;  %v810_v17 = vld [vmem:[#allocation2 + $0x11] sm:$0xff] }
  0x95   : > { %12855 = vmatprep.mubr.msk.f32.mxu1 %vm279_vm1, %v15755_v20  ;;  %13076 = vmatprep.mubr.msk.f32.mxu0 %vm279_vm1, %v15829_v12  ;;  %v15851_v20 = vld [vmem:[%s18347_s1 + $0x18] sm:$0xf] }
  0x98   : > { %12856 = vmatmul.mubr.msk.f32.gmra.mrb[16].mxu1 %vm279_vm1, %v15767_v22  ;;  %13077 = vmatmul.mubr.msk.f32.gmra.mrb[30].mxu0 %vm279_vm1, %v15839_v1 }
  0x99   : > { %12858 = vmatprep.mubr.msk.f32.mxu1 %vm279_vm1, %v15769_v11  ;;  %13081 = vmatprep.mubr.msk.f32.mxu0 %vm279_vm1, %v809_v15  ;;  %v812_v11 = vld [vmem:[#allocation2 + $0x31] sm:$0xff] }
  0x9a   : > { %v15904_v15 = vld [vmem:[#allocation2 + $0x20f] sm:$0xff] }
  0x9c   : > { %12859 = vmatmul.mubr.msk.f32.gmra.mrb[18].mxu1 %vm279_vm1, %v15779_v26  ;;  %13082 = vmatmul.mubr.msk.f32.vlgmr.msra.gmra.mrb[0].mxu0 %vm279_vm1, %v810_v17 }
  0x9d   : > { %13130 = vmatpush3.msk.msra.mxu0 %vm580_vm0, %v15633_v18  ;;  %12861 = vmatprep.mubr.msk.f32.mxu1 %vm279_vm1, %v15781_v24  ;;  %v15894_v18 = vld [vmem:[#allocation2 + $0x207] sm:$0xff] }
  0x9e   : > { %13084 = vmatprep.mubr.msk.f32.mxu0 %vm279_vm1, %v811_v59  ;;  %13179 = vmatprep.subr.msk.mxu0 %vm580_vm0, %v15851_v20 }
  0xa0   : > { %12862 = vmatmul.mubr.msk.f32.gmra.mrb[20].mxu1 %vm279_vm1, %v15791_v48  ;;  %13085 = vmatmul.mubr.msk.f32.gmra.mrb[2].mxu0 %vm279_vm1, %v812_v11 }
  0xa1   : > { %12864 = vmatprep.mubr.msk.f32.mxu1 %vm279_vm1, %v15793_v28  ;;  %13087 = vmatprep.mubr.msk.f32.mxu0 %vm279_vm1, %v15465_v30 }
  0xa4   : > { %12865 = vmatmul.mubr.msk.f32.gmra.mrb[22].mxu1 %vm279_vm1, %v15803_v56  ;;  %13088 = vmatmul.mubr.msk.f32.gmra.mrb[4].mxu0 %vm279_vm1, %v15467_v31 }
  0xa5   : > { %12867 = vmatprep.mubr.msk.f32.mxu1 %vm279_vm1, %v15805_v51  ;;  %13090 = vmatprep.mubr.msk.f32.mxu0 %vm279_vm1, %v15479_v34 }
  0xa8   : > { %12868 = vmatmul.mubr.msk.f32.gmra.mrb[24].mxu1 %vm279_vm1, %v15815_v60  ;;  %13091 = vmatmul.mubr.msk.f32.gmra.mrb[6].mxu0 %vm279_vm1, %v15491_v36 }
  0xa9   : > { %12870 = vmatprep.mubr.msk.f32.mxu1 %vm279_vm1, %v15817_v58  ;;  %13093 = vmatprep.mubr.msk.f32.mxu0 %vm279_vm1, %v15497_v38 }
  0xac   : > { %12871 = vmatmul.mubr.msk.f32.gmra.mrb[26].mxu1 %vm279_vm1, %v15827_v13  ;;  %13094 = vmatmul.mubr.msk.f32.gmra.mrb[8].mxu0 %vm279_vm1, %v15511_v40 }
  0xad   : > { %12873 = vmatprep.mubr.msk.f32.mxu1 %vm279_vm1, %v15829_v12  ;;  %13096 = vmatprep.mubr.msk.f32.mxu0 %vm279_vm1, %v15515_v42 }
  0xb0   : > { %12874 = vmatmul.mubr.msk.f32.gmra.mrb[28].mxu1 %vm279_vm1, %v15839_v1  ;;  %13097 = vmatmul.mubr.msk.f32.gmra.mrb[10].mxu0 %vm279_vm1, %v15527_v44 }
  0xb1   : > { %12876 = vmatprep.mubr.msk.f32.mxu1 %vm279_vm1, %v15894_v18  ;;  %13099 = vmatprep.mubr.msk.f32.mxu0 %vm279_vm1, %v15531_v46 }
  0xb4   : > { %12877 = vmatmul.mubr.msk.f32.gmra.mrb[30].mxu1 %vm279_vm1, %v15904_v15  ;;  %13100 = vmatmul.mubr.msk.f32.gmra.mrb[12].mxu0 %vm279_vm1, %v15549_v52 }
  0xb5   : > { %12881 = vmatprep.mubr.msk.f32.mxu1 %vm279_vm1, %v811_v59  ;;  %13102 = vmatprep.mubr.msk.f32.mxu0 %vm279_vm1, %v15556_v55 }
  0xb8   : > { %12882 = vmatmul.mubr.msk.f32.vlgmr.msra.gmra.mrb[0].mxu1 %vm279_vm1, %v812_v11  ;;  %13103 = vmatmul.mubr.msk.f32.gmra.mrb[14].mxu0 %vm279_vm1, %v15577_v62 }
  0xb9   : > { %12884 = vmatprep.mubr.msk.f32.mxu1 %vm279_vm1, %v15465_v30  ;;  %13105 = vmatprep.mubr.msk.f32.mxu0 %vm279_vm1, %v15583_v0  ;;  %v15932_v30 = vld [vmem:[#allocation2 + $0x149] sm:$0xff] }
  0xba   : > { %12930 = vmatpush3.msk.msra.mxu1 %vm580_vm0, %v15745_v10  ;;  %v11269_v10 = vld [vmem:[%s18349_s3 + $0xa8] sm:$0xff] }
  0xbb   : > { %14381 = vmatprep.subr.msk.mxu1 %vm580_vm0, %v15377_v2 }
  0xbc   : > { %12885 = vmatmul.mubr.msk.f32.gmra.mrb[2].mxu1 %vm279_vm1, %v15467_v31  ;;  %13106 = vmatmul.mubr.msk.f32.gmra.mrb[16].mxu0 %vm279_vm1, %v15595_v4  ;;  %v15942_v31 = vld [vmem:[#allocation2 + $0x151] sm:$0xff] }
  0xbd   : > { %12887 = vmatprep.mubr.msk.f32.mxu1 %vm279_vm1, %v15479_v34  ;;  %13108 = vmatprep.mubr.msk.f32.mxu0 %vm279_vm1, %v15599_v6  ;;  %v15944_v34 = vld [vmem:[#allocation2 + $0x169] sm:$0xff] }
  0xc0   : > { %12888 = vmatmul.mubr.msk.f32.gmra.mrb[4].mxu1 %vm279_vm1, %v15491_v36  ;;  %13109 = vmatmul.mubr.msk.f32.gmra.mrb[18].mxu0 %vm279_vm1, %v15611_v8  ;;  %v15954_v36 = vld [vmem:[#allocation2 + $0x171] sm:$0xff] }
  0xc1   : > { %12890 = vmatprep.mubr.msk.f32.mxu1 %vm279_vm1, %v15497_v38  ;;  %13111 = vmatprep.mubr.msk.f32.mxu0 %vm279_vm1, %v15932_v30  ;;  %v15956_v38 = vld [vmem:[#allocation2 + $0x189] sm:$0xff] }
  0xc4   : > { %12891 = vmatmul.mubr.msk.f32.gmra.mrb[6].mxu1 %vm279_vm1, %v15511_v40  ;;  %13112 = vmatmul.mubr.msk.f32.gmra.mrb[20].mxu0 %vm279_vm1, %v15942_v31  ;;  %v15966_v40 = vld [vmem:[#allocation2 + $0x191] sm:$0xff] }
  0xc5   : > { %12893 = vmatprep.mubr.msk.f32.mxu1 %vm279_vm1, %v15515_v42  ;;  %13114 = vmatprep.mubr.msk.f32.mxu0 %vm279_vm1, %v15944_v34  ;;  %v15968_v42 = vld [vmem:[#allocation2 + $0x1a9] sm:$0xff] }
  0xc8   : > { %12894 = vmatmul.mubr.msk.f32.gmra.mrb[8].mxu1 %vm279_vm1, %v15527_v44  ;;  %13115 = vmatmul.mubr.msk.f32.gmra.mrb[22].mxu0 %vm279_vm1, %v15954_v36  ;;  %v15978_v44 = vld [vmem:[#allocation2 + $0x1b1] sm:$0xff] }
  0xc9   : > { %12896 = vmatprep.mubr.msk.f32.mxu1 %vm279_vm1, %v15531_v46  ;;  %13117 = vmatprep.mubr.msk.f32.mxu0 %vm279_vm1, %v15956_v38  ;;  %v15980_v46 = vld [vmem:[#allocation2 + $0x1c9] sm:$0xff] }
  0xcc   : > { %12897 = vmatmul.mubr.msk.f32.gmra.mrb[10].mxu1 %vm279_vm1, %v15549_v52  ;;  %13118 = vmatmul.mubr.msk.f32.gmra.mrb[24].mxu0 %vm279_vm1, %v15966_v40  ;;  %v15990_v52 = vld [vmem:[#allocation2 + $0x1d1] sm:$0xff] }
  0xcd   : > { %12899 = vmatprep.mubr.msk.f32.mxu1 %vm279_vm1, %v15556_v55  ;;  %13120 = vmatprep.mubr.msk.f32.mxu0 %vm279_vm1, %v15968_v42  ;;  %v15992_v55 = vld [vmem:[#allocation2 + $0x1e9] sm:$0xff] }
  0xd0   : > { %12900 = vmatmul.mubr.msk.f32.gmra.mrb[12].mxu1 %vm279_vm1, %v15577_v62  ;;  %13121 = vmatmul.mubr.msk.f32.gmra.mrb[26].mxu0 %vm279_vm1, %v15978_v44  ;;  %v16002_v62 = vld [vmem:[#allocation2 + $0x1f1] sm:$0xff] }
  0xd1   : > { %12902 = vmatprep.mubr.msk.f32.mxu1 %vm279_vm1, %v15583_v0  ;;  %13123 = vmatprep.mubr.msk.f32.mxu0 %vm279_vm1, %v15980_v46  ;;  %v18531_v0 = vld [vmem:[#allocation13_spill] sm:$0xff] }
  0xd4   : > { %12903 = vmatmul.mubr.msk.f32.gmra.mrb[14].mxu1 %vm279_vm1, %v15595_v4  ;;  %13124 = vmatmul.mubr.msk.f32.gmra.mrb[28].mxu0 %vm279_vm1, %v15990_v52  ;;  %v18533_v4 = vld [vmem:[#allocation16_spill] sm:$0xff] }
  0xd5   : > { %12905 = vmatprep.mubr.msk.f32.mxu1 %vm279_vm1, %v15599_v6  ;;  %13126 = vmatprep.mubr.msk.f32.mxu0 %vm279_vm1, %v15992_v55  ;;  %v18534_v6 = vld [vmem:[#allocation17_spill] sm:$0xff] }
  0xd8   : > { %12906 = vmatmul.mubr.msk.f32.gmra.mrb[16].mxu1 %vm279_vm1, %v15611_v8  ;;  %13127 = vmatmul.mubr.msk.f32.gmra.mrb[30].mxu0 %vm279_vm1, %v16002_v62  ;;  %v1659_v8 = vld [vmem:[#allocation2 + $0x230] sm:$0xff] }
  0xd9   : > { %12908 = vmatprep.mubr.msk.f32.mxu1 %vm279_vm1, %v15932_v30  ;;  %13131 = vmatprep.mubr.msk.f32.mxu0 %vm279_vm1, %v15463_v29  ;;  %v16054_v29 = vld [vmem:[#allocation2 + $0x209] sm:$0xff] }
  0xdc   : > { %12909 = vmatmul.mubr.msk.f32.gmra.mrb[18].mxu1 %vm279_vm1, %v15942_v31  ;;  %13132 = vmatmul.mubr.msk.f32.vlgmr.msra.gmra.mrb[0].mxu0 %vm279_vm1, %v15475_v32  ;;  %v16064_v32 = vld [vmem:[#allocation2 + $0x211] sm:$0xff] }
  0xdd   : > { %13180 = vmatpush3.msk.msra.mxu0 %vm580_vm0, %v15851_v20  ;;  %12911 = vmatprep.mubr.msk.f32.mxu1 %vm279_vm1, %v15944_v34 }
  0xde   : > { %13134 = vmatprep.mubr.msk.f32.mxu0 %vm279_vm1, %v15477_v33 }
  0xe0   : > { %12912 = vmatmul.mubr.msk.f32.gmra.mrb[20].mxu1 %vm279_vm1, %v15954_v36  ;;  %13135 = vmatmul.mubr.msk.f32.gmra.mrb[2].mxu0 %vm279_vm1, %v15489_v35 }
  0xe1   : > { %12914 = vmatprep.mubr.msk.f32.mxu1 %vm279_vm1, %v15956_v38  ;;  %13137 = vmatprep.mubr.msk.f32.mxu0 %vm279_vm1, %v15495_v37 }
  0xe4   : > { %12915 = vmatmul.mubr.msk.f32.gmra.mrb[22].mxu1 %vm279_vm1, %v15966_v40  ;;  %13138 = vmatmul.mubr.msk.f32.gmra.mrb[4].mxu0 %vm279_vm1, %v15509_v39 }
  0xe5   : > { %12917 = vmatprep.mubr.msk.f32.mxu1 %vm279_vm1, %v15968_v42  ;;  %13140 = vmatprep.mubr.msk.f32.mxu0 %vm279_vm1, %v15513_v41 }
  0xe8   : > { %12918 = vmatmul.mubr.msk.f32.gmra.mrb[24].mxu1 %vm279_vm1, %v15978_v44  ;;  %13141 = vmatmul.mubr.msk.f32.gmra.mrb[6].mxu0 %vm279_vm1, %v15525_v43 }
  0xe9   : > { %12920 = vmatprep.mubr.msk.f32.mxu1 %vm279_vm1, %v15980_v46  ;;  %13143 = vmatprep.mubr.msk.f32.mxu0 %vm279_vm1, %v15529_v45 }
  0xec   : > { %12921 = vmatmul.mubr.msk.f32.gmra.mrb[26].mxu1 %vm279_vm1, %v15990_v52  ;;  %13144 = vmatmul.mubr.msk.f32.gmra.mrb[8].mxu0 %vm279_vm1, %v15540_v49 }
  0xed   : > { %12923 = vmatprep.mubr.msk.f32.mxu1 %vm279_vm1, %v15992_v55  ;;  %13146 = vmatprep.mubr.msk.f32.mxu0 %vm279_vm1, %v15551_v53 }
  0xf0   : > { %12924 = vmatmul.mubr.msk.f32.gmra.mrb[28].mxu1 %vm279_vm1, %v16002_v62  ;;  %13147 = vmatmul.mubr.msk.f32.gmra.mrb[10].mxu0 %vm279_vm1, %v15575_v61 }
  0xf1   : > { %12926 = vmatprep.mubr.msk.f32.mxu1 %vm279_vm1, %v16054_v29  ;;  %13149 = vmatprep.mubr.msk.f32.mxu0 %vm279_vm1, %v15581_v63 }
  0xf4   : > { %12927 = vmatmul.mubr.msk.f32.gmra.mrb[30].mxu1 %vm279_vm1, %v16064_v32  ;;  %13150 = vmatmul.mubr.msk.f32.gmra.mrb[12].mxu0 %vm279_vm1, %v15593_v3 }
  0xf5   : > { %12931 = vmatprep.mubr.msk.f32.mxu1 %vm279_vm1, %v15477_v33  ;;  %13152 = vmatprep.mubr.msk.f32.mxu0 %vm279_vm1, %v15597_v5  ;;  %v1231_v33 = vld [vmem:[#allocation2 + $0x208] sm:$0xff] }
  0xf8   : > { %12932 = vmatmul.mubr.msk.f32.vlgmr.msra.gmra.mrb[0].mxu1 %vm279_vm1, %v15489_v35  ;;  %13153 = vmatmul.mubr.msk.f32.gmra.mrb[14].mxu0 %vm279_vm1, %v15609_v7  ;;  %v18522_v35 = vld [vmem:[#allocation14_spill] sm:$0xff] }
  0xf9   : > { %12934 = vmatprep.mubr.msk.f32.mxu1 %vm279_vm1, %v15495_v37  ;;  %13155 = vmatprep.mubr.msk.f32.mxu0 %vm279_vm1, %v15613_v9  ;;  %v1232_v37 = vld [vmem:[#allocation2 + $0x210] sm:$0xff] }
  0xfa   : > { %14382 = vmatpush3.msk.msra.mxu1 %vm580_vm0, %v15377_v2  ;;  %v18521_v2 = vld [vmem:[#allocation12_spill] sm:$0xff] }
  0xfc   : > { %12935 = vmatmul.mubr.msk.f32.gmra.mrb[2].mxu1 %vm279_vm1, %v15509_v39  ;;  %13156 = vmatmul.mubr.msk.f32.gmra.mrb[16].mxu0 %vm279_vm1, %v15624_v14  ;;  %v18523_v39 = vld [vmem:[#allocation4_spill] sm:$0xff] }
  0xfd   : > { %12937 = vmatprep.mubr.msk.f32.mxu1 %vm279_vm1, %v15513_v41  ;;  %13158 = vmatprep.mubr.msk.f32.mxu0 %vm279_vm1, %v15628_v16  ;;  %v18524_v41 = vld [vmem:[#allocation5_spill] sm:$0xff] }
 0x100   : > { %12938 = vmatmul.mubr.msk.f32.gmra.mrb[4].mxu1 %vm279_vm1, %v15525_v43  ;;  %13159 = vmatmul.mubr.msk.f32.gmra.mrb[18].mxu0 %vm279_vm1, %v15642_v19  ;;  %v18525_v43 = vld [vmem:[#allocation6_spill] sm:$0xff] }
 0x101   : > { %12940 = vmatprep.mubr.msk.f32.mxu1 %vm279_vm1, %v15529_v45  ;;  %13161 = vmatprep.mubr.msk.f32.mxu0 %vm279_vm1, %v15645_v21  ;;  %v18526_v45 = vld [vmem:[#allocation7_spill] sm:$0xff] }
 0x104   : > { %12941 = vmatmul.mubr.msk.f32.gmra.mrb[6].mxu1 %vm279_vm1, %v15540_v49  ;;  %13162 = vmatmul.mubr.msk.f32.gmra.mrb[20].mxu0 %vm279_vm1, %v15658_v23  ;;  %v18527_v49 = vld [vmem:[#allocation8_spill] sm:$0xff] }
 0x105   : > { %12943 = vmatprep.mubr.msk.f32.mxu1 %vm279_vm1, %v15551_v53  ;;  %13164 = vmatprep.mubr.msk.f32.mxu0 %vm279_vm1, %v15662_v25  ;;  %v18528_v53 = vld [vmem:[#allocation9_spill] sm:$0xff] }
 0x108   : > { %12944 = vmatmul.mubr.msk.f32.gmra.mrb[8].mxu1 %vm279_vm1, %v15575_v61  ;;  %13165 = vmatmul.mubr.msk.f32.gmra.mrb[22].mxu0 %vm279_vm1, %v15674_v27  ;;  %v18529_v61 = vld [vmem:[#allocation10_spill] sm:$0xff] }
 0x109   : > { %12946 = vmatprep.mubr.msk.f32.mxu1 %vm279_vm1, %v15581_v63  ;;  %13167 = vmatprep.mubr.msk.f32.mxu0 %vm279_vm1, %v15678_v47  ;;  %v18530_v63 = vld [vmem:[#allocation11_spill] sm:$0xff] }
 0x10c   : > { %12947 = vmatmul.mubr.msk.f32.gmra.mrb[10].mxu1 %vm279_vm1, %v15593_v3  ;;  %13168 = vmatmul.mubr.msk.f32.gmra.mrb[24].mxu0 %vm279_vm1, %v15690_v50  ;;  %v18532_v3 = vld [vmem:[#allocation15_spill] sm:$0xff] }
 0x10d   : > { %12949 = vmatprep.mubr.msk.f32.mxu1 %vm279_vm1, %v15597_v5  ;;  %13170 = vmatprep.mubr.msk.f32.mxu0 %vm279_vm1, %v15694_v54  ;;  %v1658_v5 = vld [vmem:[#allocation2 + $0x228] sm:$0xff] }
 0x110   : > { %12950 = vmatmul.mubr.msk.f32.gmra.mrb[12].mxu1 %vm279_vm1, %v15609_v7  ;;  %13171 = vmatmul.mubr.msk.f32.gmra.mrb[26].mxu0 %vm279_vm1, %v15706_v57  ;;  %v18535_v7 = vld [vmem:[#allocation18_spill] sm:$0xff] }
 0x111   : > { %12952 = vmatprep.mubr.msk.f32.mxu1 %vm279_vm1, %v15613_v9  ;;  %13173 = vmatprep.mubr.msk.f32.mxu0 %vm279_vm1, %v18521_v2  ;;  %v18536_v9 = vld [vmem:[#allocation19_spill] sm:$0xff] }
 0x114   : > { %12953 = vmatmul.mubr.msk.f32.gmra.mrb[14].mxu1 %vm279_vm1, %v15624_v14  ;;  %13174 = vmatmul.mubr.msk.f32.gmra.mrb[28].mxu0 %vm279_vm1, %v18522_v35  ;;  %v18537_v14 = vld [vmem:[#allocation20_spill] sm:$0xff] }
 0x115   : > { %12955 = vmatprep.mubr.msk.f32.mxu1 %vm279_vm1, %v15628_v16  ;;  %13176 = vmatprep.mubr.msk.f32.mxu0 %vm279_vm1, %v1231_v33  ;;  %v18538_v16 = vld [vmem:[#allocation21_spill] sm:$0xff] }
 0x118   : > { %12956 = vmatmul.mubr.msk.f32.gmra.mrb[16].mxu1 %vm279_vm1, %v15642_v19  ;;  %13177 = vmatmul.mubr.msk.f32.gmra.mrb[30].mxu0 %vm279_vm1, %v1232_v37  ;;  %v2016_v19 = vld [vmem:[#allocation2 + $0x229] sm:$0xff] }
 0x119   : > { %12958 = vmatprep.mubr.msk.f32.mxu1 %vm279_vm1, %v15645_v21  ;;  %13181 = vmatprep.mubr.msk.f32.mxu0 %vm279_vm1, %v18523_v39  ;;  %v2017_v21 = vld [vmem:[#allocation2 + $0x231] sm:$0xff] }
 0x11c   : > { %12959 = vmatmul.mubr.msk.f32.gmra.mrb[18].mxu1 %vm279_vm1, %v15658_v23  ;;  %13182 = vmatmul.mubr.msk.f32.vlgmr.msra.gmra.mrb[0].mxu0 %vm279_vm1, %v18524_v41  ;;  %v1625_v23 = vld [vmem:[#allocation2 + $0x22f] sm:$0xff] }
 0x11d   : > { %12961 = vmatprep.mubr.msk.f32.mxu1 %vm279_vm1, %v15662_v25  ;;  %13184 = vmatprep.mubr.msk.f32.mxu0 %vm279_vm1, %v18525_v43 }
 0x120   : > { %12962 = vmatmul.mubr.msk.f32.gmra.mrb[20].mxu1 %vm279_vm1, %v15674_v27  ;;  %13185 = vmatmul.mubr.msk.f32.gmra.mrb[2].mxu0 %vm279_vm1, %v18526_v45  ;;  %v11191_v27 = vld [vmem:[%s18349_s3 + $0x38] sm:$0xff] }
 0x121   : > { %12964 = vmatprep.mubr.msk.f32.mxu1 %vm279_vm1, %v15678_v47  ;;  %13187 = vmatprep.mubr.msk.f32.mxu0 %vm279_vm1, %v18527_v49  ;;  %v18539_v47 = vmov 0.0  }
 0x122   : > { %3846 = vst.msk [vmem:[#allocation3 + $0x30] sm:$0xff] %vm3839_vm2, %v18539_v47  ;;  %3840 = vst.msk [vmem:[#allocation3] sm:$0xff] %vm3839_vm2, %v18539_v47 }
 0x123   : > { %3841 = vst.msk [vmem:[#allocation3 + $0x8] sm:$0xff] %vm3839_vm2, %v18539_v47  ;;  %3842 = vst.msk [vmem:[#allocation3 + $0x10] sm:$0xff] %vm3839_vm2, %v18539_v47 }
 0x124   : > { %12965 = vmatmul.mubr.msk.f32.gmra.mrb[22].mxu1 %vm279_vm1, %v15690_v50  ;;  %13188 = vmatmul.mubr.msk.f32.gmra.mrb[4].mxu0 %vm279_vm1, %v18528_v53  ;;  %3843 = vst.msk [vmem:[#allocation3 + $0x18] sm:$0xff] %vm3839_vm2, %v18539_v47  ;;  %3844 = vst.msk [vmem:[#allocation3 + $0x20] sm:$0xff] %vm3839_vm2, %v18539_v47 }
 0x125   : > { %12967 = vmatprep.mubr.msk.f32.mxu1 %vm279_vm1, %v15694_v54  ;;  %13190 = vmatprep.mubr.msk.f32.mxu0 %vm279_vm1, %v18529_v61  ;;  %3845 = vst.msk [vmem:[#allocation3 + $0x28] sm:$0xff] %vm3839_vm2, %v18539_v47  ;;  %3847 = vst.msk [vmem:[#allocation3 + $0x38] sm:$0xff] %vm3839_vm2, %v18539_v47  ;;  %v11229_v54 = vld [vmem:[%s18349_s3 + $0x68] sm:$0xff] }
 0x126   : > { %3848 = vst.msk [vmem:[#allocation3 + $0x40] sm:$0xff] %vm3839_vm2, %v18539_v47  ;;  %3849 = vst.msk [vmem:[#allocation3 + $0x48] sm:$0xff] %vm3839_vm2, %v18539_v47 }
 0x127   : > { %3850 = vst.msk [vmem:[#allocation3 + $0x50] sm:$0xff] %vm3839_vm2, %v18539_v47  ;;  %3851 = vst.msk [vmem:[#allocation3 + $0x58] sm:$0xff] %vm3839_vm2, %v18539_v47 }
 0x128   : > { %12968 = vmatmul.mubr.msk.f32.gmra.mrb[24].mxu1 %vm279_vm1, %v15706_v57  ;;  %13191 = vmatmul.mubr.msk.f32.gmra.mrb[6].mxu0 %vm279_vm1, %v18530_v63  ;;  %3852 = vst.msk [vmem:[#allocation3 + $0x60] sm:$0xff] %vm3839_vm2, %v18539_v47  ;;  %3853 = vst.msk [vmem:[#allocation3 + $0x68] sm:$0xff] %vm3839_vm2, %v18539_v47  ;;  %v11230_v57 = vld [vmem:[%s18349_s3 + $0x70] sm:$0xff] }
 0x129   : > { %12970 = vmatprep.mubr.msk.f32.mxu1 %vm279_vm1, %v18521_v2  ;;  %13193 = vmatprep.mubr.msk.f32.mxu0 %vm279_vm1, %v18531_v0  ;;  %3854 = vst.msk [vmem:[#allocation3 + $0x70] sm:$0xff] %vm3839_vm2, %v18539_v47  ;;  %3855 = vst.msk [vmem:[#allocation3 + $0x78] sm:$0xff] %vm3839_vm2, %v18539_v47 }
 0x12a   : > { %3856 = vst.msk [vmem:[#allocation3 + $0x80] sm:$0xff] %vm3839_vm2, %v18539_v47  ;;  %3857 = vst.msk [vmem:[#allocation3 + $0x88] sm:$0xff] %vm3839_vm2, %v18539_v47  ;;  %v3982_v50 = vld [vmem:[#allocation3 + $0x10] sm:$0xff] }
 0x12b   : > { %3858 = vst.msk [vmem:[#allocation3 + $0x90] sm:$0xff] %vm3839_vm2, %v18539_v47  ;;  %3859 = vst.msk [vmem:[#allocation3 + $0x98] sm:$0xff] %vm3839_vm2, %v18539_v47 }
 0x12c   : > { %12971 = vmatmul.mubr.msk.f32.gmra.mrb[26].mxu1 %vm279_vm1, %v18522_v35  ;;  %13194 = vmatmul.mubr.msk.f32.gmra.mrb[8].mxu0 %vm279_vm1, %v18532_v3  ;;  %3860 = vst.msk [vmem:[#allocation3 + $0xa0] sm:$0xff] %vm3839_vm2, %v18539_v47  ;;  %3861 = vst.msk [vmem:[#allocation3 + $0xa8] sm:$0xff] %vm3839_vm2, %v18539_v47 }
 0x12d   : > { %12973 = vmatprep.mubr.msk.f32.mxu1 %vm279_vm1, %v1231_v33  ;;  %13196 = vmatprep.mubr.msk.f32.mxu0 %vm279_vm1, %v18533_v4  ;;  %3862 = vst.msk [vmem:[#allocation3 + $0xb0] sm:$0xff] %vm3839_vm2, %v18539_v47  ;;  %3863 = vst.msk [vmem:[#allocation3 + $0xb8] sm:$0xff] %vm3839_vm2, %v18539_v47 }
 0x12e   : > { %3864 = vst.msk [vmem:[#allocation3 + $0xc0] sm:$0xff] %vm3839_vm2, %v18539_v47  ;;  %3865 = vst.msk [vmem:[#allocation3 + $0xc8] sm:$0xff] %vm3839_vm2, %v18539_v47 }
 0x12f   : > { %3866 = vst.msk [vmem:[#allocation3 + $0xd0] sm:$0xff] %vm3839_vm2, %v18539_v47  ;;  %3867 = vst.msk [vmem:[#allocation3 + $0xd8] sm:$0xff] %vm3839_vm2, %v18539_v47 }
 0x130   : > { %12974 = vmatmul.mubr.msk.f32.gmra.mrb[28].mxu1 %vm279_vm1, %v1232_v37  ;;  %13197 = vmatmul.mubr.msk.f32.gmra.mrb[10].mxu0 %vm279_vm1, %v18534_v6  ;;  %3868 = vst.msk [vmem:[#allocation3 + $0xe0] sm:$0xff] %vm3839_vm2, %v18539_v47  ;;  %3869 = vst.msk [vmem:[#allocation3 + $0xe8] sm:$0xff] %vm3839_vm2, %v18539_v47 }
 0x131   : > { %12976 = vmatprep.mubr.msk.f32.mxu1 %vm279_vm1, %v1658_v5  ;;  %13199 = vmatprep.mubr.msk.f32.mxu0 %vm279_vm1, %v18535_v7  ;;  %3870 = vst.msk [vmem:[#allocation3 + $0xf0] sm:$0xff] %vm3839_vm2, %v18539_v47  ;;  %3871 = vst.msk [vmem:[#allocation3 + $0xf8] sm:$0xff] %vm3839_vm2, %v18539_v47 }
 0x132   : > { %3872 = vst.msk [vmem:[#allocation3 + $0x100] sm:$0xff] %vm3839_vm2, %v18539_v47  ;;  %3873 = vst.msk [vmem:[#allocation3 + $0x108] sm:$0xff] %vm3839_vm2, %v18539_v47 }
 0x133   : > { %3874 = vst.msk [vmem:[#allocation3 + $0x110] sm:$0xff] %vm3839_vm2, %v18539_v47  ;;  %3875 = vst.msk [vmem:[#allocation3 + $0x118] sm:$0xff] %vm3839_vm2, %v18539_v47 }
 0x134   : > { %12977 = vmatmul.mubr.msk.f32.gmra.mrb[30].mxu1 %vm279_vm1, %v1659_v8  ;;  %13200 = vmatmul.mubr.msk.f32.gmra.mrb[12].mxu0 %vm279_vm1, %v18536_v9  ;;  %3876 = vst.msk [vmem:[#allocation3 + $0x120] sm:$0xff] %vm3839_vm2, %v18539_v47  ;;  %3877 = vst.msk [vmem:[#allocation3 + $0x128] sm:$0xff] %vm3839_vm2, %v18539_v47 }
 0x135   : > { %13005 = vmatprep.mubr.msk.f32.mxu1 %vm279_vm1, %v15932_v30  ;;  %13202 = vmatprep.mubr.msk.f32.mxu0 %vm279_vm1, %v18537_v14  ;;  %3878 = vst.msk [vmem:[#allocation3 + $0x130] sm:$0xff] %vm3839_vm2, %v18539_v47  ;;  %3879 = vst.msk [vmem:[#allocation3 + $0x138] sm:$0xff] %vm3839_vm2, %v18539_v47 }
 0x136   : > { %3880 = vst.msk [vmem:[#allocation3 + $0x140] sm:$0xff] %vm3839_vm2, %v18539_v47  ;;  %3881 = vst.msk [vmem:[#allocation3 + $0x148] sm:$0xff] %vm3839_vm2, %v18539_v47 }
 0x137   : > { %3882 = vst.msk [vmem:[#allocation3 + $0x150] sm:$0xff] %vm3839_vm2, %v18539_v47  ;;  %3883 = vst.msk [vmem:[#allocation3 + $0x158] sm:$0xff] %vm3839_vm2, %v18539_v47 }
 0x138   : > { %13006 = vmatmul.mubr.msk.f32.vlgmr.msra.gmra.mrb[16].mxu1 %vm279_vm1, %v15942_v31  ;;  %13203 = vmatmul.mubr.msk.f32.gmra.mrb[14].mxu0 %vm279_vm1, %v15767_v22  ;;  %v1624_v22 = vld [vmem:[#allocation2 + $0x227] sm:$0xff]  ;;  %3884 = vst.msk [vmem:[#allocation3 + $0x160] sm:$0xff] %vm3839_vm2, %v18539_v47  ;;  %3885 = vst.msk [vmem:[#allocation3 + $0x168] sm:$0xff] %vm3839_vm2, %v18539_v47 }
 0x139   : > { %13008 = vmatprep.mubr.msk.f32.mxu1 %vm279_vm1, %v15944_v34  ;;  %13205 = vmatprep.mubr.msk.f32.mxu0 %vm279_vm1, %v18538_v16  ;;  %3886 = vst.msk [vmem:[#allocation3 + $0x170] sm:$0xff] %vm3839_vm2, %v18539_v47  ;;  %3887 = vst.msk [vmem:[#allocation3 + $0x178] sm:$0xff] %vm3839_vm2, %v18539_v47 }
 0x13a   : > { %3888 = vst.msk [vmem:[#allocation3 + $0x180] sm:$0xff] %vm3839_vm2, %v18539_v47  ;;  %3889 = vst.msk [vmem:[#allocation3 + $0x188] sm:$0xff] %vm3839_vm2, %v18539_v47 }
 0x13b   : > { %3890 = vst.msk [vmem:[#allocation3 + $0x190] sm:$0xff] %vm3839_vm2, %v18539_v47  ;;  %3891 = vst.msk [vmem:[#allocation3 + $0x198] sm:$0xff] %vm3839_vm2, %v18539_v47 }
 0x13c   : > { %13009 = vmatmul.mubr.msk.f32.gmra.mrb[18].mxu1 %vm279_vm1, %v15954_v36  ;;  %13206 = vmatmul.mubr.msk.f32.gmra.mrb[16].mxu0 %vm279_vm1, %v15779_v26  ;;  %v11190_v26 = vld [vmem:[%s18349_s3 + $0x30] sm:$0xff]  ;;  %3892 = vst.msk [vmem:[#allocation3 + $0x1a0] sm:$0xff] %vm3839_vm2, %v18539_v47  ;;  %3893 = vst.msk [vmem:[#allocation3 + $0x1a8] sm:$0xff] %vm3839_vm2, %v18539_v47 }
 0x13d   : > { %13011 = vmatprep.mubr.msk.f32.mxu1 %vm279_vm1, %v15956_v38  ;;  %13208 = vmatprep.mubr.msk.f32.mxu0 %vm279_vm1, %v15781_v24  ;;  %v11189_v24 = vld [vmem:[%s18349_s3 + $0x28] sm:$0xff]  ;;  %3894 = vst.msk [vmem:[#allocation3 + $0x1b0] sm:$0xff] %vm3839_vm2, %v18539_v47  ;;  %3895 = vst.msk [vmem:[#allocation3 + $0x1b8] sm:$0xff] %vm3839_vm2, %v18539_v47 }
 0x13e   : > { %3896 = vst.msk [vmem:[#allocation3 + $0x1c0] sm:$0xff] %vm3839_vm2, %v18539_v47  ;;  %3897 = vst.msk [vmem:[#allocation3 + $0x1c8] sm:$0xff] %vm3839_vm2, %v18539_v47 }
 0x13f   : > { %3898 = vst.msk [vmem:[#allocation3 + $0x1d0] sm:$0xff] %vm3839_vm2, %v18539_v47  ;;  %3899 = vst.msk [vmem:[#allocation3 + $0x1d8] sm:$0xff] %vm3839_vm2, %v18539_v47 }
 0x140   : > { %13012 = vmatmul.mubr.msk.f32.gmra.mrb[20].mxu1 %vm279_vm1, %v15966_v40  ;;  %13209 = vmatmul.mubr.msk.f32.gmra.mrb[18].mxu0 %vm279_vm1, %v15791_v48  ;;  %3900 = vst.msk [vmem:[#allocation3 + $0x1e0] sm:$0xff] %vm3839_vm2, %v18539_v47  ;;  %3901 = vst.msk [vmem:[#allocation3 + $0x1e8] sm:$0xff] %vm3839_vm2, %v18539_v47  ;;  %v3981_v48 = vld [vmem:[#allocation3 + $0x8] sm:$0xff] }
 0x141   : > { %13014 = vmatprep.mubr.msk.f32.mxu1 %vm279_vm1, %v15968_v42  ;;  %13211 = vmatprep.mubr.msk.f32.mxu0 %vm279_vm1, %v15793_v28  ;;  %v14241_v28 = vpack.c.bf16 %v11191_v27, %v11190_v26  ;;  %3902 = vst.msk [vmem:[#allocation3 + $0x1f0] sm:$0xff] %vm3839_vm2, %v18539_v47  ;;  %3903 = vst.msk [vmem:[#allocation3 + $0x1f8] sm:$0xff] %vm3839_vm2, %v18539_v47 }
 0x142   : > { %3904 = vst.msk [vmem:[#allocation3 + $0x200] sm:$0xff] %vm3839_vm2, %v18539_v47  ;;  %3905 = vst.msk [vmem:[#allocation3 + $0x208] sm:$0xff] %vm3839_vm2, %v18539_v47 }
 0x143   : > { %3906 = vst.msk [vmem:[#allocation3 + $0x210] sm:$0xff] %vm3839_vm2, %v18539_v47  ;;  %3907 = vst.msk [vmem:[#allocation3 + $0x218] sm:$0xff] %vm3839_vm2, %v18539_v47 }
 0x144   : > { %13015 = vmatmul.mubr.msk.f32.gmra.mrb[22].mxu1 %vm279_vm1, %v15978_v44  ;;  %13212 = vmatmul.mubr.msk.f32.gmra.mrb[20].mxu0 %vm279_vm1, %v15803_v56  ;;  %3908 = vst.msk [vmem:[#allocation3 + $0x220] sm:$0xff] %vm3839_vm2, %v18539_v47  ;;  %3909 = vst.msk [vmem:[#allocation3 + $0x228] sm:$0xff] %vm3839_vm2, %v18539_v47 }
 0x145   : > { %13017 = vmatprep.mubr.msk.f32.mxu1 %vm279_vm1, %v15980_v46  ;;  %13214 = vmatprep.mubr.msk.f32.mxu0 %vm279_vm1, %v15805_v51  ;;  %3910 = vst.msk [vmem:[#allocation3 + $0x230] sm:$0xff] %vm3839_vm2, %v18539_v47  ;;  %3911 = vst.msk [vmem:[#allocation3 + $0x238] sm:$0xff] %vm3839_vm2, %v18539_v47  ;;  %v11228_v51 = vld [vmem:[%s18349_s3 + $0x60] sm:$0xff] }
 0x146   : > { %v14245_v56 = vpack.c.bf16 %v11229_v54, %v11228_v51 }
 0x148   : > { %13018 = vmatmul.mubr.msk.f32.gmra.mrb[24].mxu1 %vm279_vm1, %v15990_v52  ;;  %13215 = vmatmul.mubr.msk.f32.gmra.mrb[22].mxu0 %vm279_vm1, %v15815_v60  ;;  %v11268_v60 = vld [vmem:[%s18349_s3 + $0xa0] sm:$0xff] }
 0x149   : > { %13020 = vmatprep.mubr.msk.f32.mxu1 %vm279_vm1, %v15992_v55  ;;  %13217 = vmatprep.mubr.msk.f32.mxu0 %vm279_vm1, %v15817_v58  ;;  %v11231_v58 = vld [vmem:[%s18349_s3 + $0x78] sm:$0xff] }
 0x14a   : > { %v14249_v59 = vpack.c.bf16 %v11231_v58, %v11230_v57 }
 0x14c   : > { %13021 = vmatmul.mubr.msk.f32.gmra.mrb[26].mxu1 %vm279_vm1, %v16002_v62  ;;  %13218 = vmatmul.mubr.msk.f32.gmra.mrb[24].mxu0 %vm279_vm1, %v15827_v13  ;;  %v16450_v62 = vld [vmem:[%s18348_s2] ss:$0 sm:$0xff] }
 0x14d   : > { %13023 = vmatprep.mubr.msk.f32.mxu1 %vm279_vm1, %v16054_v29  ;;  %13220 = vmatprep.mubr.msk.f32.mxu0 %vm279_vm1, %v15829_v12  ;;  %v16434_v12 = vpack.c.bf16 %v11269_v10, %v11268_v60 }
 0x150   : > { %13024 = vmatmul.mubr.msk.f32.gmra.mrb[28].mxu1 %vm279_vm1, %v16064_v32  ;;  %13221 = vmatmul.mubr.msk.f32.gmra.mrb[26].mxu0 %vm279_vm1, %v15839_v1  ;;  %v11188_v1 = vld [vmem:[%s18349_s3 + $0x20] sm:$0xff] }
 0x151   : > { %13026 = vmatprep.mubr.msk.f32.mxu1 %vm279_vm1, %v2016_v19  ;;  %13223 = vmatprep.mubr.msk.f32.mxu0 %vm279_vm1, %v15894_v18  ;;  %v14237_v25 = vpack.c.bf16 %v11189_v24, %v11188_v1 }
 0x153   : > { %14238 = vmatprep.subr.bf16.mxu1 %v14237_v25 }
 0x154   : > { %13027 = vmatmul.mubr.msk.f32.gmra.mrb[30].mxu1 %vm279_vm1, %v2017_v21  ;;  %13224 = vmatmul.mubr.msk.f32.gmra.mrb[28].mxu0 %vm279_vm1, %v15904_v15 }
 0x155   : > { %13226 = vmatprep.mubr.msk.f32.mxu0 %vm279_vm1, %v1624_v22  ;;  %14240 = vmatpush3.bf16.msra.mxu1 %v14237_v25 }
 0x156   : > { %14242 = vmatprep.subr.bf16.mxu1 %v14241_v28  ;;  %13237 = vmatprep.mubr.msk.f32.mxu1 %vm3839_vm2, %v3981_v48 }
 0x158   : > { %13227 = vmatmul.mubr.msk.f32.gmra.mrb[30].mxu0 %vm279_vm1, %v1625_v23 }
 0x159   : > { %14244 = vmatpush3.bf16.msra.mxu1 %v14241_v28 }
 0x15a   : > { %14246 = vmatprep.subr.bf16.mxu1 %v14245_v56 }
 0x15c   : > { %13238 = vmatmul.mubr.msk.f32.vlgmr.msra.gmra.mrb[32].mxu1 %vm3839_vm2, %v3982_v50 }
 0x15d   : > { %14248 = vmatpush3.bf16.msra.mxu1 %v14245_v56 }
 0x15e   : > { %14250 = vmatprep.subr.bf16.mxu1 %v14249_v59 }
 0x161   : > { %14252 = vmatpush3.bf16.msra.mxu1 %v14249_v59 }
 0x162   : > { %14254 = vmatprep.subr.bf16.mxu1 %v16434_v12 }
 0x1cb   : > { %v12933_v13 = vpop.f32.mrb[0].mxu1 }
 0x1cc   : > { %v1827_v17 = vpop.f32.mrb[1].mxu1 }
 0x1cf   : > { %v12936_v20 = vpop.f32.mrb[2].mxu1 }
 0x1d0   : > { %v1837_v11 = vpop.f32.mrb[3].mxu1 }
 0x1d3   : > { %v12939_v18 = vpop.f32.mrb[4].mxu1 }
 0x1d4   : > { %v1847_v15 = vpop.f32.mrb[5].mxu1 }
 0x1d7   : > { %v12942_v30 = vpop.f32.mrb[6].mxu1 }
 0x1d8   : > { %v1857_v31 = vpop.f32.mrb[7].mxu1 }
 0x1db   : > { %v12945_v34 = vpop.f32.mrb[8].mxu1 }
 0x1dc   : > { %v1867_v36 = vpop.f32.mrb[9].mxu1 }
 0x1df   : > { %v12948_v38 = vpop.f32.mrb[10].mxu1 }
 0x1e0   : > { %v16437_v40 = vpop.f32.mrb[11].mxu1 }
 0x1e3   : > { %v16439_v42 = vpop.f32.mrb[12].mxu1 }
 0x1e4   : > { %v16441_v44 = vpop.f32.mrb[13].mxu1 }
 0x1e7   : > { %v16443_v46 = vpop.f32.mrb[14].mxu1 }
 0x1e8   : > { %v16445_v52 = vpop.f32.mrb[15].mxu1 }
 0x1ef   : > { %v13183_v55 = vpop.f32.mrb[0].mxu0 }
 0x1f0   : > { %v3487_v29 = vadd.f32 %v13183_v55, %v12933_v13  ;;  %v3481_v32 = vpop.f32.mrb[1].mxu0 }
 0x1f1   : > { %v3482_v2 = vadd.f32 %v3481_v32, %v1827_v17 }
 0x1f2   : > { %v3776_v33 = vadd.f32 %v16450_v62, %v3487_v29 }
 0x1f3   : > { %v3775_v35 = vadd.f32 %v16450_v62, %v3482_v2  ;;  %v13186_v37 = vpop.f32.mrb[2].mxu0 }
 0x1f4   : > { %v3808_v39 = vmax.f32 %v3776_v33, 0.0  ;;  %v3497_v41 = vadd.f32 %v13186_v37, %v12936_v20  ;;  %v3491_v43 = vpop.f32.mrb[3].mxu0 }
 0x1f5   : > { %v3807_v45 = vmax.f32 %v3775_v35, 0.0  ;;  %v3492_v49 = vadd.f32 %v3491_v43, %v1837_v11 }
 0x1f6   : > { %3914 = vst.msk [vmem:[#allocation3 + $0x30] sm:$0xff] %vm3839_vm2, %v3808_v39  ;;  %v3778_v53 = vadd.f32 %v16450_v62, %v3497_v41 }
 0x1f7   : > { %3913 = vst.msk [vmem:[#allocation3 + $0x28] sm:$0xff] %vm3839_vm2, %v3807_v45  ;;  %v3777_v61 = vadd.f32 %v16450_v62, %v3492_v49  ;;  %v13189_v63 = vpop.f32.mrb[4].mxu0 }
 0x1f8   : > { %v3810_v0 = vmax.f32 %v3778_v53, 0.0  ;;  %v3507_v3 = vadd.f32 %v13189_v63, %v12939_v18  ;;  %v3501_v4 = vpop.f32.mrb[5].mxu0 }
 0x1f9   : > { %v3809_v5 = vmax.f32 %v3777_v61, 0.0  ;;  %v3502_v6 = vadd.f32 %v3501_v4, %v1847_v15 }
 0x1fa   : > { %3916 = vst.msk [vmem:[#allocation3 + $0x50] sm:$0xff] %vm3839_vm2, %v3810_v0  ;;  %v3780_v7 = vadd.f32 %v16450_v62, %v3507_v3 }
 0x1fb   : > { %3915 = vst.msk [vmem:[#allocation3 + $0x48] sm:$0xff] %vm3839_vm2, %v3809_v5  ;;  %v3779_v8 = vadd.f32 %v16450_v62, %v3502_v6  ;;  %v13192_v9 = vpop.f32.mrb[6].mxu0 }
 0x1fc   : > { %v3812_v14 = vmax.f32 %v3780_v7, 0.0  ;;  %v3517_v16 = vadd.f32 %v13192_v9, %v12942_v30  ;;  %v3511_v19 = vpop.f32.mrb[7].mxu0 }
 0x1fd   : > { %v3811_v21 = vmax.f32 %v3779_v8, 0.0  ;;  %v3512_v22 = vadd.f32 %v3511_v19, %v1857_v31  ;;  %v3984_v26 = vld [vmem:[#allocation3 + $0x30] sm:$0xff] }
 0x1fe   : > { %3918 = vst.msk [vmem:[#allocation3 + $0x70] sm:$0xff] %vm3839_vm2, %v3812_v14  ;;  %v3782_v23 = vadd.f32 %v16450_v62, %v3517_v16  ;;  %v3983_v1 = vld [vmem:[#allocation3 + $0x28] sm:$0xff] }
 0x1ff   : > { %3917 = vst.msk [vmem:[#allocation3 + $0x68] sm:$0xff] %vm3839_vm2, %v3811_v21  ;;  %v3781_v24 = vadd.f32 %v16450_v62, %v3512_v22  ;;  %v13195_v25 = vpop.f32.mrb[8].mxu0  ;;  %13240 = vmatprep.mubr.msk.f32.mxu1 %vm3839_vm2, %v3983_v1 }
 0x200   : > { %v3814_v27 = vmax.f32 %v3782_v23, 0.0  ;;  %v3527_v28 = vadd.f32 %v13195_v25, %v12945_v34  ;;  %v3521_v47 = vpop.f32.mrb[9].mxu0  ;;  %13241 = vmatmul.mubr.msk.f32.gmra.mrb[34].mxu1 %vm3839_vm2, %v3984_v26 }
 0x201   : > { %v3813_v48 = vmax.f32 %v3781_v24, 0.0  ;;  %v3522_v50 = vadd.f32 %v3521_v47, %v1867_v36  ;;  %v16476_v58 = vld [vmem:[#allocation3 + $0x50] sm:$0xff] }
 0x202   : > { %3920 = vst.msk [vmem:[#allocation3 + $0x90] sm:$0xff] %vm3839_vm2, %v3814_v27  ;;  %v3784_v51 = vadd.f32 %v16450_v62, %v3527_v28  ;;  %v16470_v54 = vld [vmem:[#allocation3 + $0x48] sm:$0xff] }
 0x203   : > { %3919 = vst.msk [vmem:[#allocation3 + $0x88] sm:$0xff] %vm3839_vm2, %v3813_v48  ;;  %v3783_v56 = vadd.f32 %v16450_v62, %v3522_v50  ;;  %v13198_v57 = vpop.f32.mrb[10].mxu0  ;;  %13243 = vmatprep.mubr.msk.f32.mxu1 %vm3839_vm2, %v16470_v54 }
 0x204   : > { %v3816_v59 = vmax.f32 %v3784_v51, 0.0  ;;  %v3537_v60 = vadd.f32 %v13198_v57, %v12948_v38  ;;  %v3531_v10 = vpop.f32.mrb[11].mxu0  ;;  %13244 = vmatmul.mubr.msk.f32.gmra.mrb[36].mxu1 %vm3839_vm2, %v16476_v58 }
 0x205   : > { %v3815_v13 = vmax.f32 %v3783_v56, 0.0  ;;  %v3532_v17 = vadd.f32 %v3531_v10, %v16437_v40  ;;  %v16489_v30 = vld [vmem:[#allocation3 + $0x70] sm:$0xff] }
 0x206   : > { %3922 = vst.msk [vmem:[#allocation3 + $0xb0] sm:$0xff] %vm3839_vm2, %v3816_v59  ;;  %v3786_v20 = vadd.f32 %v16450_v62, %v3537_v60  ;;  %v16483_v11 = vld [vmem:[#allocation3 + $0x68] sm:$0xff] }
 0x207   : > { %3921 = vst.msk [vmem:[#allocation3 + $0xa8] sm:$0xff] %vm3839_vm2, %v3815_v13  ;;  %v3785_v18 = vadd.f32 %v16450_v62, %v3532_v17  ;;  %v13201_v15 = vpop.f32.mrb[12].mxu0  ;;  %13246 = vmatprep.mubr.msk.f32.mxu1 %vm3839_vm2, %v16483_v11 }
 0x208   : > { %v3818_v31 = vmax.f32 %v3786_v20, 0.0  ;;  %v3547_v34 = vadd.f32 %v13201_v15, %v16439_v42  ;;  %v3541_v36 = vpop.f32.mrb[13].mxu0  ;;  %13247 = vmatmul.mubr.msk.f32.gmra.mrb[38].mxu1 %vm3839_vm2, %v16489_v30 }
 0x209   : > { %v3817_v38 = vmax.f32 %v3785_v18, 0.0  ;;  %v3542_v40 = vadd.f32 %v3541_v36, %v16441_v44  ;;  %v16503_v42 = vld [vmem:[#allocation3 + $0x90] sm:$0xff] }
 0x20a   : > { %3924 = vst.msk [vmem:[#allocation3 + $0xd0] sm:$0xff] %vm3839_vm2, %v3818_v31  ;;  %v3788_v55 = vadd.f32 %v16450_v62, %v3547_v34  ;;  %v16497_v29 = vld [vmem:[#allocation3 + $0x88] sm:$0xff] }
 0x20b   : > { %3923 = vst.msk [vmem:[#allocation3 + $0xc8] sm:$0xff] %vm3839_vm2, %v3817_v38  ;;  %v3787_v32 = vadd.f32 %v16450_v62, %v3542_v40  ;;  %v13007_v2 = vpop.f32.mrb[16].mxu1  ;;  %v13204_v33 = vpop.f32.mrb[14].mxu0  ;;  %13249 = vmatprep.mubr.msk.f32.mxu1 %vm3839_vm2, %v16497_v29 }
 0x20c   : > { %v3820_v35 = vmax.f32 %v3788_v55, 0.0  ;;  %v3557_v44 = vadd.f32 %v13204_v33, %v16443_v46  ;;  %v2265_v37 = vpop.f32.mrb[17].mxu1  ;;  %v3551_v39 = vpop.f32.mrb[15].mxu0  ;;  %13250 = vmatmul.mubr.msk.f32.gmra.mrb[40].mxu1 %vm3839_vm2, %v16503_v42 }
 0x20d   : > { %v3819_v41 = vmax.f32 %v3787_v32, 0.0  ;;  %v3552_v43 = vadd.f32 %v3551_v39, %v16445_v52  ;;  %v16517_v63 = vld [vmem:[#allocation3 + $0xb0] sm:$0xff] }
 0x20e   : > { %3926 = vst.msk [vmem:[#allocation3 + $0xf0] sm:$0xff] %vm3839_vm2, %v3820_v35  ;;  %v3790_v45 = vadd.f32 %v16450_v62, %v3557_v44  ;;  %v16511_v49 = vld [vmem:[#allocation3 + $0xa8] sm:$0xff] }
 0x20f   : > { %3925 = vst.msk [vmem:[#allocation3 + $0xe8] sm:$0xff] %vm3839_vm2, %v3819_v41  ;;  %v3789_v53 = vadd.f32 %v16450_v62, %v3552_v43  ;;  %v13010_v61 = vpop.f32.mrb[18].mxu1  ;;  %v13207_v46 = vpop.f32.mrb[16].mxu0  ;;  %13252 = vmatprep.mubr.msk.f32.mxu1 %vm3839_vm2, %v16511_v49 }
 0x210   : > { %v3822_v0 = vmax.f32 %v3790_v45, 0.0  ;;  %v14399_v3 = vadd.f32 %v13207_v46, %v13007_v2  ;;  %v2275_v52 = vpop.f32.mrb[19].mxu1  ;;  %v3561_v4 = vpop.f32.mrb[17].mxu0  ;;  %13253 = vmatmul.mubr.msk.f32.gmra.mrb[42].mxu1 %vm3839_vm2, %v16517_v63 }
 0x211   : > { %v3821_v5 = vmax.f32 %v3789_v53, 0.0  ;;  %v14400_v6 = vadd.f32 %v3561_v4, %v2265_v37  ;;  %v16529_v19 = vld [vmem:[#allocation3 + $0xd0] sm:$0xff] }
 0x212   : > { %3928 = vst.msk [vmem:[#allocation3 + $0x110] sm:$0xff] %vm3839_vm2, %v3822_v0  ;;  %v3792_v7 = vadd.f32 %v14399_v3, %v16450_v62  ;;  %v16523_v8 = vld [vmem:[#allocation3 + $0xc8] sm:$0xff] }
 0x213   : > { %3927 = vst.msk [vmem:[#allocation3 + $0x108] sm:$0xff] %vm3839_vm2, %v3821_v5  ;;  %v3791_v9 = vadd.f32 %v14400_v6, %v16450_v62  ;;  %v13013_v14 = vpop.f32.mrb[20].mxu1  ;;  %v13210_v16 = vpop.f32.mrb[18].mxu0  ;;  %13255 = vmatprep.mubr.msk.f32.mxu1 %vm3839_vm2, %v16523_v8 }
 0x214   : > { %v3824_v21 = vmax.f32 %v3792_v7, 0.0  ;;  %v14401_v22 = vadd.f32 %v13210_v16, %v13010_v61  ;;  %v2285_v23 = vpop.f32.mrb[21].mxu1  ;;  %v3571_v1 = vpop.f32.mrb[19].mxu0  ;;  %13256 = vmatmul.mubr.msk.f32.gmra.mrb[44].mxu1 %vm3839_vm2, %v16529_v19 }
 0x215   : > { %v3823_v24 = vmax.f32 %v3791_v9, 0.0  ;;  %v14402_v25 = vadd.f32 %v3571_v1, %v2275_v52  ;;  %v16541_v50 = vld [vmem:[#allocation3 + $0xf0] sm:$0xff] }
 0x216   : > { %3930 = vst.msk [vmem:[#allocation3 + $0x130] sm:$0xff] %vm3839_vm2, %v3824_v21  ;;  %v3794_v26 = vadd.f32 %v14401_v22, %v16450_v62  ;;  %v16535_v27 = vld [vmem:[#allocation3 + $0xe8] sm:$0xff] }
 0x217   : > { %3929 = vst.msk [vmem:[#allocation3 + $0x128] sm:$0xff] %vm3839_vm2, %v3823_v24  ;;  %v3793_v28 = vadd.f32 %v14402_v25, %v16450_v62  ;;  %v13016_v47 = vpop.f32.mrb[22].mxu1  ;;  %v13213_v48 = vpop.f32.mrb[20].mxu0  ;;  %13258 = vmatprep.mubr.msk.f32.mxu1 %vm3839_vm2, %v16535_v27 }
 0x218   : > { %v3826_v51 = vmax.f32 %v3794_v26, 0.0  ;;  %v14403_v56 = vadd.f32 %v13213_v48, %v13013_v14  ;;  %v2295_v57 = vpop.f32.mrb[23].mxu1  ;;  %v3581_v59 = vpop.f32.mrb[21].mxu0  ;;  %13259 = vmatmul.mubr.msk.f32.gmra.mrb[46].mxu1 %vm3839_vm2, %v16541_v50 }
 0x219   : > { %v3825_v60 = vmax.f32 %v3793_v28, 0.0  ;;  %v14404_v10 = vadd.f32 %v3581_v59, %v2285_v23  ;;  %v16553_v31 = vld [vmem:[#allocation3 + $0x110] sm:$0xff] }
 0x21a   : > { %3932 = vst.msk [vmem:[#allocation3 + $0x150] sm:$0xff] %vm3839_vm2, %v3826_v51  ;;  %v3796_v13 = vadd.f32 %v14403_v56, %v16450_v62  ;;  %v16547_v17 = vld [vmem:[#allocation3 + $0x108] sm:$0xff] }
 0x21b   : > { %3931 = vst.msk [vmem:[#allocation3 + $0x148] sm:$0xff] %vm3839_vm2, %v3825_v60  ;;  %v3795_v20 = vadd.f32 %v14404_v10, %v16450_v62  ;;  %v13019_v18 = vpop.f32.mrb[24].mxu1  ;;  %v13216_v15 = vpop.f32.mrb[22].mxu0  ;;  %13261 = vmatprep.mubr.msk.f32.mxu1 %vm3839_vm2, %v16547_v17 }
 0x21c   : > { %v3828_v34 = vmax.f32 %v3796_v13, 0.0  ;;  %v14405_v36 = vadd.f32 %v13216_v15, %v13016_v47  ;;  %v2305_v38 = vpop.f32.mrb[25].mxu1  ;;  %v3591_v40 = vpop.f32.mrb[23].mxu0  ;;  %13262 = vmatmul.mubr.msk.f32.gmra.mrb[48].mxu1 %vm3839_vm2, %v16553_v31 }
 0x21d   : > { %v3827_v55 = vmax.f32 %v3795_v20, 0.0  ;;  %v14406_v32 = vadd.f32 %v3591_v40, %v2295_v57  ;;  %v16565_v39 = vld [vmem:[#allocation3 + $0x130] sm:$0xff] }
 0x21e   : > { %3934 = vst.msk [vmem:[#allocation3 + $0x170] sm:$0xff] %vm3839_vm2, %v3828_v34  ;;  %v3798_v2 = vadd.f32 %v14405_v36, %v16450_v62  ;;  %v16559_v33 = vld [vmem:[#allocation3 + $0x128] sm:$0xff] }
 0x21f   : > { %3933 = vst.msk [vmem:[#allocation3 + $0x168] sm:$0xff] %vm3839_vm2, %v3827_v55  ;;  %v3797_v35 = vadd.f32 %v14406_v32, %v16450_v62  ;;  %v13022_v44 = vpop.f32.mrb[26].mxu1  ;;  %v13219_v37 = vpop.f32.mrb[24].mxu0  ;;  %13264 = vmatprep.mubr.msk.f32.mxu1 %vm3839_vm2, %v16559_v33 }
 0x220   : > { %v3830_v41 = vmax.f32 %v3798_v2, 0.0  ;;  %v14407_v43 = vadd.f32 %v13219_v37, %v13019_v18  ;;  %v2315_v45 = vpop.f32.mrb[27].mxu1  ;;  %v3601_v53 = vpop.f32.mrb[25].mxu0  ;;  %13265 = vmatmul.mubr.msk.f32.gmra.mrb[50].mxu1 %vm3839_vm2, %v16565_v39 }
 0x221   : > { %v3829_v61 = vmax.f32 %v3797_v35, 0.0  ;;  %v14408_v46 = vadd.f32 %v3601_v53, %v2305_v38  ;;  %v16577_v6 = vld [vmem:[#allocation3 + $0x150] sm:$0xff] }
 0x222   : > { %3936 = vst.msk [vmem:[#allocation3 + $0x190] sm:$0xff] %vm3839_vm2, %v3830_v41  ;;  %v3800_v0 = vadd.f32 %v14407_v43, %v16450_v62  ;;  %v16571_v3 = vld [vmem:[#allocation3 + $0x148] sm:$0xff]  ;;  %v11270_v53 = vld [vmem:[%s18349_s3 + $0xb0] sm:$0xff] }
 0x223   : > { %3935 = vst.msk [vmem:[#allocation3 + $0x188] sm:$0xff] %vm3839_vm2, %v3829_v61  ;;  %v3799_v52 = vadd.f32 %v14408_v46, %v16450_v62  ;;  %v13025_v4 = vpop.f32.mrb[28].mxu1  ;;  %v13222_v5 = vpop.f32.mrb[26].mxu0  ;;  %13267 = vmatprep.mubr.msk.f32.mxu1 %vm3839_vm2, %v16571_v3  ;;  %v11271_v61 = vld [vmem:[%s18349_s3 + $0xb8] sm:$0xff]  ;;  %v16641_v46 = vld [vmem:[#allocation3 + $0x27] sm:$0xff] }
 0x224   : > { %v3832_v7 = vmax.f32 %v3800_v0, 0.0  ;;  %v14409_v9 = vadd.f32 %v13222_v5, %v13022_v44  ;;  %v2325_v14 = vpop.f32.mrb[29].mxu1  ;;  %v3611_v16 = vpop.f32.mrb[27].mxu0  ;;  %13268 = vmatmul.mubr.msk.f32.gmra.mrb[52].mxu1 %vm3839_vm2, %v16577_v6  ;;  %18540 = vst [vmem:[#allocation12_spill] sm:$0xff] %v16641_v46  ;;  %v14257_v0 = vpack.c.bf16 %v11271_v61, %v11270_v53  ;;  %v11309_v5 = vld [vmem:[%s18349_s3 + $0xe8] sm:$0xff] }
 0x225   : > { %v3831_v21 = vmax.f32 %v3799_v52, 0.0  ;;  %v14410_v22 = vadd.f32 %v3611_v16, %v2315_v45  ;;  %v16589_v28 = vld [vmem:[#allocation3 + $0x170] sm:$0xff]  ;;  %v16666_v16 = vld [vmem:[#allocation3 + $0x67] sm:$0xff] }
 0x226   : > { %3938 = vst.msk [vmem:[#allocation3 + $0x1b0] sm:$0xff] %vm3839_vm2, %v3832_v7  ;;  %v3802_v23 = vadd.f32 %v14409_v9, %v16450_v62  ;;  %v16583_v1 = vld [vmem:[#allocation3 + $0x168] sm:$0xff]  ;;  %18544 = vst [vmem:[#allocation6_spill] sm:$0xff] %v16666_v16 }
 0x227   : > { %3937 = vst.msk [vmem:[#allocation3 + $0x1a8] sm:$0xff] %vm3839_vm2, %v3831_v21  ;;  %v3801_v24 = vadd.f32 %v14410_v22, %v16450_v62  ;;  %v13028_v25 = vpop.f32.mrb[30].mxu1  ;;  %v13225_v26 = vpop.f32.mrb[28].mxu0  ;;  %13270 = vmatprep.mubr.msk.f32.mxu1 %vm3839_vm2, %v16583_v1  ;;  %v16645_v52 = vld [vmem:[#allocation3 + $0x2f] sm:$0xff]  ;;  %v16655_v7 = vld [vmem:[#allocation3 + $0x47] sm:$0xff] }
 0x228   : > { %v3834_v47 = vmax.f32 %v3802_v23, 0.0  ;;  %v14411_v48 = vadd.f32 %v13225_v26, %v13025_v4  ;;  %v2335_v51 = vpop.f32.mrb[31].mxu1  ;;  %v3621_v56 = vpop.f32.mrb[29].mxu0  ;;  %13271 = vmatmul.mubr.msk.f32.gmra.mrb[54].mxu1 %vm3839_vm2, %v16589_v28  ;;  %18541 = vst [vmem:[#allocation14_spill] sm:$0xff] %v16645_v52  ;;  %v11308_v4 = vld [vmem:[%s18349_s3 + $0xe0] sm:$0xff]  ;;  %18542 = vst [vmem:[#allocation4_spill] sm:$0xff] %v16655_v7 }
 0x229   : > { %v3833_v57 = vmax.f32 %v3801_v24, 0.0  ;;  %v14412_v59 = vadd.f32 %v3621_v56, %v2325_v14  ;;  %v16601_v18 = vld [vmem:[#allocation3 + $0x190] sm:$0xff]  ;;  %v16660_v9 = vpack.c.bf16 %v11309_v5, %v11308_v4  ;;  %v16675_v21 = vld [vmem:[#allocation3 + $0x87] sm:$0xff]  ;;  %v11311_v4 = vld [vmem:[%s18349_s3 + $0xf8] sm:$0xff] }
 0x22a   : > { %3940 = vst.msk [vmem:[#allocation3 + $0x1d0] sm:$0xff] %vm3839_vm2, %v3834_v47  ;;  %v3804_v60 = vadd.f32 %v14411_v48, %v16450_v62  ;;  %v16595_v10 = vld [vmem:[#allocation3 + $0x188] sm:$0xff]  ;;  %18546 = vst [vmem:[#allocation8_spill] sm:$0xff] %v16675_v21 }
 0x22b   : > { %3939 = vst.msk [vmem:[#allocation3 + $0x1c8] sm:$0xff] %vm3839_vm2, %v3833_v57  ;;  %v3803_v13 = vadd.f32 %v14412_v59, %v16450_v62  ;;  %v13228_v20 = vpop.f32.mrb[30].mxu0  ;;  %13273 = vmatprep.mubr.msk.f32.mxu1 %vm3839_vm2, %v16595_v10  ;;  %v16662_v14 = vld [vmem:[#allocation3 + $0x4f] sm:$0xff]  ;;  %v16683_v23 = vld [vmem:[#allocation3 + $0xa7] sm:$0xff] }
 0x22c   : > { %v3836_v15 = vmax.f32 %v3804_v60, 0.0  ;;  %v14413_v34 = vadd.f32 %v13228_v20, %v13028_v25  ;;  %v3631_v36 = vpop.f32.mrb[31].mxu0  ;;  %13274 = vmatmul.mubr.msk.f32.gmra.mrb[56].mxu1 %vm3839_vm2, %v16601_v18  ;;  %18543 = vst [vmem:[#allocation5_spill] sm:$0xff] %v16662_v14  ;;  %v16679_v22 = vld [vmem:[#allocation3 + $0x8f] sm:$0xff]  ;;  %18548 = vst [vmem:[#allocation10_spill] sm:$0xff] %v16683_v23  ;;  %v16691_v25 = vld [vmem:[#allocation3 + $0xc7] sm:$0xff] }
 0x22d   : > { %v3835_v38 = vmax.f32 %v3803_v13, 0.0  ;;  %v14414_v40 = vadd.f32 %v3631_v36, %v2335_v51  ;;  %v16613_v35 = vld [vmem:[#allocation3 + $0x1b0] sm:$0xff]  ;;  %18547 = vst [vmem:[#allocation9_spill] sm:$0xff] %v16679_v22  ;;  %18550 = vst [vmem:[#allocation13_spill] sm:$0xff] %v16691_v25  ;;  %v16699_v47 = vld [vmem:[#allocation3 + $0xe7] sm:$0xff] }
 0x22e   : > { %3942 = vst.msk [vmem:[#allocation3 + $0x1f0] sm:$0xff] %vm3839_vm2, %v3836_v15  ;;  %v3806_v55 = vadd.f32 %v14413_v34, %v16450_v62  ;;  %v16607_v32 = vld [vmem:[#allocation3 + $0x1a8] sm:$0xff]  ;;  %18552 = vst [vmem:[#allocation16_spill] sm:$0xff] %v16699_v47 }
 0x22f   : > { %3941 = vst.msk [vmem:[#allocation3 + $0x1e8] sm:$0xff] %vm3839_vm2, %v3835_v38  ;;  %v3805_v2 = vadd.f32 %v14414_v40, %v16450_v62  ;;  %13276 = vmatprep.mubr.msk.f32.mxu1 %vm3839_vm2, %v16607_v32  ;;  %v16687_v24 = vld [vmem:[#allocation3 + $0xaf] sm:$0xff]  ;;  %v16707_v51 = vld [vmem:[#allocation3 + $0x107] sm:$0xff] }
 0x230   : > { %v3838_v44 = vmax.f32 %v3806_v55, 0.0  ;;  %13277 = vmatmul.mubr.msk.f32.gmra.mrb[58].mxu1 %vm3839_vm2, %v16613_v35  ;;  %18549 = vst [vmem:[#allocation11_spill] sm:$0xff] %v16687_v24  ;;  %v16695_v26 = vld [vmem:[#allocation3 + $0xcf] sm:$0xff]  ;;  %18554 = vst [vmem:[#allocation18_spill] sm:$0xff] %v16707_v51  ;;  %v16715_v57 = vld [vmem:[#allocation3 + $0x127] sm:$0xff] }
 0x231   : > { %v3837_v37 = vmax.f32 %v3805_v2, 0.0  ;;  %v16623_v62 = vld [vmem:[#allocation3 + $0x1d0] sm:$0xff]  ;;  %18551 = vst [vmem:[#allocation15_spill] sm:$0xff] %v16695_v26  ;;  %18556 = vst [vmem:[#allocation20_spill] sm:$0xff] %v16715_v57  ;;  %v16723_v60 = vld [vmem:[#allocation3 + $0x147] sm:$0xff] }
 0x232   : > { %3944 = vst.msk [vmem:[#allocation3 + $0x210] sm:$0xff] %vm3839_vm2, %v3838_v44  ;;  %v16618_v41 = vld [vmem:[#allocation3 + $0x1c8] sm:$0xff]  ;;  %18558 = vst [vmem:[#allocation22_spill] sm:$0xff] %v16723_v60 }
 0x233   : > { %3943 = vst.msk [vmem:[#allocation3 + $0x208] sm:$0xff] %vm3839_vm2, %v3837_v37  ;;  %13279 = vmatprep.mubr.msk.f32.mxu1 %vm3839_vm2, %v16618_v41  ;;  %v16703_v48 = vld [vmem:[#allocation3 + $0xef] sm:$0xff]  ;;  %v16731_v20 = vld [vmem:[#allocation3 + $0x167] sm:$0xff] }
 0x234   : > { %13280 = vmatmul.mubr.msk.f32.gmra.mrb[60].mxu1 %vm3839_vm2, %v16623_v62  ;;  %18553 = vst [vmem:[#allocation17_spill] sm:$0xff] %v16703_v48  ;;  %v16711_v56 = vld [vmem:[#allocation3 + $0x10f] sm:$0xff]  ;;  %18560 = vst [vmem:[#allocation24_spill] sm:$0xff] %v16731_v20  ;;  %v16739_v34 = vld [vmem:[#allocation3 + $0x187] sm:$0xff] }
 0x235   : > { %v16631_v45 = vld [vmem:[#allocation3 + $0x1f0] sm:$0xff]  ;;  %18555 = vst [vmem:[#allocation19_spill] sm:$0xff] %v16711_v56  ;;  %18562 = vst [vmem:[#allocation26_spill] sm:$0xff] %v16739_v34  ;;  %v16747_v38 = vld [vmem:[#allocation3 + $0x1a7] sm:$0xff] }
 0x236   : > { %v16627_v43 = vld [vmem:[#allocation3 + $0x1e8] sm:$0xff]  ;;  %18564 = vst [vmem:[#allocation28_spill] sm:$0xff] %v16747_v38 }
 0x237   : > { %13282 = vmatprep.mubr.msk.f32.mxu1 %vm3839_vm2, %v16627_v43  ;;  %v16719_v59 = vld [vmem:[#allocation3 + $0x12f] sm:$0xff]  ;;  %v16755_v55 = vld [vmem:[#allocation3 + $0x1c7] sm:$0xff] }
 0x238   : > { %13283 = vmatmul.mubr.msk.f32.gmra.mrb[62].mxu1 %vm3839_vm2, %v16631_v45  ;;  %18557 = vst [vmem:[#allocation21_spill] sm:$0xff] %v16719_v59  ;;  %v16727_v13 = vld [vmem:[#allocation3 + $0x14f] sm:$0xff]  ;;  %18566 = vst [vmem:[#allocation30_spill] sm:$0xff] %v16755_v55  ;;  %v16763_v44 = vld [vmem:[#allocation3 + $0x1e7] sm:$0xff] }
 0x239   : > { %13293 = vmatprep.mubr.msk.f32.mxu1 %vm3839_vm2, %v16641_v46  ;;  %18559 = vst [vmem:[#allocation23_spill] sm:$0xff] %v16727_v13  ;;  %v16735_v15 = vld [vmem:[#allocation3 + $0x16f] sm:$0xff]  ;;  %18568 = vst [vmem:[#allocation32_spill] sm:$0xff] %v16763_v44 }
 0x23a   : > { %18561 = vst [vmem:[#allocation25_spill] sm:$0xff] %v16735_v15  ;;  %v16743_v36 = vld [vmem:[#allocation3 + $0x18f] sm:$0xff]  ;;  %v16771_v53 = vld [vmem:[#allocation3 + $0x207] sm:$0xff] }
 0x23b   : > { %18563 = vst [vmem:[#allocation27_spill] sm:$0xff] %v16743_v36  ;;  %v16751_v40 = vld [vmem:[#allocation3 + $0x1af] sm:$0xff]  ;;  %18570 = vst [vmem:[#allocation34_spill] sm:$0xff] %v16771_v53 }
 0x23c   : > { %13294 = vmatmul.mubr.msk.f32.vlgmr.msra.gmra.mrb[32].mxu1 %vm3839_vm2, %v16645_v52  ;;  %18565 = vst [vmem:[#allocation29_spill] sm:$0xff] %v16751_v40  ;;  %v16759_v2 = vld [vmem:[#allocation3 + $0x1cf] sm:$0xff]  ;;  %v3977_v52 = vld [vmem:[%s18349_s3] sm:$0xff] }
 0x23d   : > { %14256 = vmatpush3.bf16.msra.mxu1 %v16434_v12  ;;  %13296 = vmatprep.mubr.msk.f32.mxu1 %vm3839_vm2, %v16655_v7  ;;  %v16671_v12 = vld [vmem:[#allocation3 + $0x6f] sm:$0xff]  ;;  %18567 = vst [vmem:[#allocation31_spill] sm:$0xff] %v16759_v2 }
 0x23e   : > { %14258 = vmatprep.subr.bf16.mxu1 %v14257_v0  ;;  %18545 = vst [vmem:[#allocation7_spill] sm:$0xff] %v16671_v12  ;;  %v16767_v37 = vld [vmem:[#allocation3 + $0x1ef] sm:$0xff] }
 0x23f   : > { %18569 = vst [vmem:[#allocation33_spill] sm:$0xff] %v16767_v37  ;;  %v16775_v61 = vld [vmem:[#allocation3 + $0x20f] sm:$0xff] }
 0x240   : > { %13297 = vmatmul.mubr.msk.f32.gmra.mrb[34].mxu1 %vm3839_vm2, %v16662_v14  ;;  %18571 = vst [vmem:[#allocation35_spill] sm:$0xff] %v16775_v61  ;;  %v16785_v5 = vld [vmem:[#allocation3 + $0x29] sm:$0xff]  ;;  %v11347_v14 = vld [vmem:[%s18349_s3 + $0x118] sm:$0xff] }
 0x241   : > { %13299 = vmatprep.mubr.msk.f32.mxu1 %vm3839_vm2, %v16666_v16  ;;  %14260 = vmatpush3.bf16.msra.mxu1 %v14257_v0  ;;  %v11310_v0 = vld [vmem:[%s18349_s3 + $0xf0] sm:$0xff]  ;;  %18572 = vst [vmem:[#allocation36_spill] sm:$0xff] %v16785_v5  ;;  %v3978_v46 = vld [vmem:[%s18349_s3 + $0x8] sm:$0xff] }
 0x242   : > { %14262 = vmatprep.subr.bf16.mxu1 %v16660_v9  ;;  %v11346_v16 = vld [vmem:[%s18349_s3 + $0x110] sm:$0xff] }
 0x243   : > { %v14273_v7 = vpack.c.bf16 %v11347_v14, %v11346_v16  ;;  %v18586_v14 = vld [vmem:[#allocation13_spill] sm:$0xff]  ;;  %v18587_v16 = vld [vmem:[#allocation15_spill] sm:$0xff] }
 0x244   : > { %13300 = vmatmul.mubr.msk.f32.gmra.mrb[36].mxu1 %vm3839_vm2, %v16671_v12  ;;  %v16919_v12 = vld [vmem:[#allocation3 + $0x211] sm:$0xff] }
 0x245   : > { %13302 = vmatprep.mubr.msk.f32.mxu1 %vm3839_vm2, %v16675_v21  ;;  %v16915_v21 = vld [vmem:[#allocation3 + $0x209] sm:$0xff]  ;;  %18574 = vst [vmem:[#allocation38_spill] sm:$0xff] %v16919_v12 }
 0x248   : > { %13303 = vmatmul.mubr.msk.f32.gmra.mrb[38].mxu1 %vm3839_vm2, %v16679_v22  ;;  %v16911_v22 = vld [vmem:[#allocation3 + $0x1f1] sm:$0xff] }
 0x249   : > { %13305 = vmatprep.mubr.msk.f32.mxu1 %vm3839_vm2, %v16683_v23  ;;  %v16907_v23 = vld [vmem:[#allocation3 + $0x1e9] sm:$0xff] }
 0x24c   : > { %13306 = vmatmul.mubr.msk.f32.gmra.mrb[40].mxu1 %vm3839_vm2, %v16687_v24  ;;  %v16903_v24 = vld [vmem:[#allocation3 + $0x1d1] sm:$0xff] }
 0x24d   : > { %13308 = vmatprep.mubr.msk.f32.mxu1 %vm3839_vm2, %v16691_v25  ;;  %v16899_v25 = vld [vmem:[#allocation3 + $0x1c9] sm:$0xff] }
 0x250   : > { %13309 = vmatmul.mubr.msk.f32.gmra.mrb[42].mxu1 %vm3839_vm2, %v16695_v26  ;;  %v16895_v26 = vld [vmem:[#allocation3 + $0x1b1] sm:$0xff] }
 0x251   : > { %13311 = vmatprep.mubr.msk.f32.mxu1 %vm3839_vm2, %v16699_v47  ;;  %v16891_v47 = vld [vmem:[#allocation3 + $0x1a9] sm:$0xff] }
 0x254   : > { %13312 = vmatmul.mubr.msk.f32.gmra.mrb[44].mxu1 %vm3839_vm2, %v16703_v48  ;;  %v16887_v48 = vld [vmem:[#allocation3 + $0x191] sm:$0xff] }
 0x255   : > { %13314 = vmatprep.mubr.msk.f32.mxu1 %vm3839_vm2, %v16707_v51  ;;  %v16883_v51 = vld [vmem:[#allocation3 + $0x189] sm:$0xff] }
 0x258   : > { %13315 = vmatmul.mubr.msk.f32.gmra.mrb[46].mxu1 %vm3839_vm2, %v16711_v56  ;;  %v16879_v56 = vld [vmem:[#allocation3 + $0x171] sm:$0xff] }
 0x259   : > { %13317 = vmatprep.mubr.msk.f32.mxu1 %vm3839_vm2, %v16715_v57  ;;  %v16875_v57 = vld [vmem:[#allocation3 + $0x169] sm:$0xff] }
 0x25c   : > { %13318 = vmatmul.mubr.msk.f32.gmra.mrb[48].mxu1 %vm3839_vm2, %v16719_v59  ;;  %v16871_v59 = vld [vmem:[#allocation3 + $0x151] sm:$0xff] }
 0x25d   : > { %13320 = vmatprep.mubr.msk.f32.mxu1 %vm3839_vm2, %v16723_v60  ;;  %v16867_v60 = vld [vmem:[#allocation3 + $0x149] sm:$0xff] }
 0x260   : > { %13321 = vmatmul.mubr.msk.f32.gmra.mrb[50].mxu1 %vm3839_vm2, %v16727_v13  ;;  %v16863_v13 = vld [vmem:[#allocation3 + $0x131] sm:$0xff] }
 0x261   : > { %13323 = vmatprep.mubr.msk.f32.mxu1 %vm3839_vm2, %v16731_v20  ;;  %v16859_v20 = vld [vmem:[#allocation3 + $0x129] sm:$0xff] }
 0x264   : > { %13324 = vmatmul.mubr.msk.f32.gmra.mrb[52].mxu1 %vm3839_vm2, %v16735_v15  ;;  %v16855_v15 = vld [vmem:[#allocation3 + $0x111] sm:$0xff] }
 0x265   : > { %13326 = vmatprep.mubr.msk.f32.mxu1 %vm3839_vm2, %v16739_v34  ;;  %v16851_v34 = vld [vmem:[#allocation3 + $0x109] sm:$0xff] }
 0x268   : > { %13327 = vmatmul.mubr.msk.f32.gmra.mrb[54].mxu1 %vm3839_vm2, %v16743_v36  ;;  %v16847_v36 = vld [vmem:[#allocation3 + $0xf1] sm:$0xff] }
 0x269   : > { %13329 = vmatprep.mubr.msk.f32.mxu1 %vm3839_vm2, %v16747_v38  ;;  %v16843_v38 = vld [vmem:[#allocation3 + $0xe9] sm:$0xff] }
 0x26c   : > { %13330 = vmatmul.mubr.msk.f32.gmra.mrb[56].mxu1 %vm3839_vm2, %v16751_v40  ;;  %v16839_v40 = vld [vmem:[#allocation3 + $0xd1] sm:$0xff] }
 0x26d   : > { %13332 = vmatprep.mubr.msk.f32.mxu1 %vm3839_vm2, %v16755_v55  ;;  %v16835_v55 = vld [vmem:[#allocation3 + $0xc9] sm:$0xff] }
 0x270   : > { %13333 = vmatmul.mubr.msk.f32.gmra.mrb[58].mxu1 %vm3839_vm2, %v16759_v2  ;;  %v11345_v2 = vld [vmem:[%s18349_s3 + $0x108] sm:$0xff] }
 0x271   : > { %13335 = vmatprep.mubr.msk.f32.mxu1 %vm3839_vm2, %v16763_v44  ;;  %v11344_v44 = vld [vmem:[%s18349_s3 + $0x100] sm:$0xff] }
 0x274   : > { %13336 = vmatmul.mubr.msk.f32.gmra.mrb[60].mxu1 %vm3839_vm2, %v16767_v37  ;;  %v14265_v37 = vpack.c.bf16 %v11311_v4, %v11310_v0  ;;  %v16804_v0 = vpack.c.bf16 %v11345_v2, %v11344_v44  ;;  %v16806_v4 = vld [vmem:[#allocation3 + $0x51] sm:$0xff]  ;;  %v16819_v2 = vld [vmem:[#allocation3 + $0x89] sm:$0xff] }
 0x275   : > { %13338 = vmatprep.mubr.msk.f32.mxu1 %vm3839_vm2, %v16771_v53  ;;  %v16789_v53 = vld [vmem:[#allocation3 + $0x31] sm:$0xff] }
 0x276   : > { %18573 = vst [vmem:[#allocation37_spill] sm:$0xff] %v16789_v53  ;;  %v16823_v44 = vld [vmem:[#allocation3 + $0x91] sm:$0xff] }
 0x278   : > { %13339 = vmatmul.mubr.msk.f32.gmra.mrb[62].mxu1 %vm3839_vm2, %v16775_v61  ;;  %v16799_v61 = vld [vmem:[#allocation3 + $0x49] sm:$0xff] }
 0x279   : > { %13349 = vmatprep.mubr.msk.f32.mxu1 %vm3839_vm2, %v16785_v5  ;;  %v16810_v5 = vld [vmem:[#allocation3 + $0x69] sm:$0xff] }
 0x27c   : > { %13350 = vmatmul.mubr.msk.f32.vlgmr.msra.gmra.mrb[32].mxu1 %vm3839_vm2, %v16789_v53  ;;  %v16827_v53 = vld [vmem:[#allocation3 + $0xa9] sm:$0xff] }
 0x27d   : > { %14264 = vmatpush3.bf16.msra.mxu1 %v16660_v9  ;;  %13352 = vmatprep.mubr.msk.f32.mxu1 %vm3839_vm2, %v16799_v61  ;;  %v16815_v9 = vld [vmem:[#allocation3 + $0x71] sm:$0xff] }
 0x27e   : > { %14266 = vmatprep.subr.bf16.mxu1 %v14265_v37 }
 0x280   : > { %13353 = vmatmul.mubr.msk.f32.gmra.mrb[34].mxu1 %vm3839_vm2, %v16806_v4 }
 0x281   : > { %13355 = vmatprep.mubr.msk.f32.mxu1 %vm3839_vm2, %v16810_v5  ;;  %14268 = vmatpush3.bf16.msra.mxu1 %v14265_v37  ;;  %v16831_v37 = vld [vmem:[#allocation3 + $0xb1] sm:$0xff] }
 0x282   : > { %14270 = vmatprep.subr.bf16.mxu1 %v16804_v0 }
 0x284   : > { %13356 = vmatmul.mubr.msk.f32.gmra.mrb[36].mxu1 %vm3839_vm2, %v16815_v9 }
 0x285   : > { %13358 = vmatprep.mubr.msk.f32.mxu1 %vm3839_vm2, %v16819_v2 }
 0x288   : > { %13359 = vmatmul.mubr.msk.f32.gmra.mrb[38].mxu1 %vm3839_vm2, %v16823_v44 }
 0x289   : > { %13361 = vmatprep.mubr.msk.f32.mxu1 %vm3839_vm2, %v16827_v53 }
 0x28c   : > { %13362 = vmatmul.mubr.msk.f32.gmra.mrb[40].mxu1 %vm3839_vm2, %v16831_v37 }
 0x28d   : > { %13364 = vmatprep.mubr.msk.f32.mxu1 %vm3839_vm2, %v16835_v55 }
 0x290   : > { %13365 = vmatmul.mubr.msk.f32.gmra.mrb[42].mxu1 %vm3839_vm2, %v16839_v40 }
 0x291   : > { %13367 = vmatprep.mubr.msk.f32.mxu1 %vm3839_vm2, %v16843_v38 }
 0x294   : > { %13368 = vmatmul.mubr.msk.f32.gmra.mrb[44].mxu1 %vm3839_vm2, %v16847_v36 }
 0x295   : > { %13370 = vmatprep.mubr.msk.f32.mxu1 %vm3839_vm2, %v16851_v34 }
 0x298   : > { %13371 = vmatmul.mubr.msk.f32.gmra.mrb[46].mxu1 %vm3839_vm2, %v16855_v15 }
 0x299   : > { %13373 = vmatprep.mubr.msk.f32.mxu1 %vm3839_vm2, %v16859_v20 }
 0x29c   : > { %13374 = vmatmul.mubr.msk.f32.gmra.mrb[48].mxu1 %vm3839_vm2, %v16863_v13 }
 0x29d   : > { %13376 = vmatprep.mubr.msk.f32.mxu1 %vm3839_vm2, %v16867_v60 }
 0x2a0   : > { %13377 = vmatmul.mubr.msk.f32.gmra.mrb[50].mxu1 %vm3839_vm2, %v16871_v59 }
 0x2a1   : > { %13379 = vmatprep.mubr.msk.f32.mxu1 %vm3839_vm2, %v16875_v57 }
 0x2a4   : > { %13380 = vmatmul.mubr.msk.f32.gmra.mrb[52].mxu1 %vm3839_vm2, %v16879_v56 }
 0x2a5   : > { %13382 = vmatprep.mubr.msk.f32.mxu1 %vm3839_vm2, %v16883_v51 }
 0x2a8   : > { %13383 = vmatmul.mubr.msk.f32.gmra.mrb[54].mxu1 %vm3839_vm2, %v16887_v48 }
 0x2a9   : > { %13385 = vmatprep.mubr.msk.f32.mxu1 %vm3839_vm2, %v16891_v47 }
 0x2ac   : > { %13386 = vmatmul.mubr.msk.f32.gmra.mrb[56].mxu1 %vm3839_vm2, %v16895_v26 }
 0x2ad   : > { %13388 = vmatprep.mubr.msk.f32.mxu1 %vm3839_vm2, %v16899_v25 }
 0x2b0   : > { %13389 = vmatmul.mubr.msk.f32.gmra.mrb[58].mxu1 %vm3839_vm2, %v16903_v24 }
 0x2b1   : > { %13391 = vmatprep.mubr.msk.f32.mxu1 %vm3839_vm2, %v16907_v23 }
 0x2b4   : > { %13392 = vmatmul.mubr.msk.f32.gmra.mrb[60].mxu1 %vm3839_vm2, %v16911_v22 }
 0x2b5   : > { %13394 = vmatprep.mubr.msk.f32.mxu1 %vm3839_vm2, %v16915_v21 }
 0x2b8   : > { %13395 = vmatmul.mubr.msk.f32.gmra.mrb[62].mxu1 %vm3839_vm2, %v16919_v12  ;;  %v14277_v12 = vpack.c.bf16 %v3978_v46, %v3977_v52  ;;  %v18583_v46 = vld [vmem:[#allocation9_spill] sm:$0xff]  ;;  %v18584_v52 = vld [vmem:[#allocation10_spill] sm:$0xff] }
 0x2b9   : > { %13405 = vmatprep.mubr.msk.f32.mxu1 %vm3839_vm2, %v16470_v54  ;;  %v16992_v54 = vld [vmem:[#allocation3 + $0x208] sm:$0xff] }
 0x2bc   : > { %13406 = vmatmul.mubr.msk.f32.vlgmr.msra.gmra.mrb[32].mxu1 %vm3839_vm2, %v16476_v58  ;;  %v5197_v58 = vld [vmem:[#allocation3 + $0x228] sm:$0xff] }
 0x2bd   : > { %14272 = vmatpush3.bf16.msra.mxu1 %v16804_v0  ;;  %13408 = vmatprep.mubr.msk.f32.mxu1 %vm3839_vm2, %v16483_v11  ;;  %v16996_v11 = vld [vmem:[#allocation3 + $0x210] sm:$0xff] }
 0x2be   : > { %14274 = vmatprep.subr.bf16.mxu1 %v14273_v7  ;;  %v18590_v0 = vld [vmem:[#allocation18_spill] sm:$0xff] }
 0x2c0   : > { %13409 = vmatmul.mubr.msk.f32.gmra.mrb[34].mxu1 %vm3839_vm2, %v16489_v30  ;;  %v5198_v30 = vld [vmem:[#allocation3 + $0x230] sm:$0xff] }
 0x2c1   : > { %13411 = vmatprep.mubr.msk.f32.mxu1 %vm3839_vm2, %v16497_v29  ;;  %14276 = vmatpush3.bf16.msra.mxu1 %v14273_v7  ;;  %v3979_v29 = vld [vmem:[%s18349_s3 + $0x10] sm:$0xff]  ;;  %v18585_v7 = vld [vmem:[#allocation11_spill] sm:$0xff] }
 0x2c2   : > { %14278 = vmatprep.subr.bf16.mxu1 %v14277_v12 }
 0x2c4   : > { %13412 = vmatmul.mubr.msk.f32.gmra.mrb[36].mxu1 %vm3839_vm2, %v16503_v42  ;;  %v3980_v42 = vld [vmem:[%s18349_s3 + $0x18] sm:$0xff] }
 0x2c5   : > { %13414 = vmatprep.mubr.msk.f32.mxu1 %vm3839_vm2, %v16511_v49  ;;  %v14281_v49 = vpack.c.bf16 %v3980_v42, %v3979_v29  ;;  %v18593_v29 = vld [vmem:[#allocation21_spill] sm:$0xff]  ;;  %v18594_v42 = vld [vmem:[#allocation22_spill] sm:$0xff] }
 0x2c8   : > { %13415 = vmatmul.mubr.msk.f32.gmra.mrb[38].mxu1 %vm3839_vm2, %v16517_v63  ;;  %v11224_v63 = vld [vmem:[%s18349_s3 + $0x40] sm:$0xff] }
 0x2c9   : > { %13417 = vmatprep.mubr.msk.f32.mxu1 %vm3839_vm2, %v16523_v8  ;;  %v11225_v8 = vld [vmem:[%s18349_s3 + $0x48] sm:$0xff] }
 0x2cc   : > { %13418 = vmatmul.mubr.msk.f32.gmra.mrb[40].mxu1 %vm3839_vm2, %v16529_v19  ;;  %v14285_v19 = vpack.c.bf16 %v11225_v8, %v11224_v63  ;;  %v18596_v63 = vld [vmem:[#allocation24_spill] sm:$0xff]  ;;  %v18597_v8 = vld [vmem:[#allocation25_spill] sm:$0xff] }
 0x2cd   : > { %13420 = vmatprep.mubr.msk.f32.mxu1 %vm3839_vm2, %v16535_v27  ;;  %v5555_v27 = vld [vmem:[#allocation3 + $0x229] sm:$0xff] }
 0x2d0   : > { %13421 = vmatmul.mubr.msk.f32.gmra.mrb[42].mxu1 %vm3839_vm2, %v16541_v50  ;;  %v18575_v50 = vld [vmem:[#allocation38_spill] sm:$0xff] }
 0x2d1   : > { %13423 = vmatprep.mubr.msk.f32.mxu1 %vm3839_vm2, %v16547_v17  ;;  %v5556_v17 = vld [vmem:[#allocation3 + $0x231] sm:$0xff] }
 0x2d4   : > { %13424 = vmatmul.mubr.msk.f32.gmra.mrb[44].mxu1 %vm3839_vm2, %v16553_v31  ;;  %v3945_v31 = vld [vmem:[#allocation3 + $0x7] sm:$0xff] }
 0x2d5   : > { %13426 = vmatprep.mubr.msk.f32.mxu1 %vm3839_vm2, %v16559_v33  ;;  %v11226_v33 = vld [vmem:[%s18349_s3 + $0x50] sm:$0xff] }
 0x2d8   : > { %13427 = vmatmul.mubr.msk.f32.gmra.mrb[46].mxu1 %vm3839_vm2, %v16565_v39  ;;  %v11227_v39 = vld [vmem:[%s18349_s3 + $0x58] sm:$0xff] }
 0x2d9   : > { %13429 = vmatprep.mubr.msk.f32.mxu1 %vm3839_vm2, %v16571_v3  ;;  %v3946_v3 = vld [vmem:[#allocation3 + $0xf] sm:$0xff] }
 0x2dc   : > { %13430 = vmatmul.mubr.msk.f32.gmra.mrb[48].mxu1 %vm3839_vm2, %v16577_v6  ;;  %v14289_v6 = vpack.c.bf16 %v11227_v39, %v11226_v33  ;;  %v18603_v33 = vld [vmem:[#allocation31_spill] sm:$0xff]  ;;  %v18604_v39 = vld [vmem:[#allocation32_spill] sm:$0xff] }
 0x2dd   : > { %13432 = vmatprep.mubr.msk.f32.mxu1 %vm3839_vm2, %v16583_v1  ;;  %v11264_v1 = vld [vmem:[%s18349_s3 + $0x80] sm:$0xff] }
 0x2e0   : > { %13433 = vmatmul.mubr.msk.f32.gmra.mrb[50].mxu1 %vm3839_vm2, %v16589_v28  ;;  %v11265_v28 = vld [vmem:[%s18349_s3 + $0x88] sm:$0xff] }
 0x2e1   : > { %13435 = vmatprep.mubr.msk.f32.mxu1 %vm3839_vm2, %v16595_v10  ;;  %v18576_v10 = vld [vmem:[#allocation12_spill] sm:$0xff] }
 0x2e4   : > { %13436 = vmatmul.mubr.msk.f32.gmra.mrb[52].mxu1 %vm3839_vm2, %v16601_v18  ;;  %v14293_v18 = vpack.c.bf16 %v11265_v28, %v11264_v1  ;;  %v11267_v1 = vld [vmem:[%s18349_s3 + $0x98] sm:$0xff]  ;;  %v18605_v28 = vld [vmem:[#allocation33_spill] sm:$0xff] }
 0x2e5   : > { %13438 = vmatprep.mubr.msk.f32.mxu1 %vm3839_vm2, %v16607_v32  ;;  %v18577_v32 = vld [vmem:[#allocation14_spill] sm:$0xff] }
 0x2e8   : > { %13439 = vmatmul.mubr.msk.f32.gmra.mrb[54].mxu1 %vm3839_vm2, %v16613_v35  ;;  %v18578_v35 = vld [vmem:[#allocation4_spill] sm:$0xff] }
 0x2e9   : > { %13441 = vmatprep.mubr.msk.f32.mxu1 %vm3839_vm2, %v16618_v41  ;;  %v18579_v41 = vld [vmem:[#allocation5_spill] sm:$0xff] }
 0x2ec   : > { %13442 = vmatmul.mubr.msk.f32.gmra.mrb[56].mxu1 %vm3839_vm2, %v16623_v62  ;;  %v18580_v62 = vld [vmem:[#allocation6_spill] sm:$0xff] }
 0x2ed   : > { %13444 = vmatprep.mubr.msk.f32.mxu1 %vm3839_vm2, %v16627_v43  ;;  %v18581_v43 = vld [vmem:[#allocation7_spill] sm:$0xff] }
 0x2f0   : > { %13445 = vmatmul.mubr.msk.f32.gmra.mrb[58].mxu1 %vm3839_vm2, %v16631_v45  ;;  %v18582_v45 = vld [vmem:[#allocation8_spill] sm:$0xff] }
 0x2f1   : > { %13447 = vmatprep.mubr.msk.f32.mxu1 %vm3839_vm2, %v16992_v54 }
 0x2f4   : > { %13448 = vmatmul.mubr.msk.f32.gmra.mrb[60].mxu1 %vm3839_vm2, %v16996_v11 }
 0x2f5   : > { %13450 = vmatprep.mubr.msk.f32.mxu1 %vm3839_vm2, %v5197_v58  ;;  %v18591_v58 = vld [vmem:[#allocation19_spill] sm:$0xff] }
 0x2f8   : > { %13451 = vmatmul.mubr.msk.f32.gmra.mrb[62].mxu1 %vm3839_vm2, %v5198_v30  ;;  %v18592_v30 = vld [vmem:[#allocation20_spill] sm:$0xff] }
 0x2f9   : > { %13461 = vmatprep.mubr.msk.f32.mxu1 %vm3839_vm2, %v16799_v61 }
 0x2fc   : > { %13462 = vmatmul.mubr.msk.f32.vlgmr.msra.gmra.mrb[32].mxu1 %vm3839_vm2, %v16806_v4 }
 0x2fd   : > { %14280 = vmatpush3.bf16.msra.mxu1 %v14277_v12  ;;  %13464 = vmatprep.mubr.msk.f32.mxu1 %vm3839_vm2, %v16810_v5  ;;  %v18588_v12 = vld [vmem:[#allocation16_spill] sm:$0xff] }
 0x2fe   : > { %14282 = vmatprep.subr.bf16.mxu1 %v14281_v49 }
 0x300   : > { %13465 = vmatmul.mubr.msk.f32.gmra.mrb[34].mxu1 %vm3839_vm2, %v16815_v9 }
 0x301   : > { %13467 = vmatprep.mubr.msk.f32.mxu1 %vm3839_vm2, %v16819_v2  ;;  %14284 = vmatpush3.bf16.msra.mxu1 %v14281_v49  ;;  %v18595_v49 = vld [vmem:[#allocation23_spill] sm:$0xff] }
 0x302   : > { %14286 = vmatprep.subr.bf16.mxu1 %v14285_v19 }
 0x304   : > { %13468 = vmatmul.mubr.msk.f32.gmra.mrb[36].mxu1 %vm3839_vm2, %v16823_v44 }
 0x305   : > { %13470 = vmatprep.mubr.msk.f32.mxu1 %vm3839_vm2, %v16827_v53 }
 0x308   : > { %13471 = vmatmul.mubr.msk.f32.gmra.mrb[38].mxu1 %vm3839_vm2, %v16831_v37 }
 0x309   : > { %13473 = vmatprep.mubr.msk.f32.mxu1 %vm3839_vm2, %v16835_v55 }
 0x30c   : > { %13474 = vmatmul.mubr.msk.f32.gmra.mrb[40].mxu1 %vm3839_vm2, %v16839_v40 }
 0x30d   : > { %13476 = vmatprep.mubr.msk.f32.mxu1 %vm3839_vm2, %v16843_v38 }
 0x310   : > { %13477 = vmatmul.mubr.msk.f32.gmra.mrb[42].mxu1 %vm3839_vm2, %v16847_v36 }
 0x311   : > { %13479 = vmatprep.mubr.msk.f32.mxu1 %vm3839_vm2, %v16851_v34 }
 0x314   : > { %13480 = vmatmul.mubr.msk.f32.gmra.mrb[44].mxu1 %vm3839_vm2, %v16855_v15 }
 0x315   : > { %13482 = vmatprep.mubr.msk.f32.mxu1 %vm3839_vm2, %v16859_v20 }
 0x318   : > { %13483 = vmatmul.mubr.msk.f32.gmra.mrb[46].mxu1 %vm3839_vm2, %v16863_v13 }
 0x319   : > { %13485 = vmatprep.mubr.msk.f32.mxu1 %vm3839_vm2, %v16867_v60 }
 0x31c   : > { %13486 = vmatmul.mubr.msk.f32.gmra.mrb[48].mxu1 %vm3839_vm2, %v16871_v59 }
 0x31d   : > { %13488 = vmatprep.mubr.msk.f32.mxu1 %vm3839_vm2, %v16875_v57 }
 0x320   : > { %13489 = vmatmul.mubr.msk.f32.gmra.mrb[50].mxu1 %vm3839_vm2, %v16879_v56 }
 0x321   : > { %13491 = vmatprep.mubr.msk.f32.mxu1 %vm3839_vm2, %v16883_v51 }
 0x324   : > { %13492 = vmatmul.mubr.msk.f32.gmra.mrb[52].mxu1 %vm3839_vm2, %v16887_v48 }
 0x325   : > { %13494 = vmatprep.mubr.msk.f32.mxu1 %vm3839_vm2, %v16891_v47 }
 0x328   : > { %13495 = vmatmul.mubr.msk.f32.gmra.mrb[54].mxu1 %vm3839_vm2, %v16895_v26 }
 0x329   : > { %13497 = vmatprep.mubr.msk.f32.mxu1 %vm3839_vm2, %v16899_v25 }
 0x32c   : > { %13498 = vmatmul.mubr.msk.f32.gmra.mrb[56].mxu1 %vm3839_vm2, %v16903_v24 }
 0x32d   : > { %13500 = vmatprep.mubr.msk.f32.mxu1 %vm3839_vm2, %v16907_v23 }
 0x330   : > { %13501 = vmatmul.mubr.msk.f32.gmra.mrb[58].mxu1 %vm3839_vm2, %v16911_v22 }
 0x331   : > { %13503 = vmatprep.mubr.msk.f32.mxu1 %vm3839_vm2, %v16915_v21  ;;  %v18589_v21 = vld [vmem:[#allocation17_spill] sm:$0xff] }
 0x334   : > { %13504 = vmatmul.mubr.msk.f32.gmra.mrb[60].mxu1 %vm3839_vm2, %v18575_v50  ;;  %v18600_v50 = vld [vmem:[#allocation28_spill] sm:$0xff] }
 0x335   : > { %13506 = vmatprep.mubr.msk.f32.mxu1 %vm3839_vm2, %v5555_v27  ;;  %v18599_v27 = vld [vmem:[#allocation27_spill] sm:$0xff] }
 0x338   : > { %13507 = vmatmul.mubr.msk.f32.gmra.mrb[62].mxu1 %vm3839_vm2, %v5556_v17  ;;  %v18601_v17 = vld [vmem:[#allocation29_spill] sm:$0xff] }
 0x339   : > { %13517 = vmatprep.mubr.msk.f32.mxu1 %vm3839_vm2, %v3945_v31  ;;  %v18602_v31 = vld [vmem:[#allocation30_spill] sm:$0xff] }
 0x33c   : > { %13518 = vmatmul.mubr.msk.f32.vlgmr.msra.gmra.mrb[32].mxu1 %vm3839_vm2, %v3946_v3  ;;  %v4339_v3 = vld [vmem:[#allocation3 + $0x9] sm:$0xff] }
 0x33d   : > { %14288 = vmatpush3.bf16.msra.mxu1 %v14285_v19  ;;  %13520 = vmatprep.mubr.msk.f32.mxu1 %vm3839_vm2, %v18576_v10  ;;  %v18598_v19 = vld [vmem:[#allocation26_spill] sm:$0xff] }
 0x33e   : > { %14290 = vmatprep.subr.bf16.mxu1 %v14289_v6  ;;  %v4340_v10 = vld [vmem:[#allocation3 + $0x11] sm:$0xff] }
 0x340   : > { %13521 = vmatmul.mubr.msk.f32.gmra.mrb[34].mxu1 %vm3839_vm2, %v18577_v32 }
 0x341   : > { %13523 = vmatprep.mubr.msk.f32.mxu1 %vm3839_vm2, %v18578_v35  ;;  %14292 = vmatpush3.bf16.msra.mxu1 %v14289_v6  ;;  %v11266_v6 = vld [vmem:[%s18349_s3 + $0x90] sm:$0xff] }
 0x342   : > { %14294 = vmatprep.subr.bf16.mxu1 %v14293_v18  ;;  %v14297_v32 = vpack.c.bf16 %v11267_v1, %v11266_v6  ;;  %v4759_v6 = vld [vmem:[#allocation3 + $0x1b0] sm:$0xff]  ;;  %v4760_v1 = vld [vmem:[#allocation3 + $0x1c8] sm:$0xff] }
 0x344   : > { %13524 = vmatmul.mubr.msk.f32.gmra.mrb[36].mxu1 %vm3839_vm2, %v18579_v41 }
 0x345   : > { %13526 = vmatprep.mubr.msk.f32.mxu1 %vm3839_vm2, %v18580_v62 }
 0x348   : > { %13527 = vmatmul.mubr.msk.f32.gmra.mrb[38].mxu1 %vm3839_vm2, %v18581_v43 }
 0x349   : > { %13529 = vmatprep.mubr.msk.f32.mxu1 %vm3839_vm2, %v18582_v45 }
 0x34c   : > { %13530 = vmatmul.mubr.msk.f32.gmra.mrb[40].mxu1 %vm3839_vm2, %v18583_v46 }
 0x34d   : > { %13532 = vmatprep.mubr.msk.f32.mxu1 %vm3839_vm2, %v18584_v52 }
 0x350   : > { %13533 = vmatmul.mubr.msk.f32.gmra.mrb[42].mxu1 %vm3839_vm2, %v18585_v7 }
 0x351   : > { %13535 = vmatprep.mubr.msk.f32.mxu1 %vm3839_vm2, %v18586_v14 }
 0x354   : > { %13536 = vmatmul.mubr.msk.f32.gmra.mrb[44].mxu1 %vm3839_vm2, %v18587_v16 }
 0x355   : > { %13538 = vmatprep.mubr.msk.f32.mxu1 %vm3839_vm2, %v18588_v12 }
 0x358   : > { %13539 = vmatmul.mubr.msk.f32.gmra.mrb[46].mxu1 %vm3839_vm2, %v18589_v21 }
 0x359   : > { %13541 = vmatprep.mubr.msk.f32.mxu1 %vm3839_vm2, %v18590_v0 }
 0x35c   : > { %13542 = vmatmul.mubr.msk.f32.gmra.mrb[48].mxu1 %vm3839_vm2, %v18591_v58 }
 0x35d   : > { %13544 = vmatprep.mubr.msk.f32.mxu1 %vm3839_vm2, %v18592_v30 }
 0x360   : > { %13545 = vmatmul.mubr.msk.f32.gmra.mrb[50].mxu1 %vm3839_vm2, %v18593_v29 }
 0x361   : > { %13547 = vmatprep.mubr.msk.f32.mxu1 %vm3839_vm2, %v18594_v42 }
 0x364   : > { %13548 = vmatmul.mubr.msk.f32.gmra.mrb[52].mxu1 %vm3839_vm2, %v18595_v49 }
 0x365   : > { %13550 = vmatprep.mubr.msk.f32.mxu1 %vm3839_vm2, %v18596_v63 }
 0x368   : > { %13551 = vmatmul.mubr.msk.f32.gmra.mrb[54].mxu1 %vm3839_vm2, %v18597_v8 }
 0x369   : > { %13553 = vmatprep.mubr.msk.f32.mxu1 %vm3839_vm2, %v18598_v19 }
 0x36c   : > { %13554 = vmatmul.mubr.msk.f32.gmra.mrb[56].mxu1 %vm3839_vm2, %v18599_v27 }
 0x36d   : > { %13556 = vmatprep.mubr.msk.f32.mxu1 %vm3839_vm2, %v18600_v50 }
 0x370   : > { %13557 = vmatmul.mubr.msk.f32.gmra.mrb[58].mxu1 %vm3839_vm2, %v18601_v17  ;;  %v18607_v17 = vld [vmem:[#allocation37_spill] sm:$0xff] }
 0x371   : > { %13559 = vmatprep.mubr.msk.f32.mxu1 %vm3839_vm2, %v18602_v31  ;;  %v18606_v31 = vld [vmem:[#allocation36_spill] sm:$0xff] }
 0x374   : > { %13560 = vmatmul.mubr.msk.f32.gmra.mrb[60].mxu1 %vm3839_vm2, %v18603_v33  ;;  %v11305_v33 = vld [vmem:[%s18349_s3 + $0xc8] sm:$0xff] }
 0x375   : > { %13562 = vmatprep.mubr.msk.f32.mxu1 %vm3839_vm2, %v18604_v39  ;;  %v11304_v39 = vld [vmem:[%s18349_s3 + $0xc0] sm:$0xff] }
 0x378   : > { %13563 = vmatmul.mubr.msk.f32.gmra.mrb[62].mxu1 %vm3839_vm2, %v18605_v28  ;;  %v14301_v28 = vpack.c.bf16 %v11305_v33, %v11304_v39  ;;  %v4756_v33 = vld [vmem:[#allocation3 + $0x188] sm:$0xff]  ;;  %v4757_v39 = vld [vmem:[#allocation3 + $0x190] sm:$0xff] }
 0x379   : > { %13573 = vmatprep.mubr.msk.f32.mxu1 %vm3839_vm2, %v4339_v3  ;;  %v4758_v3 = vld [vmem:[#allocation3 + $0x1a8] sm:$0xff] }
 0x37c   : > { %13574 = vmatmul.mubr.msk.f32.vlgmr.msra.gmra.mrb[32].mxu1 %vm3839_vm2, %v4340_v10  ;;  %v4762_v10 = vld [vmem:[#allocation3 + $0x1e8] sm:$0xff] }
 0x37d   : > { %14296 = vmatpush3.bf16.msra.mxu1 %v14293_v18  ;;  %13576 = vmatprep.mubr.msk.f32.mxu1 %vm3839_vm2, %v18606_v31  ;;  %v4753_v18 = vld [vmem:[#allocation3 + $0x150] sm:$0xff] }
 0x37e   : > { %14298 = vmatprep.subr.bf16.mxu1 %v14297_v32  ;;  %v4755_v31 = vld [vmem:[#allocation3 + $0x170] sm:$0xff] }
 0x380   : > { %13577 = vmatmul.mubr.msk.f32.gmra.mrb[34].mxu1 %vm3839_vm2, %v18607_v17  ;;  %v4754_v17 = vld [vmem:[#allocation3 + $0x168] sm:$0xff] }
 0x381   : > { %13579 = vmatprep.mubr.msk.f32.mxu1 %vm3839_vm2, %v16799_v61  ;;  %14300 = vmatpush3.bf16.msra.mxu1 %v14297_v32  ;;  %v4746_v61 = vld [vmem:[#allocation3 + $0xe8] sm:$0xff]  ;;  %v4763_v32 = vld [vmem:[#allocation3 + $0x1f0] sm:$0xff] }
 0x382   : > { %14302 = vmatprep.subr.bf16.mxu1 %v14301_v28 }
 0x384   : > { %13580 = vmatmul.mubr.msk.f32.gmra.mrb[36].mxu1 %vm3839_vm2, %v16806_v4  ;;  %v4748_v4 = vld [vmem:[#allocation3 + $0x108] sm:$0xff] }
 0x385   : > { %13582 = vmatprep.mubr.msk.f32.mxu1 %vm3839_vm2, %v16810_v5  ;;  %v4747_v5 = vld [vmem:[#allocation3 + $0xf0] sm:$0xff] }
 0x388   : > { %13583 = vmatmul.mubr.msk.f32.gmra.mrb[38].mxu1 %vm3839_vm2, %v16815_v9  ;;  %v4749_v9 = vld [vmem:[#allocation3 + $0x110] sm:$0xff] }
 0x389   : > { %13585 = vmatprep.mubr.msk.f32.mxu1 %vm3839_vm2, %v16819_v2  ;;  %v4750_v2 = vld [vmem:[#allocation3 + $0x128] sm:$0xff] }
 0x38c   : > { %13586 = vmatmul.mubr.msk.f32.gmra.mrb[40].mxu1 %vm3839_vm2, %v16823_v44  ;;  %v4751_v44 = vld [vmem:[#allocation3 + $0x130] sm:$0xff] }
 0x38d   : > { %13588 = vmatprep.mubr.msk.f32.mxu1 %vm3839_vm2, %v16827_v53  ;;  %v4745_v53 = vld [vmem:[#allocation3 + $0xd0] sm:$0xff] }
 0x390   : > { %13589 = vmatmul.mubr.msk.f32.gmra.mrb[42].mxu1 %vm3839_vm2, %v16831_v37  ;;  %v4752_v37 = vld [vmem:[#allocation3 + $0x148] sm:$0xff] }
 0x391   : > { %13591 = vmatprep.mubr.msk.f32.mxu1 %vm3839_vm2, %v16835_v55  ;;  %v4744_v55 = vld [vmem:[#allocation3 + $0xc8] sm:$0xff] }
 0x394   : > { %13592 = vmatmul.mubr.msk.f32.gmra.mrb[44].mxu1 %vm3839_vm2, %v16839_v40  ;;  %v4743_v40 = vld [vmem:[#allocation3 + $0xb0] sm:$0xff] }
 0x395   : > { %13594 = vmatprep.mubr.msk.f32.mxu1 %vm3839_vm2, %v16843_v38  ;;  %v4742_v38 = vld [vmem:[#allocation3 + $0xa8] sm:$0xff] }
 0x398   : > { %13595 = vmatmul.mubr.msk.f32.gmra.mrb[46].mxu1 %vm3839_vm2, %v16847_v36  ;;  %v4741_v36 = vld [vmem:[#allocation3 + $0x90] sm:$0xff] }
 0x399   : > { %13597 = vmatprep.mubr.msk.f32.mxu1 %vm3839_vm2, %v16851_v34  ;;  %v4740_v34 = vld [vmem:[#allocation3 + $0x88] sm:$0xff] }
 0x39c   : > { %13598 = vmatmul.mubr.msk.f32.gmra.mrb[48].mxu1 %vm3839_vm2, %v16855_v15  ;;  %v4739_v15 = vld [vmem:[#allocation3 + $0x70] sm:$0xff] }
 0x39d   : > { %13600 = vmatprep.mubr.msk.f32.mxu1 %vm3839_vm2, %v16859_v20  ;;  %v4738_v20 = vld [vmem:[#allocation3 + $0x68] sm:$0xff] }
 0x3a0   : > { %13601 = vmatmul.mubr.msk.f32.gmra.mrb[50].mxu1 %vm3839_vm2, %v16863_v13  ;;  %v4737_v13 = vld [vmem:[#allocation3 + $0x50] sm:$0xff] }
 0x3a1   : > { %13603 = vmatprep.mubr.msk.f32.mxu1 %vm3839_vm2, %v16867_v60  ;;  %v4736_v60 = vld [vmem:[#allocation3 + $0x48] sm:$0xff] }
 0x3a4   : > { %13604 = vmatmul.mubr.msk.f32.gmra.mrb[52].mxu1 %vm3839_vm2, %v16871_v59  ;;  %v4735_v59 = vld [vmem:[#allocation3 + $0x30] sm:$0xff] }
 0x3a5   : > { %13606 = vmatprep.mubr.msk.f32.mxu1 %vm3839_vm2, %v16875_v57 }
 0x3a8   : > { %13607 = vmatmul.mubr.msk.f32.gmra.mrb[54].mxu1 %vm3839_vm2, %v16879_v56  ;;  %v4734_v56 = vld [vmem:[#allocation3 + $0x28] sm:$0xff] }
 0x3a9   : > { %13609 = vmatprep.mubr.msk.f32.mxu1 %vm3839_vm2, %v16883_v51  ;;  %v11512_v51 = vld [vmem:[%s18351_s5 + $0x38] sm:$0xff] }
 0x3ac   : > { %13610 = vmatmul.mubr.msk.f32.gmra.mrb[56].mxu1 %vm3839_vm2, %v16887_v48  ;;  %v11306_v48 = vld [vmem:[%s18349_s3 + $0xd0] sm:$0xff] }
 0x3ad   : > { %13612 = vmatprep.mubr.msk.f32.mxu1 %vm3839_vm2, %v16891_v47  ;;  %v11307_v47 = vld [vmem:[%s18349_s3 + $0xd8] sm:$0xff] }
 0x3b0   : > { %13613 = vmatmul.mubr.msk.f32.gmra.mrb[58].mxu1 %vm3839_vm2, %v16895_v26 }
 0x3b1   : > { %13615 = vmatprep.mubr.msk.f32.mxu1 %vm3839_vm2, %v16899_v25  ;;  %v11509_v25 = vld [vmem:[%s18351_s5 + $0x20] sm:$0xff] }
 0x3b4   : > { %13616 = vmatmul.mubr.msk.f32.gmra.mrb[60].mxu1 %vm3839_vm2, %v16903_v24  ;;  %v11511_v24 = vld [vmem:[%s18351_s5 + $0x30] sm:$0xff] }
 0x3b5   : > { %13618 = vmatprep.mubr.msk.f32.mxu1 %vm3839_vm2, %v16907_v23  ;;  %v11510_v23 = vld [vmem:[%s18351_s5 + $0x28] sm:$0xff]  ;;  %v14313_v57 = vpack.c.bf16 %v11512_v51, %v11511_v24 }
 0x3b6   : > { %v14309_v26 = vpack.c.bf16 %v11510_v23, %v11509_v25 }
 0x3b8   : > { %13619 = vmatmul.mubr.msk.f32.gmra.mrb[62].mxu1 %vm3839_vm2, %v16911_v22  ;;  %v14305_v22 = vpack.c.bf16 %v11307_v47, %v11306_v48  ;;  %14310 = vmatprep.subr.bf16.mxu0 %v14309_v26 }
 0x3b9   : > { %13629 = vmatprep.mubr.msk.f32.mxu1 %vm3839_vm2, %v4734_v56  ;;  %14312 = vmatpush3.bf16.msra.mxu0 %v14309_v26 }
 0x3ba   : > { %14314 = vmatprep.subr.bf16.mxu0 %v14313_v57 }
 0x3bc   : > { %13630 = vmatmul.mubr.msk.f32.vlgmr.msra.gmra.mrb[32].mxu1 %vm3839_vm2, %v4735_v59 }
 0x3bd   : > { %14304 = vmatpush3.bf16.msra.mxu1 %v14301_v28  ;;  %13632 = vmatprep.mubr.msk.f32.mxu1 %vm3839_vm2, %v4736_v60  ;;  %v4761_v28 = vld [vmem:[#allocation3 + $0x1d0] sm:$0xff] }
 0x3be   : > { %14306 = vmatprep.subr.bf16.mxu1 %v14305_v22  ;;  %14316 = vmatpush3.bf16.msra.mxu0 %v14313_v57 }
 0x3c0   : > { %13633 = vmatmul.mubr.msk.f32.gmra.mrb[34].mxu1 %vm3839_vm2, %v4737_v13 }
 0x3c1   : > { %13635 = vmatprep.mubr.msk.f32.mxu1 %vm3839_vm2, %v4738_v20  ;;  %14308 = vmatpush3.bf16.msra.mxu1 %v14305_v22 }
 0x3c4   : > { %13636 = vmatmul.mubr.msk.f32.gmra.mrb[36].mxu1 %vm3839_vm2, %v4739_v15 }
 0x3c5   : > { %13638 = vmatprep.mubr.msk.f32.mxu1 %vm3839_vm2, %v4740_v34 }
 0x3c8   : > { %13639 = vmatmul.mubr.msk.f32.gmra.mrb[38].mxu1 %vm3839_vm2, %v4741_v36 }
 0x3c9   : > { %13641 = vmatprep.mubr.msk.f32.mxu1 %vm3839_vm2, %v4742_v38 }
 0x3cc   : > { %13642 = vmatmul.mubr.msk.f32.gmra.mrb[40].mxu1 %vm3839_vm2, %v4743_v40 }
 0x3cd   : > { %13644 = vmatprep.mubr.msk.f32.mxu1 %vm3839_vm2, %v4744_v55 }
 0x3d0   : > { %13645 = vmatmul.mubr.msk.f32.gmra.mrb[42].mxu1 %vm3839_vm2, %v4745_v53 }
 0x3d1   : > { %13647 = vmatprep.mubr.msk.f32.mxu1 %vm3839_vm2, %v4746_v61 }
 0x3d4   : > { %13648 = vmatmul.mubr.msk.f32.gmra.mrb[44].mxu1 %vm3839_vm2, %v4747_v5 }
 0x3d5   : > { %13650 = vmatprep.mubr.msk.f32.mxu1 %vm3839_vm2, %v4748_v4 }
 0x3d8   : > { %13651 = vmatmul.mubr.msk.f32.gmra.mrb[46].mxu1 %vm3839_vm2, %v4749_v9 }
 0x3d9   : > { %13653 = vmatprep.mubr.msk.f32.mxu1 %vm3839_vm2, %v4750_v2 }
 0x3dc   : > { %13654 = vmatmul.mubr.msk.f32.gmra.mrb[48].mxu1 %vm3839_vm2, %v4751_v44 }
 0x3dd   : > { %13656 = vmatprep.mubr.msk.f32.mxu1 %vm3839_vm2, %v4752_v37 }
 0x3e0   : > { %13657 = vmatmul.mubr.msk.f32.gmra.mrb[50].mxu1 %vm3839_vm2, %v4753_v18 }
 0x3e1   : > { %13659 = vmatprep.mubr.msk.f32.mxu1 %vm3839_vm2, %v4754_v17 }
 0x3e4   : > { %13660 = vmatmul.mubr.msk.f32.gmra.mrb[52].mxu1 %vm3839_vm2, %v4755_v31 }
 0x3e5   : > { %13662 = vmatprep.mubr.msk.f32.mxu1 %vm3839_vm2, %v4756_v33 }
 0x3e8   : > { %13663 = vmatmul.mubr.msk.f32.gmra.mrb[54].mxu1 %vm3839_vm2, %v4757_v39 }
 0x3e9   : > { %13665 = vmatprep.mubr.msk.f32.mxu1 %vm3839_vm2, %v4758_v3 }
 0x3ec   : > { %13666 = vmatmul.mubr.msk.f32.gmra.mrb[56].mxu1 %vm3839_vm2, %v4759_v6 }
 0x3ed   : > { %13668 = vmatprep.mubr.msk.f32.mxu1 %vm3839_vm2, %v4760_v1 }
 0x3f0   : > { %13669 = vmatmul.mubr.msk.f32.gmra.mrb[58].mxu1 %vm3839_vm2, %v4761_v28 }
 0x3f1   : > { %13671 = vmatprep.mubr.msk.f32.mxu1 %vm3839_vm2, %v4762_v10 }
 0x3f4   : > { %13672 = vmatmul.mubr.msk.f32.gmra.mrb[60].mxu1 %vm3839_vm2, %v4763_v32 }
 0x3f5   : > { %13674 = vmatprep.mubr.msk.f32.mxu1 %vm3839_vm2, %v16992_v54  ;;  %v18608_v54 = vld [vmem:[#allocation29_spill] sm:$0xff] }
 0x3f8   : > { %13675 = vmatmul.mubr.msk.f32.gmra.mrb[62].mxu1 %vm3839_vm2, %v16996_v11  ;;  %v18609_v11 = vld [vmem:[#allocation30_spill] sm:$0xff] }
 0x3f9   : > { %13685 = vmatprep.mubr.msk.f32.mxu1 %vm3839_vm2, %v18578_v35  ;;  %v18610_v35 = vld [vmem:[#allocation31_spill] sm:$0xff] }
 0x3fc   : > { %13686 = vmatmul.mubr.msk.f32.vlgmr.msra.gmra.mrb[32].mxu1 %vm3839_vm2, %v18579_v41  ;;  %v18611_v41 = vld [vmem:[#allocation32_spill] sm:$0xff] }
 0x3fd   : > { %13688 = vmatprep.mubr.msk.f32.mxu1 %vm3839_vm2, %v18580_v62  ;;  %v18612_v62 = vld [vmem:[#allocation33_spill] sm:$0xff] }
 0x400   : > { %13689 = vmatmul.mubr.msk.f32.gmra.mrb[34].mxu1 %vm3839_vm2, %v18581_v43  ;;  %v18613_v43 = vld [vmem:[#allocation34_spill] sm:$0xff] }
 0x401   : > { %13691 = vmatprep.mubr.msk.f32.mxu1 %vm3839_vm2, %v18582_v45  ;;  %v5160_v45 = vld [vmem:[#allocation3 + $0x227] sm:$0xff] }
 0x404   : > { %13692 = vmatmul.mubr.msk.f32.gmra.mrb[36].mxu1 %vm3839_vm2, %v18583_v46  ;;  %v18614_v46 = vld [vmem:[#allocation35_spill] sm:$0xff] }
 0x405   : > { %13694 = vmatprep.mubr.msk.f32.mxu1 %vm3839_vm2, %v18584_v52  ;;  %v5161_v52 = vld [vmem:[#allocation3 + $0x22f] sm:$0xff] }
 0x408   : > { %13695 = vmatmul.mubr.msk.f32.gmra.mrb[38].mxu1 %vm3839_vm2, %v18585_v7  ;;  %v7434_v7 = vld [vmem:[#allocation3 + $0x8] sm:$0xff] }
 0x409   : > { %13697 = vmatprep.mubr.msk.f32.mxu1 %vm3839_vm2, %v18586_v14  ;;  %13741 = vmatprep.mubr.msk.f32.mxu0 %vm3839_vm2, %v7434_v7  ;;  %v7435_v14 = vld [vmem:[#allocation3 + $0x10] sm:$0xff] }
 0x40a   : > { %13742 = vmatmul.mubr.msk.f32.vlgmr.msra.gmra.mrb[32].mxu0 %vm3839_vm2, %v7435_v14 }
 0x40c   : > { %13698 = vmatmul.mubr.msk.f32.gmra.mrb[40].mxu1 %vm3839_vm2, %v18587_v16  ;;  %v11549_v16 = vld [vmem:[%s18351_s5 + $0x60] sm:$0xff] }
 0x40d   : > { %13700 = vmatprep.mubr.msk.f32.mxu1 %vm3839_vm2, %v18588_v12  ;;  %v11550_v12 = vld [vmem:[%s18351_s5 + $0x68] sm:$0xff] }
 0x410   : > { %13701 = vmatmul.mubr.msk.f32.gmra.mrb[42].mxu1 %vm3839_vm2, %v18589_v21  ;;  %v14317_v21 = vpack.c.bf16 %v11550_v12, %v11549_v16 }
 0x411   : > { %13703 = vmatprep.mubr.msk.f32.mxu1 %vm3839_vm2, %v18590_v0  ;;  %v11551_v0 = vld [vmem:[%s18351_s5 + $0x70] sm:$0xff] }
 0x412   : > { %14318 = vmatprep.subr.bf16.mxu0 %v14317_v21 }
 0x413   : > { %14320 = vmatpush3.bf16.msra.mxu0 %v14317_v21 }
 0x414   : > { %13704 = vmatmul.mubr.msk.f32.gmra.mrb[44].mxu1 %vm3839_vm2, %v18591_v58  ;;  %v11552_v58 = vld [vmem:[%s18351_s5 + $0x78] sm:$0xff] }
 0x415   : > { %13706 = vmatprep.mubr.msk.f32.mxu1 %vm3839_vm2, %v18592_v30  ;;  %v14321_v30 = vpack.c.bf16 %v11552_v58, %v11551_v0 }
 0x417   : > { %14322 = vmatprep.subr.bf16.mxu0 %v14321_v30 }
 0x418   : > { %13707 = vmatmul.mubr.msk.f32.gmra.mrb[46].mxu1 %vm3839_vm2, %v18593_v29  ;;  %14324 = vmatpush3.bf16.msra.mxu0 %v14321_v30  ;;  %v11589_v29 = vld [vmem:[%s18351_s5 + $0xa0] sm:$0xff] }
 0x419   : > { %13709 = vmatprep.mubr.msk.f32.mxu1 %vm3839_vm2, %v18594_v42  ;;  %v11590_v42 = vld [vmem:[%s18351_s5 + $0xa8] sm:$0xff] }
 0x41c   : > { %13710 = vmatmul.mubr.msk.f32.gmra.mrb[48].mxu1 %vm3839_vm2, %v18595_v49  ;;  %v17358_v49 = vpack.c.bf16 %v11590_v42, %v11589_v29 }
 0x41d   : > { %13712 = vmatprep.mubr.msk.f32.mxu1 %vm3839_vm2, %v18596_v63  ;;  %v17364_v63 = vld [vmem:[%s18350_s4] ss:$0 sm:$0xff] }
 0x41e   : > { %14326 = vmatprep.subr.bf16.mxu0 %v17358_v49 }
 0x420   : > { %13713 = vmatmul.mubr.msk.f32.gmra.mrb[50].mxu1 %vm3839_vm2, %v18597_v8 }
 0x421   : > { %13715 = vmatprep.mubr.msk.f32.mxu1 %vm3839_vm2, %v18598_v19 }
 0x424   : > { %13716 = vmatmul.mubr.msk.f32.gmra.mrb[52].mxu1 %vm3839_vm2, %v18599_v27 }
 0x425   : > { %13718 = vmatprep.mubr.msk.f32.mxu1 %vm3839_vm2, %v18600_v50 }
 0x428   : > { %13719 = vmatmul.mubr.msk.f32.gmra.mrb[54].mxu1 %vm3839_vm2, %v18608_v54 }
 0x429   : > { %13721 = vmatprep.mubr.msk.f32.mxu1 %vm3839_vm2, %v18609_v11 }
 0x42c   : > { %13722 = vmatmul.mubr.msk.f32.gmra.mrb[56].mxu1 %vm3839_vm2, %v18610_v35 }
 0x42d   : > { %13724 = vmatprep.mubr.msk.f32.mxu1 %vm3839_vm2, %v18611_v41 }
 0x430   : > { %13725 = vmatmul.mubr.msk.f32.gmra.mrb[58].mxu1 %vm3839_vm2, %v18612_v62 }
 0x431   : > { %13727 = vmatprep.mubr.msk.f32.mxu1 %vm3839_vm2, %v18613_v43 }
 0x434   : > { %13728 = vmatmul.mubr.msk.f32.gmra.mrb[60].mxu1 %vm3839_vm2, %v18614_v46 }
 0x435   : > { %13730 = vmatprep.mubr.msk.f32.mxu1 %vm3839_vm2, %v5160_v45 }
 0x438   : > { %13731 = vmatmul.mubr.msk.f32.gmra.mrb[62].mxu1 %vm3839_vm2, %v5161_v52 }
 0x4cf   : > { %v13687_v8 = vpop.f32.mrb[32].mxu1 }
 0x4d0   : > { %v7303_v19 = vadd.f32 %v13687_v8, %v17364_v63  ;;  %v7008_v27 = vpop.f32.mrb[33].mxu1 }
 0x4d1   : > { %v7302_v50 = vadd.f32 %v17364_v63, %v7008_v27 }
 0x4d2   : > { %v7335_v56 = vmax.f32 %v7303_v19, 0.0 }
 0x4d3   : > { %v7334_v48 = vmax.f32 %v7302_v50, 0.0  ;;  %v13690_v47 = vpop.f32.mrb[34].mxu1 }
 0x4d4   : > { %7367 = vst.msk [vmem:[#allocation3 + $0x30] sm:$0xff] %vm3839_vm2, %v7335_v56  ;;  %v7305_v25 = vadd.f32 %v13690_v47, %v17364_v63  ;;  %v7018_v23 = vpop.f32.mrb[35].mxu1 }
 0x4d5   : > { %7366 = vst.msk [vmem:[#allocation3 + $0x28] sm:$0xff] %vm3839_vm2, %v7334_v48  ;;  %v7304_v24 = vadd.f32 %v17364_v63, %v7018_v23 }
 0x4d6   : > { %v7337_v26 = vmax.f32 %v7305_v25, 0.0 }
 0x4d7   : > { %v7336_v51 = vmax.f32 %v7304_v24, 0.0  ;;  %v13693_v22 = vpop.f32.mrb[36].mxu1 }
 0x4d8   : > { %7369 = vst.msk [vmem:[#allocation3 + $0x50] sm:$0xff] %vm3839_vm2, %v7337_v26  ;;  %v7307_v57 = vadd.f32 %v13693_v22, %v17364_v63  ;;  %v7028_v59 = vpop.f32.mrb[37].mxu1 }
 0x4d9   : > { %7368 = vst.msk [vmem:[#allocation3 + $0x48] sm:$0xff] %vm3839_vm2, %v7336_v51  ;;  %v7306_v60 = vadd.f32 %v17364_v63, %v7028_v59 }
 0x4da   : > { %v7339_v13 = vmax.f32 %v7307_v57, 0.0 }
 0x4db   : > { %v7338_v20 = vmax.f32 %v7306_v60, 0.0  ;;  %v13696_v15 = vpop.f32.mrb[38].mxu1  ;;  %v7437_v55 = vld [vmem:[#allocation3 + $0x30] sm:$0xff] }
 0x4dc   : > { %7371 = vst.msk [vmem:[#allocation3 + $0x70] sm:$0xff] %vm3839_vm2, %v7339_v13  ;;  %v7309_v34 = vadd.f32 %v13696_v15, %v17364_v63  ;;  %v7038_v36 = vpop.f32.mrb[39].mxu1  ;;  %v7436_v38 = vld [vmem:[#allocation3 + $0x28] sm:$0xff] }
 0x4dd   : > { %7370 = vst.msk [vmem:[#allocation3 + $0x68] sm:$0xff] %vm3839_vm2, %v7338_v20  ;;  %v7308_v40 = vadd.f32 %v17364_v63, %v7038_v36  ;;  %13744 = vmatprep.mubr.msk.f32.mxu0 %vm3839_vm2, %v7436_v38 }
 0x4de   : > { %v7341_v53 = vmax.f32 %v7309_v34, 0.0  ;;  %13745 = vmatmul.mubr.msk.f32.gmra.mrb[34].mxu0 %vm3839_vm2, %v7437_v55 }
 0x4df   : > { %v7340_v61 = vmax.f32 %v7308_v40, 0.0  ;;  %v13699_v5 = vpop.f32.mrb[40].mxu1  ;;  %v17390_v37 = vld [vmem:[#allocation3 + $0x50] sm:$0xff] }
 0x4e0   : > { %7373 = vst.msk [vmem:[#allocation3 + $0x90] sm:$0xff] %vm3839_vm2, %v7341_v53  ;;  %v7311_v4 = vadd.f32 %v13699_v5, %v17364_v63  ;;  %v7048_v9 = vpop.f32.mrb[41].mxu1  ;;  %v17384_v2 = vld [vmem:[#allocation3 + $0x48] sm:$0xff] }
 0x4e1   : > { %7372 = vst.msk [vmem:[#allocation3 + $0x88] sm:$0xff] %vm3839_vm2, %v7340_v61  ;;  %v7310_v44 = vadd.f32 %v17364_v63, %v7048_v9  ;;  %13747 = vmatprep.mubr.msk.f32.mxu0 %vm3839_vm2, %v17384_v2 }
 0x4e2   : > { %v7343_v18 = vmax.f32 %v7311_v4, 0.0  ;;  %13748 = vmatmul.mubr.msk.f32.gmra.mrb[36].mxu0 %vm3839_vm2, %v17390_v37 }
 0x4e3   : > { %v7342_v17 = vmax.f32 %v7310_v44, 0.0  ;;  %v13702_v31 = vpop.f32.mrb[42].mxu1  ;;  %v17402_v1 = vld [vmem:[#allocation3 + $0x70] sm:$0xff] }
 0x4e4   : > { %7375 = vst.msk [vmem:[#allocation3 + $0xb0] sm:$0xff] %vm3839_vm2, %v7343_v18  ;;  %v7313_v33 = vadd.f32 %v13702_v31, %v17364_v63  ;;  %v7058_v39 = vpop.f32.mrb[43].mxu1  ;;  %v17396_v3 = vld [vmem:[#allocation3 + $0x68] sm:$0xff] }
 0x4e5   : > { %7374 = vst.msk [vmem:[#allocation3 + $0xa8] sm:$0xff] %vm3839_vm2, %v7342_v17  ;;  %v7312_v6 = vadd.f32 %v17364_v63, %v7058_v39  ;;  %13750 = vmatprep.mubr.msk.f32.mxu0 %vm3839_vm2, %v17396_v3 }
 0x4e6   : > { %v7345_v28 = vmax.f32 %v7313_v33, 0.0  ;;  %13751 = vmatmul.mubr.msk.f32.gmra.mrb[38].mxu0 %vm3839_vm2, %v17402_v1 }
 0x4e7   : > { %v7344_v10 = vmax.f32 %v7312_v6, 0.0  ;;  %v13705_v32 = vpop.f32.mrb[44].mxu1  ;;  %v17414_v62 = vld [vmem:[#allocation3 + $0x90] sm:$0xff] }
 0x4e8   : > { %7377 = vst.msk [vmem:[#allocation3 + $0xd0] sm:$0xff] %vm3839_vm2, %v7345_v28  ;;  %v7315_v54 = vadd.f32 %v13705_v32, %v17364_v63  ;;  %v7068_v11 = vpop.f32.mrb[45].mxu1  ;;  %v17408_v35 = vld [vmem:[#allocation3 + $0x88] sm:$0xff] }
 0x4e9   : > { %7376 = vst.msk [vmem:[#allocation3 + $0xc8] sm:$0xff] %vm3839_vm2, %v7344_v10  ;;  %v7314_v41 = vadd.f32 %v17364_v63, %v7068_v11  ;;  %13753 = vmatprep.mubr.msk.f32.mxu0 %vm3839_vm2, %v17408_v35 }
 0x4ea   : > { %v7347_v43 = vmax.f32 %v7315_v54, 0.0  ;;  %13754 = vmatmul.mubr.msk.f32.gmra.mrb[40].mxu0 %vm3839_vm2, %v17414_v62 }
 0x4eb   : > { %v7346_v45 = vmax.f32 %v7314_v41, 0.0  ;;  %v13708_v46 = vpop.f32.mrb[46].mxu1  ;;  %v17426_v12 = vld [vmem:[#allocation3 + $0xb0] sm:$0xff] }
 0x4ec   : > { %7379 = vst.msk [vmem:[#allocation3 + $0xf0] sm:$0xff] %vm3839_vm2, %v7347_v43  ;;  %v7317_v52 = vadd.f32 %v13708_v46, %v17364_v63  ;;  %v7078_v7 = vpop.f32.mrb[47].mxu1  ;;  %v17420_v14 = vld [vmem:[#allocation3 + $0xa8] sm:$0xff] }
 0x4ed   : > { %7378 = vst.msk [vmem:[#allocation3 + $0xe8] sm:$0xff] %vm3839_vm2, %v7346_v45  ;;  %v7316_v16 = vadd.f32 %v17364_v63, %v7078_v7  ;;  %13756 = vmatprep.mubr.msk.f32.mxu0 %vm3839_vm2, %v17420_v14 }
 0x4ee   : > { %v7349_v21 = vmax.f32 %v7317_v52, 0.0  ;;  %13757 = vmatmul.mubr.msk.f32.gmra.mrb[42].mxu0 %vm3839_vm2, %v17426_v12 }
 0x4ef   : > { %v7348_v0 = vmax.f32 %v7316_v16, 0.0  ;;  %v13711_v58 = vpop.f32.mrb[48].mxu1  ;;  %v17438_v19 = vld [vmem:[#allocation3 + $0xd0] sm:$0xff] }
 0x4f0   : > { %7381 = vst.msk [vmem:[#allocation3 + $0x110] sm:$0xff] %vm3839_vm2, %v7349_v21  ;;  %v7319_v30 = vadd.f32 %v13711_v58, %v17364_v63  ;;  %v7088_v29 = vpop.f32.mrb[49].mxu1  ;;  %v17432_v42 = vld [vmem:[#allocation3 + $0xc8] sm:$0xff] }
 0x4f1   : > { %7380 = vst.msk [vmem:[#allocation3 + $0x108] sm:$0xff] %vm3839_vm2, %v7348_v0  ;;  %v7318_v8 = vadd.f32 %v17364_v63, %v7088_v29  ;;  %13759 = vmatprep.mubr.msk.f32.mxu0 %vm3839_vm2, %v17432_v42 }
 0x4f2   : > { %v7351_v27 = vmax.f32 %v7319_v30, 0.0  ;;  %13760 = vmatmul.mubr.msk.f32.gmra.mrb[44].mxu0 %vm3839_vm2, %v17438_v19 }
 0x4f3   : > { %v7350_v50 = vmax.f32 %v7318_v8, 0.0  ;;  %v13714_v56 = vpop.f32.mrb[50].mxu1  ;;  %v17450_v24 = vld [vmem:[#allocation3 + $0xf0] sm:$0xff] }
 0x4f4   : > { %7383 = vst.msk [vmem:[#allocation3 + $0x130] sm:$0xff] %vm3839_vm2, %v7351_v27  ;;  %v7321_v48 = vadd.f32 %v13714_v56, %v17364_v63  ;;  %v7098_v47 = vpop.f32.mrb[51].mxu1  ;;  %v17444_v25 = vld [vmem:[#allocation3 + $0xe8] sm:$0xff] }
 0x4f5   : > { %7382 = vst.msk [vmem:[#allocation3 + $0x128] sm:$0xff] %vm3839_vm2, %v7350_v50  ;;  %v7320_v23 = vadd.f32 %v17364_v63, %v7098_v47  ;;  %13762 = vmatprep.mubr.msk.f32.mxu0 %vm3839_vm2, %v17444_v25 }
 0x4f6   : > { %v7353_v26 = vmax.f32 %v7321_v48, 0.0  ;;  %13763 = vmatmul.mubr.msk.f32.gmra.mrb[46].mxu0 %vm3839_vm2, %v17450_v24 }
 0x4f7   : > { %v7352_v51 = vmax.f32 %v7320_v23, 0.0  ;;  %v13717_v22 = vpop.f32.mrb[52].mxu1  ;;  %v17462_v20 = vld [vmem:[#allocation3 + $0x110] sm:$0xff] }
 0x4f8   : > { %7385 = vst.msk [vmem:[#allocation3 + $0x150] sm:$0xff] %vm3839_vm2, %v7353_v26  ;;  %v7323_v57 = vadd.f32 %v13717_v22, %v17364_v63  ;;  %v7108_v59 = vpop.f32.mrb[53].mxu1  ;;  %v17456_v60 = vld [vmem:[#allocation3 + $0x108] sm:$0xff] }
 0x4f9   : > { %7384 = vst.msk [vmem:[#allocation3 + $0x148] sm:$0xff] %vm3839_vm2, %v7352_v51  ;;  %v7322_v13 = vadd.f32 %v17364_v63, %v7108_v59  ;;  %13765 = vmatprep.mubr.msk.f32.mxu0 %vm3839_vm2, %v17456_v60  ;;  %v11592_v59 = vld [vmem:[%s18351_s5 + $0xb8] sm:$0xff] }
 0x4fa   : > { %v7355_v15 = vmax.f32 %v7323_v57, 0.0  ;;  %13766 = vmatmul.mubr.msk.f32.gmra.mrb[48].mxu0 %vm3839_vm2, %v17462_v20  ;;  %v11591_v57 = vld [vmem:[%s18351_s5 + $0xb0] sm:$0xff] }
 0x4fb   : > { %v7354_v34 = vmax.f32 %v7322_v13, 0.0  ;;  %v13720_v36 = vpop.f32.mrb[54].mxu1  ;;  %v17474_v61 = vld [vmem:[#allocation3 + $0x130] sm:$0xff]  ;;  %v17550_v13 = vld [vmem:[#allocation3 + $0x27] sm:$0xff] }
 0x4fc   : > { %7387 = vst.msk [vmem:[#allocation3 + $0x170] sm:$0xff] %vm3839_vm2, %v7355_v15  ;;  %v7325_v38 = vadd.f32 %v13720_v36, %v17364_v63  ;;  %v7118_v40 = vpop.f32.mrb[55].mxu1  ;;  %v17468_v55 = vld [vmem:[#allocation3 + $0x128] sm:$0xff]  ;;  %18615 = vst [vmem:[#allocation38_spill] sm:$0xff] %v17550_v13  ;;  %v14329_v15 = vpack.c.bf16 %v11592_v59, %v11591_v57  ;;  %v11629_v36 = vld [vmem:[%s18351_s5 + $0xe0] sm:$0xff] }
 0x4fd   : > { %7386 = vst.msk [vmem:[#allocation3 + $0x168] sm:$0xff] %vm3839_vm2, %v7354_v34  ;;  %v7324_v53 = vadd.f32 %v17364_v63, %v7118_v40  ;;  %13768 = vmatprep.mubr.msk.f32.mxu0 %vm3839_vm2, %v17468_v55  ;;  %v17554_v34 = vld [vmem:[#allocation3 + $0x2f] sm:$0xff]  ;;  %v17564_v40 = vld [vmem:[#allocation3 + $0x47] sm:$0xff] }
 0x4fe   : > { %v7357_v5 = vmax.f32 %v7325_v38, 0.0  ;;  %13769 = vmatmul.mubr.msk.f32.gmra.mrb[50].mxu0 %vm3839_vm2, %v17474_v61  ;;  %18616 = vst [vmem:[#allocation12_spill] sm:$0xff] %v17554_v34  ;;  %v11630_v38 = vld [vmem:[%s18351_s5 + $0xe8] sm:$0xff]  ;;  %18617 = vst [vmem:[#allocation14_spill] sm:$0xff] %v17564_v40 }
 0x4ff   : > { %v7356_v4 = vmax.f32 %v7324_v53, 0.0  ;;  %v13723_v9 = vpop.f32.mrb[56].mxu1  ;;  %v17486_v33 = vld [vmem:[#allocation3 + $0x150] sm:$0xff]  ;;  %v17569_v53 = vpack.c.bf16 %v11630_v38, %v11629_v36  ;;  %v11632_v36 = vld [vmem:[%s18351_s5 + $0xf8] sm:$0xff] }
 0x500   : > { %7389 = vst.msk [vmem:[#allocation3 + $0x190] sm:$0xff] %vm3839_vm2, %v7357_v5  ;;  %v7327_v44 = vadd.f32 %v13723_v9, %v17364_v63  ;;  %v7128_v18 = vpop.f32.mrb[57].mxu1  ;;  %v17480_v17 = vld [vmem:[#allocation3 + $0x148] sm:$0xff] }
 0x501   : > { %7388 = vst.msk [vmem:[#allocation3 + $0x188] sm:$0xff] %vm3839_vm2, %v7356_v4  ;;  %v7326_v31 = vadd.f32 %v17364_v63, %v7128_v18  ;;  %13771 = vmatprep.mubr.msk.f32.mxu0 %vm3839_vm2, %v17480_v17  ;;  %v17571_v5 = vld [vmem:[#allocation3 + $0x4f] sm:$0xff]  ;;  %v17575_v4 = vld [vmem:[#allocation3 + $0x67] sm:$0xff] }
 0x502   : > { %v7359_v39 = vmax.f32 %v7327_v44, 0.0  ;;  %13772 = vmatmul.mubr.msk.f32.gmra.mrb[52].mxu0 %vm3839_vm2, %v17486_v33  ;;  %18618 = vst [vmem:[#allocation4_spill] sm:$0xff] %v17571_v5  ;;  %18619 = vst [vmem:[#allocation5_spill] sm:$0xff] %v17575_v4  ;;  %v17584_v9 = vld [vmem:[#allocation3 + $0x87] sm:$0xff]  ;;  %v17588_v44 = vld [vmem:[#allocation3 + $0x8f] sm:$0xff] }
 0x503   : > { %v7358_v6 = vmax.f32 %v7326_v31, 0.0  ;;  %v13726_v28 = vpop.f32.mrb[58].mxu1  ;;  %v17498_v41 = vld [vmem:[#allocation3 + $0x170] sm:$0xff]  ;;  %18621 = vst [vmem:[#allocation7_spill] sm:$0xff] %v17584_v9  ;;  %18622 = vst [vmem:[#allocation8_spill] sm:$0xff] %v17588_v44  ;;  %v17592_v18 = vld [vmem:[#allocation3 + $0xa7] sm:$0xff] }
 0x504   : > { %7391 = vst.msk [vmem:[#allocation3 + $0x1b0] sm:$0xff] %vm3839_vm2, %v7359_v39  ;;  %v7329_v10 = vadd.f32 %v13726_v28, %v17364_v63  ;;  %v7138_v32 = vpop.f32.mrb[59].mxu1  ;;  %v17492_v54 = vld [vmem:[#allocation3 + $0x168] sm:$0xff]  ;;  %18623 = vst [vmem:[#allocation9_spill] sm:$0xff] %v17592_v18 }
 0x505   : > { %7390 = vst.msk [vmem:[#allocation3 + $0x1a8] sm:$0xff] %vm3839_vm2, %v7358_v6  ;;  %v7328_v11 = vadd.f32 %v17364_v63, %v7138_v32  ;;  %13774 = vmatprep.mubr.msk.f32.mxu0 %vm3839_vm2, %v17492_v54  ;;  %v17596_v31 = vld [vmem:[#allocation3 + $0xaf] sm:$0xff]  ;;  %v17600_v39 = vld [vmem:[#allocation3 + $0xc7] sm:$0xff] }
 0x506   : > { %v7361_v43 = vmax.f32 %v7329_v10, 0.0  ;;  %13775 = vmatmul.mubr.msk.f32.gmra.mrb[54].mxu0 %vm3839_vm2, %v17498_v41  ;;  %18624 = vst [vmem:[#allocation10_spill] sm:$0xff] %v17596_v31  ;;  %18625 = vst [vmem:[#allocation11_spill] sm:$0xff] %v17600_v39  ;;  %v17604_v6 = vld [vmem:[#allocation3 + $0xcf] sm:$0xff]  ;;  %v17608_v28 = vld [vmem:[#allocation3 + $0xe7] sm:$0xff] }
 0x507   : > { %v7360_v45 = vmax.f32 %v7328_v11, 0.0  ;;  %v13729_v46 = vpop.f32.mrb[60].mxu1  ;;  %v17510_v0 = vld [vmem:[#allocation3 + $0x190] sm:$0xff]  ;;  %18626 = vst [vmem:[#allocation13_spill] sm:$0xff] %v17604_v6  ;;  %18627 = vst [vmem:[#allocation15_spill] sm:$0xff] %v17608_v28  ;;  %v17616_v32 = vld [vmem:[#allocation3 + $0x107] sm:$0xff] }
 0x508   : > { %7393 = vst.msk [vmem:[#allocation3 + $0x1d0] sm:$0xff] %vm3839_vm2, %v7361_v43  ;;  %v7331_v52 = vadd.f32 %v13729_v46, %v17364_v63  ;;  %v7148_v7 = vpop.f32.mrb[61].mxu1  ;;  %v17504_v16 = vld [vmem:[#allocation3 + $0x188] sm:$0xff]  ;;  %18629 = vst [vmem:[#allocation17_spill] sm:$0xff] %v17616_v32 }
 0x509   : > { %7392 = vst.msk [vmem:[#allocation3 + $0x1c8] sm:$0xff] %vm3839_vm2, %v7360_v45  ;;  %v7330_v21 = vadd.f32 %v17364_v63, %v7148_v7  ;;  %13777 = vmatprep.mubr.msk.f32.mxu0 %vm3839_vm2, %v17504_v16  ;;  %v17612_v10 = vld [vmem:[#allocation3 + $0xef] sm:$0xff]  ;;  %v17624_v43 = vld [vmem:[#allocation3 + $0x127] sm:$0xff] }
 0x50a   : > { %v7363_v58 = vmax.f32 %v7331_v52, 0.0  ;;  %13778 = vmatmul.mubr.msk.f32.gmra.mrb[56].mxu0 %vm3839_vm2, %v17510_v0  ;;  %18628 = vst [vmem:[#allocation16_spill] sm:$0xff] %v17612_v10  ;;  %v17620_v11 = vld [vmem:[#allocation3 + $0x10f] sm:$0xff]  ;;  %18631 = vst [vmem:[#allocation19_spill] sm:$0xff] %v17624_v43  ;;  %v17632_v46 = vld [vmem:[#allocation3 + $0x147] sm:$0xff] }
 0x50b   : > { %v7362_v30 = vmax.f32 %v7330_v21, 0.0  ;;  %v13732_v29 = vpop.f32.mrb[62].mxu1  ;;  %v17522_v48 = vld [vmem:[#allocation3 + $0x1b0] sm:$0xff]  ;;  %18630 = vst [vmem:[#allocation18_spill] sm:$0xff] %v17620_v11  ;;  %18633 = vst [vmem:[#allocation21_spill] sm:$0xff] %v17632_v46  ;;  %v17640_v7 = vld [vmem:[#allocation3 + $0x167] sm:$0xff] }
 0x50c   : > { %7395 = vst.msk [vmem:[#allocation3 + $0x1f0] sm:$0xff] %vm3839_vm2, %v7363_v58  ;;  %v7333_v8 = vadd.f32 %v13732_v29, %v17364_v63  ;;  %v7158_v27 = vpop.f32.mrb[63].mxu1  ;;  %v17516_v50 = vld [vmem:[#allocation3 + $0x1a8] sm:$0xff]  ;;  %18635 = vst [vmem:[#allocation23_spill] sm:$0xff] %v17640_v7 }
 0x50d   : > { %7394 = vst.msk [vmem:[#allocation3 + $0x1e8] sm:$0xff] %vm3839_vm2, %v7362_v30  ;;  %v7332_v56 = vadd.f32 %v17364_v63, %v7158_v27  ;;  %13780 = vmatprep.mubr.msk.f32.mxu0 %vm3839_vm2, %v17516_v50  ;;  %v17628_v45 = vld [vmem:[#allocation3 + $0x12f] sm:$0xff]  ;;  %v17648_v58 = vld [vmem:[#allocation3 + $0x187] sm:$0xff] }
 0x50e   : > { %v7365_v47 = vmax.f32 %v7333_v8, 0.0  ;;  %13781 = vmatmul.mubr.msk.f32.gmra.mrb[58].mxu0 %vm3839_vm2, %v17522_v48  ;;  %18632 = vst [vmem:[#allocation20_spill] sm:$0xff] %v17628_v45  ;;  %v17636_v52 = vld [vmem:[#allocation3 + $0x14f] sm:$0xff]  ;;  %18637 = vst [vmem:[#allocation25_spill] sm:$0xff] %v17648_v58  ;;  %v17656_v29 = vld [vmem:[#allocation3 + $0x1a7] sm:$0xff] }
 0x50f   : > { %v7364_v23 = vmax.f32 %v7332_v56, 0.0  ;;  %v17532_v63 = vld [vmem:[#allocation3 + $0x1d0] sm:$0xff]  ;;  %18634 = vst [vmem:[#allocation22_spill] sm:$0xff] %v17636_v52  ;;  %18639 = vst [vmem:[#allocation27_spill] sm:$0xff] %v17656_v29 }
 0x510   : > { %7397 = vst.msk [vmem:[#allocation3 + $0x210] sm:$0xff] %vm3839_vm2, %v7365_v47  ;;  %v17527_v26 = vld [vmem:[#allocation3 + $0x1c8] sm:$0xff] }
 0x511   : > { %7396 = vst.msk [vmem:[#allocation3 + $0x208] sm:$0xff] %vm3839_vm2, %v7364_v23  ;;  %13783 = vmatprep.mubr.msk.f32.mxu0 %vm3839_vm2, %v17527_v26  ;;  %v17644_v21 = vld [vmem:[#allocation3 + $0x16f] sm:$0xff]  ;;  %v17664_v27 = vld [vmem:[#allocation3 + $0x1c7] sm:$0xff] }
 0x512   : > { %13784 = vmatmul.mubr.msk.f32.gmra.mrb[60].mxu0 %vm3839_vm2, %v17532_v63  ;;  %18636 = vst [vmem:[#allocation24_spill] sm:$0xff] %v17644_v21  ;;  %v17652_v30 = vld [vmem:[#allocation3 + $0x18f] sm:$0xff]  ;;  %18641 = vst [vmem:[#allocation36_spill] sm:$0xff] %v17664_v27 }
 0x513   : > { %v17540_v22 = vld [vmem:[#allocation3 + $0x1f0] sm:$0xff]  ;;  %18638 = vst [vmem:[#allocation26_spill] sm:$0xff] %v17652_v30 }
 0x514   : > { %v17536_v51 = vld [vmem:[#allocation3 + $0x1e8] sm:$0xff] }
 0x515   : > { %13786 = vmatprep.mubr.msk.f32.mxu0 %vm3839_vm2, %v17536_v51  ;;  %v17660_v8 = vld [vmem:[#allocation3 + $0x1af] sm:$0xff]  ;;  %v17672_v47 = vld [vmem:[#allocation3 + $0x1e7] sm:$0xff] }
 0x516   : > { %13787 = vmatmul.mubr.msk.f32.gmra.mrb[62].mxu0 %vm3839_vm2, %v17540_v22  ;;  %18640 = vst [vmem:[#allocation28_spill] sm:$0xff] %v17660_v8  ;;  %v17668_v56 = vld [vmem:[#allocation3 + $0x1cf] sm:$0xff]  ;;  %18643 = vst [vmem:[#allocation29_spill] sm:$0xff] %v17672_v47 }
 0x517   : > { %13797 = vmatprep.mubr.msk.f32.mxu0 %vm3839_vm2, %v17550_v13  ;;  %18642 = vst [vmem:[#allocation37_spill] sm:$0xff] %v17668_v56  ;;  %v17676_v23 = vld [vmem:[#allocation3 + $0x1ef] sm:$0xff] }
 0x518   : > { %18644 = vst [vmem:[#allocation30_spill] sm:$0xff] %v17676_v23  ;;  %v17680_v57 = vld [vmem:[#allocation3 + $0x207] sm:$0xff]  ;;  %v17684_v59 = vld [vmem:[#allocation3 + $0x20f] sm:$0xff] }
 0x519   : > { %18645 = vst [vmem:[#allocation31_spill] sm:$0xff] %v17680_v57  ;;  %18646 = vst [vmem:[#allocation32_spill] sm:$0xff] %v17684_v59  ;;  %v17694_v38 = vld [vmem:[#allocation3 + $0x29] sm:$0xff] }
 0x51a   : > { %13798 = vmatmul.mubr.msk.f32.vlgmr.msra.gmra.mrb[32].mxu0 %vm3839_vm2, %v17554_v34  ;;  %18647 = vst [vmem:[#allocation33_spill] sm:$0xff] %v17694_v38  ;;  %v7430_v34 = vld [vmem:[%s18351_s5] sm:$0xff]  ;;  %v7431_v13 = vld [vmem:[%s18351_s5 + $0x8] sm:$0xff] }
 0x51b   : > { %14328 = vmatpush3.bf16.msra.mxu0 %v17358_v49  ;;  %13800 = vmatprep.mubr.msk.f32.mxu0 %vm3839_vm2, %v17564_v40  ;;  %v17580_v49 = vld [vmem:[#allocation3 + $0x6f] sm:$0xff] }
 0x51c   : > { %14330 = vmatprep.subr.bf16.mxu0 %v14329_v15  ;;  %18620 = vst [vmem:[#allocation6_spill] sm:$0xff] %v17580_v49 }
 0x51e   : > { %13801 = vmatmul.mubr.msk.f32.gmra.mrb[34].mxu0 %vm3839_vm2, %v17571_v5  ;;  %v11668_v5 = vld [vmem:[%s18351_s5 + $0x118] sm:$0xff] }
 0x51f   : > { %13803 = vmatprep.mubr.msk.f32.mxu0 %vm3839_vm2, %v17575_v4  ;;  %14332 = vmatpush3.bf16.msra.mxu0 %v14329_v15  ;;  %v11631_v15 = vld [vmem:[%s18351_s5 + $0xf0] sm:$0xff] }
 0x520   : > { %14334 = vmatprep.subr.bf16.mxu0 %v17569_v53  ;;  %v11667_v4 = vld [vmem:[%s18351_s5 + $0x110] sm:$0xff] }
 0x521   : > { %v14345_v40 = vpack.c.bf16 %v11668_v5, %v11667_v4  ;;  %v18661_v5 = vld [vmem:[#allocation11_spill] sm:$0xff]  ;;  %v18662_v4 = vld [vmem:[#allocation13_spill] sm:$0xff] }
 0x522   : > { %13804 = vmatmul.mubr.msk.f32.gmra.mrb[36].mxu0 %vm3839_vm2, %v17580_v49  ;;  %v17828_v49 = vld [vmem:[#allocation3 + $0x211] sm:$0xff] }
 0x523   : > { %13806 = vmatprep.mubr.msk.f32.mxu0 %vm3839_vm2, %v17584_v9  ;;  %v17824_v9 = vld [vmem:[#allocation3 + $0x209] sm:$0xff]  ;;  %18649 = vst [vmem:[#allocation35_spill] sm:$0xff] %v17828_v49 }
 0x526   : > { %13807 = vmatmul.mubr.msk.f32.gmra.mrb[38].mxu0 %vm3839_vm2, %v17588_v44  ;;  %v17820_v44 = vld [vmem:[#allocation3 + $0x1f1] sm:$0xff] }
 0x527   : > { %13809 = vmatprep.mubr.msk.f32.mxu0 %vm3839_vm2, %v17592_v18  ;;  %v17816_v18 = vld [vmem:[#allocation3 + $0x1e9] sm:$0xff] }
 0x52a   : > { %13810 = vmatmul.mubr.msk.f32.gmra.mrb[40].mxu0 %vm3839_vm2, %v17596_v31  ;;  %v17812_v31 = vld [vmem:[#allocation3 + $0x1d1] sm:$0xff] }
 0x52b   : > { %13812 = vmatprep.mubr.msk.f32.mxu0 %vm3839_vm2, %v17600_v39  ;;  %v17808_v39 = vld [vmem:[#allocation3 + $0x1c9] sm:$0xff] }
 0x52e   : > { %13813 = vmatmul.mubr.msk.f32.gmra.mrb[42].mxu0 %vm3839_vm2, %v17604_v6  ;;  %v17804_v6 = vld [vmem:[#allocation3 + $0x1b1] sm:$0xff] }
 0x52f   : > { %13815 = vmatprep.mubr.msk.f32.mxu0 %vm3839_vm2, %v17608_v28  ;;  %v17800_v28 = vld [vmem:[#allocation3 + $0x1a9] sm:$0xff] }
 0x532   : > { %13816 = vmatmul.mubr.msk.f32.gmra.mrb[44].mxu0 %vm3839_vm2, %v17612_v10  ;;  %v17796_v10 = vld [vmem:[#allocation3 + $0x191] sm:$0xff] }
 0x533   : > { %13818 = vmatprep.mubr.msk.f32.mxu0 %vm3839_vm2, %v17616_v32  ;;  %v17792_v32 = vld [vmem:[#allocation3 + $0x189] sm:$0xff] }
 0x536   : > { %13819 = vmatmul.mubr.msk.f32.gmra.mrb[46].mxu0 %vm3839_vm2, %v17620_v11  ;;  %v17788_v11 = vld [vmem:[#allocation3 + $0x171] sm:$0xff] }
 0x537   : > { %13821 = vmatprep.mubr.msk.f32.mxu0 %vm3839_vm2, %v17624_v43  ;;  %v17784_v43 = vld [vmem:[#allocation3 + $0x169] sm:$0xff] }
 0x53a   : > { %13822 = vmatmul.mubr.msk.f32.gmra.mrb[48].mxu0 %vm3839_vm2, %v17628_v45  ;;  %v17780_v45 = vld [vmem:[#allocation3 + $0x151] sm:$0xff] }
 0x53b   : > { %13824 = vmatprep.mubr.msk.f32.mxu0 %vm3839_vm2, %v17632_v46  ;;  %v17776_v46 = vld [vmem:[#allocation3 + $0x149] sm:$0xff] }
 0x53e   : > { %13825 = vmatmul.mubr.msk.f32.gmra.mrb[50].mxu0 %vm3839_vm2, %v17636_v52  ;;  %v17772_v52 = vld [vmem:[#allocation3 + $0x131] sm:$0xff] }
 0x53f   : > { %13827 = vmatprep.mubr.msk.f32.mxu0 %vm3839_vm2, %v17640_v7  ;;  %v17768_v7 = vld [vmem:[#allocation3 + $0x129] sm:$0xff] }
 0x542   : > { %13828 = vmatmul.mubr.msk.f32.gmra.mrb[52].mxu0 %vm3839_vm2, %v17644_v21  ;;  %v17764_v21 = vld [vmem:[#allocation3 + $0x111] sm:$0xff] }
 0x543   : > { %13830 = vmatprep.mubr.msk.f32.mxu0 %vm3839_vm2, %v17648_v58  ;;  %v17760_v58 = vld [vmem:[#allocation3 + $0x109] sm:$0xff] }
 0x546   : > { %13831 = vmatmul.mubr.msk.f32.gmra.mrb[54].mxu0 %vm3839_vm2, %v17652_v30  ;;  %v17756_v30 = vld [vmem:[#allocation3 + $0xf1] sm:$0xff] }
 0x547   : > { %13833 = vmatprep.mubr.msk.f32.mxu0 %vm3839_vm2, %v17656_v29  ;;  %v17752_v29 = vld [vmem:[#allocation3 + $0xe9] sm:$0xff] }
 0x54a   : > { %13834 = vmatmul.mubr.msk.f32.gmra.mrb[56].mxu0 %vm3839_vm2, %v17660_v8  ;;  %v17748_v8 = vld [vmem:[#allocation3 + $0xd1] sm:$0xff] }
 0x54b   : > { %13836 = vmatprep.mubr.msk.f32.mxu0 %vm3839_vm2, %v17664_v27  ;;  %v17744_v27 = vld [vmem:[#allocation3 + $0xc9] sm:$0xff] }
 0x54e   : > { %13837 = vmatmul.mubr.msk.f32.gmra.mrb[58].mxu0 %vm3839_vm2, %v17668_v56  ;;  %v11666_v56 = vld [vmem:[%s18351_s5 + $0x108] sm:$0xff] }
 0x54f   : > { %13839 = vmatprep.mubr.msk.f32.mxu0 %vm3839_vm2, %v17672_v47  ;;  %v11665_v47 = vld [vmem:[%s18351_s5 + $0x100] sm:$0xff] }
 0x552   : > { %13840 = vmatmul.mubr.msk.f32.gmra.mrb[60].mxu0 %vm3839_vm2, %v17676_v23  ;;  %v14337_v23 = vpack.c.bf16 %v11632_v36, %v11631_v15  ;;  %v17713_v15 = vpack.c.bf16 %v11666_v56, %v11665_v47  ;;  %v17715_v36 = vld [vmem:[#allocation3 + $0x51] sm:$0xff]  ;;  %v17728_v56 = vld [vmem:[#allocation3 + $0x89] sm:$0xff] }
 0x553   : > { %13842 = vmatprep.mubr.msk.f32.mxu0 %vm3839_vm2, %v17680_v57  ;;  %v17698_v57 = vld [vmem:[#allocation3 + $0x31] sm:$0xff] }
 0x554   : > { %18648 = vst [vmem:[#allocation34_spill] sm:$0xff] %v17698_v57  ;;  %v17732_v47 = vld [vmem:[#allocation3 + $0x91] sm:$0xff] }
 0x556   : > { %13843 = vmatmul.mubr.msk.f32.gmra.mrb[62].mxu0 %vm3839_vm2, %v17684_v59  ;;  %v17708_v59 = vld [vmem:[#allocation3 + $0x49] sm:$0xff] }
 0x557   : > { %13853 = vmatprep.mubr.msk.f32.mxu0 %vm3839_vm2, %v17694_v38  ;;  %v17719_v38 = vld [vmem:[#allocation3 + $0x69] sm:$0xff] }
 0x55a   : > { %13854 = vmatmul.mubr.msk.f32.vlgmr.msra.gmra.mrb[32].mxu0 %vm3839_vm2, %v17698_v57  ;;  %v17736_v57 = vld [vmem:[#allocation3 + $0xa9] sm:$0xff] }
 0x55b   : > { %14336 = vmatpush3.bf16.msra.mxu0 %v17569_v53  ;;  %13856 = vmatprep.mubr.msk.f32.mxu0 %vm3839_vm2, %v17708_v59  ;;  %v17724_v53 = vld [vmem:[#allocation3 + $0x71] sm:$0xff] }
 0x55c   : > { %14338 = vmatprep.subr.bf16.mxu0 %v14337_v23 }
 0x55e   : > { %13857 = vmatmul.mubr.msk.f32.gmra.mrb[34].mxu0 %vm3839_vm2, %v17715_v36 }
 0x55f   : > { %13859 = vmatprep.mubr.msk.f32.mxu0 %vm3839_vm2, %v17719_v38  ;;  %14340 = vmatpush3.bf16.msra.mxu0 %v14337_v23  ;;  %v17740_v23 = vld [vmem:[#allocation3 + $0xb1] sm:$0xff] }
 0x560   : > { %14342 = vmatprep.subr.bf16.mxu0 %v17713_v15 }
 0x562   : > { %13860 = vmatmul.mubr.msk.f32.gmra.mrb[36].mxu0 %vm3839_vm2, %v17724_v53 }
 0x563   : > { %13862 = vmatprep.mubr.msk.f32.mxu0 %vm3839_vm2, %v17728_v56 }
 0x566   : > { %13863 = vmatmul.mubr.msk.f32.gmra.mrb[38].mxu0 %vm3839_vm2, %v17732_v47 }
 0x567   : > { %13865 = vmatprep.mubr.msk.f32.mxu0 %vm3839_vm2, %v17736_v57 }
 0x56a   : > { %13866 = vmatmul.mubr.msk.f32.gmra.mrb[40].mxu0 %vm3839_vm2, %v17740_v23 }
 0x56b   : > { %13868 = vmatprep.mubr.msk.f32.mxu0 %vm3839_vm2, %v17744_v27 }
 0x56e   : > { %13869 = vmatmul.mubr.msk.f32.gmra.mrb[42].mxu0 %vm3839_vm2, %v17748_v8 }
 0x56f   : > { %13871 = vmatprep.mubr.msk.f32.mxu0 %vm3839_vm2, %v17752_v29 }
 0x572   : > { %13872 = vmatmul.mubr.msk.f32.gmra.mrb[44].mxu0 %vm3839_vm2, %v17756_v30 }
 0x573   : > { %13874 = vmatprep.mubr.msk.f32.mxu0 %vm3839_vm2, %v17760_v58 }
 0x576   : > { %13875 = vmatmul.mubr.msk.f32.gmra.mrb[46].mxu0 %vm3839_vm2, %v17764_v21 }
 0x577   : > { %13877 = vmatprep.mubr.msk.f32.mxu0 %vm3839_vm2, %v17768_v7 }
 0x57a   : > { %13878 = vmatmul.mubr.msk.f32.gmra.mrb[48].mxu0 %vm3839_vm2, %v17772_v52 }
 0x57b   : > { %13880 = vmatprep.mubr.msk.f32.mxu0 %vm3839_vm2, %v17776_v46 }
 0x57e   : > { %13881 = vmatmul.mubr.msk.f32.gmra.mrb[50].mxu0 %vm3839_vm2, %v17780_v45 }
 0x57f   : > { %13883 = vmatprep.mubr.msk.f32.mxu0 %vm3839_vm2, %v17784_v43 }
 0x582   : > { %13884 = vmatmul.mubr.msk.f32.gmra.mrb[52].mxu0 %vm3839_vm2, %v17788_v11 }
 0x583   : > { %13886 = vmatprep.mubr.msk.f32.mxu0 %vm3839_vm2, %v17792_v32 }
 0x586   : > { %13887 = vmatmul.mubr.msk.f32.gmra.mrb[54].mxu0 %vm3839_vm2, %v17796_v10 }
 0x587   : > { %13889 = vmatprep.mubr.msk.f32.mxu0 %vm3839_vm2, %v17800_v28 }
 0x58a   : > { %13890 = vmatmul.mubr.msk.f32.gmra.mrb[56].mxu0 %vm3839_vm2, %v17804_v6 }
 0x58b   : > { %13892 = vmatprep.mubr.msk.f32.mxu0 %vm3839_vm2, %v17808_v39 }
 0x58e   : > { %13893 = vmatmul.mubr.msk.f32.gmra.mrb[58].mxu0 %vm3839_vm2, %v17812_v31 }
 0x58f   : > { %13895 = vmatprep.mubr.msk.f32.mxu0 %vm3839_vm2, %v17816_v18 }
 0x592   : > { %13896 = vmatmul.mubr.msk.f32.gmra.mrb[60].mxu0 %vm3839_vm2, %v17820_v44 }
 0x593   : > { %13898 = vmatprep.mubr.msk.f32.mxu0 %vm3839_vm2, %v17824_v9 }
 0x596   : > { %13899 = vmatmul.mubr.msk.f32.gmra.mrb[62].mxu0 %vm3839_vm2, %v17828_v49  ;;  %v14349_v49 = vpack.c.bf16 %v7431_v13, %v7430_v34  ;;  %v18658_v13 = vld [vmem:[#allocation8_spill] sm:$0xff]  ;;  %v18659_v34 = vld [vmem:[#allocation9_spill] sm:$0xff] }
 0x597   : > { %13909 = vmatprep.mubr.msk.f32.mxu0 %vm3839_vm2, %v17384_v2  ;;  %v17901_v2 = vld [vmem:[#allocation3 + $0x208] sm:$0xff] }
 0x59a   : > { %13910 = vmatmul.mubr.msk.f32.vlgmr.msra.gmra.mrb[32].mxu0 %vm3839_vm2, %v17390_v37  ;;  %v8649_v37 = vld [vmem:[#allocation3 + $0x228] sm:$0xff] }
 0x59b   : > { %14344 = vmatpush3.bf16.msra.mxu0 %v17713_v15  ;;  %13912 = vmatprep.mubr.msk.f32.mxu0 %vm3839_vm2, %v17396_v3  ;;  %v17905_v3 = vld [vmem:[#allocation3 + $0x210] sm:$0xff]  ;;  %v18665_v15 = vld [vmem:[#allocation17_spill] sm:$0xff] }
 0x59c   : > { %14346 = vmatprep.subr.bf16.mxu0 %v14345_v40 }
 0x59e   : > { %13913 = vmatmul.mubr.msk.f32.gmra.mrb[34].mxu0 %vm3839_vm2, %v17402_v1  ;;  %v8650_v1 = vld [vmem:[#allocation3 + $0x230] sm:$0xff] }
 0x59f   : > { %13915 = vmatprep.mubr.msk.f32.mxu0 %vm3839_vm2, %v17408_v35  ;;  %14348 = vmatpush3.bf16.msra.mxu0 %v14345_v40  ;;  %v7432_v35 = vld [vmem:[%s18351_s5 + $0x10] sm:$0xff] }
 0x5a0   : > { %14350 = vmatprep.subr.bf16.mxu0 %v14349_v49  ;;  %v18660_v40 = vld [vmem:[#allocation10_spill] sm:$0xff] }
 0x5a2   : > { %13916 = vmatmul.mubr.msk.f32.gmra.mrb[36].mxu0 %vm3839_vm2, %v17414_v62  ;;  %v7433_v62 = vld [vmem:[%s18351_s5 + $0x18] sm:$0xff] }
 0x5a3   : > { %13918 = vmatprep.mubr.msk.f32.mxu0 %vm3839_vm2, %v17420_v14  ;;  %v14353_v14 = vpack.c.bf16 %v7433_v62, %v7432_v35  ;;  %v18668_v35 = vld [vmem:[#allocation20_spill] sm:$0xff]  ;;  %v18669_v62 = vld [vmem:[#allocation21_spill] sm:$0xff] }
 0x5a6   : > { %13919 = vmatmul.mubr.msk.f32.gmra.mrb[38].mxu0 %vm3839_vm2, %v17426_v12  ;;  %v11545_v12 = vld [vmem:[%s18351_s5 + $0x40] sm:$0xff] }
 0x5a7   : > { %13921 = vmatprep.mubr.msk.f32.mxu0 %vm3839_vm2, %v17432_v42  ;;  %v11546_v42 = vld [vmem:[%s18351_s5 + $0x48] sm:$0xff] }
 0x5aa   : > { %13922 = vmatmul.mubr.msk.f32.gmra.mrb[40].mxu0 %vm3839_vm2, %v17438_v19  ;;  %v14357_v19 = vpack.c.bf16 %v11546_v42, %v11545_v12  ;;  %v18671_v12 = vld [vmem:[#allocation23_spill] sm:$0xff]  ;;  %v18672_v42 = vld [vmem:[#allocation24_spill] sm:$0xff] }
 0x5ab   : > { %13924 = vmatprep.mubr.msk.f32.mxu0 %vm3839_vm2, %v17444_v25  ;;  %v9007_v25 = vld [vmem:[#allocation3 + $0x229] sm:$0xff] }
 0x5ae   : > { %13925 = vmatmul.mubr.msk.f32.gmra.mrb[42].mxu0 %vm3839_vm2, %v17450_v24  ;;  %v18650_v24 = vld [vmem:[#allocation35_spill] sm:$0xff] }
 0x5af   : > { %13927 = vmatprep.mubr.msk.f32.mxu0 %vm3839_vm2, %v17456_v60  ;;  %v9008_v60 = vld [vmem:[#allocation3 + $0x231] sm:$0xff] }
 0x5b2   : > { %13928 = vmatmul.mubr.msk.f32.gmra.mrb[44].mxu0 %vm3839_vm2, %v17462_v20  ;;  %v7398_v20 = vld [vmem:[#allocation3 + $0x7] sm:$0xff] }
 0x5b3   : > { %13930 = vmatprep.mubr.msk.f32.mxu0 %vm3839_vm2, %v17468_v55  ;;  %v11547_v55 = vld [vmem:[%s18351_s5 + $0x50] sm:$0xff] }
 0x5b6   : > { %13931 = vmatmul.mubr.msk.f32.gmra.mrb[46].mxu0 %vm3839_vm2, %v17474_v61  ;;  %v11548_v61 = vld [vmem:[%s18351_s5 + $0x58] sm:$0xff] }
 0x5b7   : > { %13933 = vmatprep.mubr.msk.f32.mxu0 %vm3839_vm2, %v17480_v17  ;;  %v7399_v17 = vld [vmem:[#allocation3 + $0xf] sm:$0xff] }
 0x5ba   : > { %13934 = vmatmul.mubr.msk.f32.gmra.mrb[48].mxu0 %vm3839_vm2, %v17486_v33  ;;  %v14361_v33 = vpack.c.bf16 %v11548_v61, %v11547_v55  ;;  %v18678_v55 = vld [vmem:[#allocation37_spill] sm:$0xff] }
 0x5bb   : > { %13936 = vmatprep.mubr.msk.f32.mxu0 %vm3839_vm2, %v17492_v54  ;;  %v11585_v54 = vld [vmem:[%s18351_s5 + $0x80] sm:$0xff]  ;;  %v18679_v61 = vld [vmem:[#allocation29_spill] sm:$0xff] }
 0x5be   : > { %13937 = vmatmul.mubr.msk.f32.gmra.mrb[50].mxu0 %vm3839_vm2, %v17498_v41  ;;  %v11586_v41 = vld [vmem:[%s18351_s5 + $0x88] sm:$0xff] }
 0x5bf   : > { %13939 = vmatprep.mubr.msk.f32.mxu0 %vm3839_vm2, %v17504_v16  ;;  %v18651_v16 = vld [vmem:[#allocation38_spill] sm:$0xff] }
 0x5c2   : > { %13940 = vmatmul.mubr.msk.f32.gmra.mrb[52].mxu0 %vm3839_vm2, %v17510_v0  ;;  %v14365_v0 = vpack.c.bf16 %v11586_v41, %v11585_v54  ;;  %v11588_v54 = vld [vmem:[%s18351_s5 + $0x98] sm:$0xff]  ;;  %v18680_v41 = vld [vmem:[#allocation30_spill] sm:$0xff] }
 0x5c3   : > { %13942 = vmatprep.mubr.msk.f32.mxu0 %vm3839_vm2, %v17516_v50  ;;  %v18652_v50 = vld [vmem:[#allocation12_spill] sm:$0xff] }
 0x5c6   : > { %13943 = vmatmul.mubr.msk.f32.gmra.mrb[54].mxu0 %vm3839_vm2, %v17522_v48  ;;  %v18653_v48 = vld [vmem:[#allocation14_spill] sm:$0xff] }
 0x5c7   : > { %13945 = vmatprep.mubr.msk.f32.mxu0 %vm3839_vm2, %v17527_v26  ;;  %v18654_v26 = vld [vmem:[#allocation4_spill] sm:$0xff] }
 0x5ca   : > { %13946 = vmatmul.mubr.msk.f32.gmra.mrb[56].mxu0 %vm3839_vm2, %v17532_v63  ;;  %v18655_v63 = vld [vmem:[#allocation5_spill] sm:$0xff] }
 0x5cb   : > { %13948 = vmatprep.mubr.msk.f32.mxu0 %vm3839_vm2, %v17536_v51  ;;  %v18656_v51 = vld [vmem:[#allocation6_spill] sm:$0xff] }
 0x5ce   : > { %13949 = vmatmul.mubr.msk.f32.gmra.mrb[58].mxu0 %vm3839_vm2, %v17540_v22  ;;  %v18657_v22 = vld [vmem:[#allocation7_spill] sm:$0xff] }
 0x5cf   : > { %13951 = vmatprep.mubr.msk.f32.mxu0 %vm3839_vm2, %v17901_v2 }
 0x5d2   : > { %13952 = vmatmul.mubr.msk.f32.gmra.mrb[60].mxu0 %vm3839_vm2, %v17905_v3 }
 0x5d3   : > { %13954 = vmatprep.mubr.msk.f32.mxu0 %vm3839_vm2, %v8649_v37  ;;  %v18666_v37 = vld [vmem:[#allocation18_spill] sm:$0xff] }
 0x5d6   : > { %13955 = vmatmul.mubr.msk.f32.gmra.mrb[62].mxu0 %vm3839_vm2, %v8650_v1  ;;  %v18667_v1 = vld [vmem:[#allocation19_spill] sm:$0xff] }
 0x5d7   : > { %13965 = vmatprep.mubr.msk.f32.mxu0 %vm3839_vm2, %v17708_v59 }
 0x5da   : > { %13966 = vmatmul.mubr.msk.f32.vlgmr.msra.gmra.mrb[32].mxu0 %vm3839_vm2, %v17715_v36 }
 0x5db   : > { %14352 = vmatpush3.bf16.msra.mxu0 %v14349_v49  ;;  %13968 = vmatprep.mubr.msk.f32.mxu0 %vm3839_vm2, %v17719_v38  ;;  %v18663_v49 = vld [vmem:[#allocation15_spill] sm:$0xff] }
 0x5dc   : > { %14354 = vmatprep.subr.bf16.mxu0 %v14353_v14 }
 0x5de   : > { %13969 = vmatmul.mubr.msk.f32.gmra.mrb[34].mxu0 %vm3839_vm2, %v17724_v53 }
 0x5df   : > { %13971 = vmatprep.mubr.msk.f32.mxu0 %vm3839_vm2, %v17728_v56  ;;  %14356 = vmatpush3.bf16.msra.mxu0 %v14353_v14  ;;  %v18670_v14 = vld [vmem:[#allocation22_spill] sm:$0xff] }
 0x5e0   : > { %14358 = vmatprep.subr.bf16.mxu0 %v14357_v19 }
 0x5e2   : > { %13972 = vmatmul.mubr.msk.f32.gmra.mrb[36].mxu0 %vm3839_vm2, %v17732_v47 }
 0x5e3   : > { %13974 = vmatprep.mubr.msk.f32.mxu0 %vm3839_vm2, %v17736_v57 }
 0x5e6   : > { %13975 = vmatmul.mubr.msk.f32.gmra.mrb[38].mxu0 %vm3839_vm2, %v17740_v23 }
 0x5e7   : > { %13977 = vmatprep.mubr.msk.f32.mxu0 %vm3839_vm2, %v17744_v27 }
 0x5ea   : > { %13978 = vmatmul.mubr.msk.f32.gmra.mrb[40].mxu0 %vm3839_vm2, %v17748_v8 }
 0x5eb   : > { %13980 = vmatprep.mubr.msk.f32.mxu0 %vm3839_vm2, %v17752_v29 }
 0x5ee   : > { %13981 = vmatmul.mubr.msk.f32.gmra.mrb[42].mxu0 %vm3839_vm2, %v17756_v30 }
 0x5ef   : > { %13983 = vmatprep.mubr.msk.f32.mxu0 %vm3839_vm2, %v17760_v58 }
 0x5f2   : > { %13984 = vmatmul.mubr.msk.f32.gmra.mrb[44].mxu0 %vm3839_vm2, %v17764_v21 }
 0x5f3   : > { %13986 = vmatprep.mubr.msk.f32.mxu0 %vm3839_vm2, %v17768_v7 }
 0x5f6   : > { %13987 = vmatmul.mubr.msk.f32.gmra.mrb[46].mxu0 %vm3839_vm2, %v17772_v52 }
 0x5f7   : > { %13989 = vmatprep.mubr.msk.f32.mxu0 %vm3839_vm2, %v17776_v46 }
 0x5fa   : > { %13990 = vmatmul.mubr.msk.f32.gmra.mrb[48].mxu0 %vm3839_vm2, %v17780_v45 }
 0x5fb   : > { %13992 = vmatprep.mubr.msk.f32.mxu0 %vm3839_vm2, %v17784_v43 }
 0x5fe   : > { %13993 = vmatmul.mubr.msk.f32.gmra.mrb[50].mxu0 %vm3839_vm2, %v17788_v11 }
 0x5ff   : > { %13995 = vmatprep.mubr.msk.f32.mxu0 %vm3839_vm2, %v17792_v32 }
 0x602   : > { %13996 = vmatmul.mubr.msk.f32.gmra.mrb[52].mxu0 %vm3839_vm2, %v17796_v10 }
 0x603   : > { %13998 = vmatprep.mubr.msk.f32.mxu0 %vm3839_vm2, %v17800_v28 }
 0x606   : > { %13999 = vmatmul.mubr.msk.f32.gmra.mrb[54].mxu0 %vm3839_vm2, %v17804_v6 }
 0x607   : > { %14001 = vmatprep.mubr.msk.f32.mxu0 %vm3839_vm2, %v17808_v39 }
 0x60a   : > { %14002 = vmatmul.mubr.msk.f32.gmra.mrb[56].mxu0 %vm3839_vm2, %v17812_v31 }
 0x60b   : > { %14004 = vmatprep.mubr.msk.f32.mxu0 %vm3839_vm2, %v17816_v18 }
 0x60e   : > { %14005 = vmatmul.mubr.msk.f32.gmra.mrb[58].mxu0 %vm3839_vm2, %v17820_v44 }
 0x60f   : > { %14007 = vmatprep.mubr.msk.f32.mxu0 %vm3839_vm2, %v17824_v9  ;;  %v18664_v9 = vld [vmem:[#allocation16_spill] sm:$0xff] }
 0x612   : > { %14008 = vmatmul.mubr.msk.f32.gmra.mrb[60].mxu0 %vm3839_vm2, %v18650_v24  ;;  %v18675_v24 = vld [vmem:[#allocation27_spill] sm:$0xff] }
 0x613   : > { %14010 = vmatprep.mubr.msk.f32.mxu0 %vm3839_vm2, %v9007_v25  ;;  %v18674_v25 = vld [vmem:[#allocation26_spill] sm:$0xff] }
 0x616   : > { %14011 = vmatmul.mubr.msk.f32.gmra.mrb[62].mxu0 %vm3839_vm2, %v9008_v60  ;;  %v18676_v60 = vld [vmem:[#allocation28_spill] sm:$0xff] }
 0x617   : > { %14021 = vmatprep.mubr.msk.f32.mxu0 %vm3839_vm2, %v7398_v20  ;;  %v18677_v20 = vld [vmem:[#allocation36_spill] sm:$0xff] }
 0x61a   : > { %14022 = vmatmul.mubr.msk.f32.vlgmr.msra.gmra.mrb[32].mxu0 %vm3839_vm2, %v7399_v17  ;;  %v7792_v17 = vld [vmem:[#allocation3 + $0x9] sm:$0xff] }
 0x61b   : > { %14360 = vmatpush3.bf16.msra.mxu0 %v14357_v19  ;;  %14024 = vmatprep.mubr.msk.f32.mxu0 %vm3839_vm2, %v18651_v16  ;;  %v18673_v19 = vld [vmem:[#allocation25_spill] sm:$0xff]  ;;  %v7793_v16 = vld [vmem:[#allocation3 + $0x11] sm:$0xff] }
 0x61c   : > { %14362 = vmatprep.subr.bf16.mxu0 %v14361_v33 }
 0x61e   : > { %14025 = vmatmul.mubr.msk.f32.gmra.mrb[34].mxu0 %vm3839_vm2, %v18652_v50 }
 0x61f   : > { %14027 = vmatprep.mubr.msk.f32.mxu0 %vm3839_vm2, %v18653_v48  ;;  %14364 = vmatpush3.bf16.msra.mxu0 %v14361_v33  ;;  %v11587_v33 = vld [vmem:[%s18351_s5 + $0x90] sm:$0xff] }
 0x620   : > { %14366 = vmatprep.subr.bf16.mxu0 %v14365_v0  ;;  %v14369_v50 = vpack.c.bf16 %v11588_v54, %v11587_v33 }
 0x622   : > { %14028 = vmatmul.mubr.msk.f32.gmra.mrb[36].mxu0 %vm3839_vm2, %v18654_v26 }
 0x623   : > { %14030 = vmatprep.mubr.msk.f32.mxu0 %vm3839_vm2, %v18655_v63 }
 0x626   : > { %14031 = vmatmul.mubr.msk.f32.gmra.mrb[38].mxu0 %vm3839_vm2, %v18656_v51 }
 0x627   : > { %14033 = vmatprep.mubr.msk.f32.mxu0 %vm3839_vm2, %v18657_v22 }
 0x62a   : > { %14034 = vmatmul.mubr.msk.f32.gmra.mrb[40].mxu0 %vm3839_vm2, %v18658_v13 }
 0x62b   : > { %14036 = vmatprep.mubr.msk.f32.mxu0 %vm3839_vm2, %v18659_v34 }
 0x62e   : > { %14037 = vmatmul.mubr.msk.f32.gmra.mrb[42].mxu0 %vm3839_vm2, %v18660_v40 }
 0x62f   : > { %14039 = vmatprep.mubr.msk.f32.mxu0 %vm3839_vm2, %v18661_v5 }
 0x632   : > { %14040 = vmatmul.mubr.msk.f32.gmra.mrb[44].mxu0 %vm3839_vm2, %v18662_v4 }
 0x633   : > { %14042 = vmatprep.mubr.msk.f32.mxu0 %vm3839_vm2, %v18663_v49 }
 0x636   : > { %14043 = vmatmul.mubr.msk.f32.gmra.mrb[46].mxu0 %vm3839_vm2, %v18664_v9 }
 0x637   : > { %14045 = vmatprep.mubr.msk.f32.mxu0 %vm3839_vm2, %v18665_v15 }
 0x63a   : > { %14046 = vmatmul.mubr.msk.f32.gmra.mrb[48].mxu0 %vm3839_vm2, %v18666_v37 }
 0x63b   : > { %14048 = vmatprep.mubr.msk.f32.mxu0 %vm3839_vm2, %v18667_v1 }
 0x63e   : > { %14049 = vmatmul.mubr.msk.f32.gmra.mrb[50].mxu0 %vm3839_vm2, %v18668_v35 }
 0x63f   : > { %14051 = vmatprep.mubr.msk.f32.mxu0 %vm3839_vm2, %v18669_v62 }
 0x642   : > { %14052 = vmatmul.mubr.msk.f32.gmra.mrb[52].mxu0 %vm3839_vm2, %v18670_v14 }
 0x643   : > { %14054 = vmatprep.mubr.msk.f32.mxu0 %vm3839_vm2, %v18671_v12 }
 0x646   : > { %14055 = vmatmul.mubr.msk.f32.gmra.mrb[54].mxu0 %vm3839_vm2, %v18672_v42 }
 0x647   : > { %14057 = vmatprep.mubr.msk.f32.mxu0 %vm3839_vm2, %v18673_v19 }
 0x64a   : > { %14058 = vmatmul.mubr.msk.f32.gmra.mrb[56].mxu0 %vm3839_vm2, %v18674_v25 }
 0x64b   : > { %14060 = vmatprep.mubr.msk.f32.mxu0 %vm3839_vm2, %v18675_v24 }
 0x64e   : > { %14061 = vmatmul.mubr.msk.f32.gmra.mrb[58].mxu0 %vm3839_vm2, %v18676_v60  ;;  %v18682_v60 = vld [vmem:[#allocation34_spill] sm:$0xff] }
 0x64f   : > { %14063 = vmatprep.mubr.msk.f32.mxu0 %vm3839_vm2, %v18677_v20  ;;  %v18681_v20 = vld [vmem:[#allocation33_spill] sm:$0xff] }
 0x652   : > { %14064 = vmatmul.mubr.msk.f32.gmra.mrb[60].mxu0 %vm3839_vm2, %v18678_v55  ;;  %v11626_v55 = vld [vmem:[%s18351_s5 + $0xc8] sm:$0xff] }
 0x653   : > { %14066 = vmatprep.mubr.msk.f32.mxu0 %vm3839_vm2, %v18679_v61  ;;  %v11625_v61 = vld [vmem:[%s18351_s5 + $0xc0] sm:$0xff] }
 0x656   : > { %14067 = vmatmul.mubr.msk.f32.gmra.mrb[62].mxu0 %vm3839_vm2, %v18680_v41  ;;  %v14373_v41 = vpack.c.bf16 %v11626_v55, %v11625_v61  ;;  %v8215_v55 = vld [vmem:[#allocation3 + $0x1e8] sm:$0xff]  ;;  %v8216_v61 = vld [vmem:[#allocation3 + $0x1f0] sm:$0xff] }
 0x657   : > { %14077 = vmatprep.mubr.msk.f32.mxu0 %vm3839_vm2, %v7792_v17 }
 0x65a   : > { %14078 = vmatmul.mubr.msk.f32.vlgmr.msra.gmra.mrb[32].mxu0 %vm3839_vm2, %v7793_v16 }
 0x65b   : > { %14368 = vmatpush3.bf16.msra.mxu0 %v14365_v0  ;;  %14080 = vmatprep.mubr.msk.f32.mxu0 %vm3839_vm2, %v18681_v20  ;;  %v8212_v0 = vld [vmem:[#allocation3 + $0x1b0] sm:$0xff] }
 0x65c   : > { %14370 = vmatprep.subr.bf16.mxu0 %v14369_v50  ;;  %v8214_v20 = vld [vmem:[#allocation3 + $0x1d0] sm:$0xff] }
 0x65e   : > { %14081 = vmatmul.mubr.msk.f32.gmra.mrb[34].mxu0 %vm3839_vm2, %v18682_v60  ;;  %v8213_v60 = vld [vmem:[#allocation3 + $0x1c8] sm:$0xff] }
 0x65f   : > { %14083 = vmatprep.mubr.msk.f32.mxu0 %vm3839_vm2, %v17708_v59  ;;  %14372 = vmatpush3.bf16.msra.mxu0 %v14369_v50  ;;  %v8205_v59 = vld [vmem:[#allocation3 + $0x148] sm:$0xff] }
 0x660   : > { %14374 = vmatprep.subr.bf16.mxu0 %v14373_v41 }
 0x662   : > { %14084 = vmatmul.mubr.msk.f32.gmra.mrb[36].mxu0 %vm3839_vm2, %v17715_v36  ;;  %v8207_v36 = vld [vmem:[#allocation3 + $0x168] sm:$0xff] }
 0x663   : > { %14086 = vmatprep.mubr.msk.f32.mxu0 %vm3839_vm2, %v17719_v38  ;;  %v8206_v38 = vld [vmem:[#allocation3 + $0x150] sm:$0xff] }
 0x666   : > { %14087 = vmatmul.mubr.msk.f32.gmra.mrb[38].mxu0 %vm3839_vm2, %v17724_v53  ;;  %v8208_v53 = vld [vmem:[#allocation3 + $0x170] sm:$0xff] }
 0x667   : > { %14089 = vmatprep.mubr.msk.f32.mxu0 %vm3839_vm2, %v17728_v56  ;;  %v8209_v56 = vld [vmem:[#allocation3 + $0x188] sm:$0xff] }
 0x66a   : > { %14090 = vmatmul.mubr.msk.f32.gmra.mrb[40].mxu0 %vm3839_vm2, %v17732_v47  ;;  %v8210_v47 = vld [vmem:[#allocation3 + $0x190] sm:$0xff] }
 0x66b   : > { %14092 = vmatprep.mubr.msk.f32.mxu0 %vm3839_vm2, %v17736_v57  ;;  %v8204_v57 = vld [vmem:[#allocation3 + $0x130] sm:$0xff] }
 0x66e   : > { %14093 = vmatmul.mubr.msk.f32.gmra.mrb[42].mxu0 %vm3839_vm2, %v17740_v23  ;;  %v8211_v23 = vld [vmem:[#allocation3 + $0x1a8] sm:$0xff] }
 0x66f   : > { %14095 = vmatprep.mubr.msk.f32.mxu0 %vm3839_vm2, %v17744_v27  ;;  %v8203_v27 = vld [vmem:[#allocation3 + $0x128] sm:$0xff] }
 0x672   : > { %14096 = vmatmul.mubr.msk.f32.gmra.mrb[44].mxu0 %vm3839_vm2, %v17748_v8  ;;  %v8202_v8 = vld [vmem:[#allocation3 + $0x110] sm:$0xff] }
 0x673   : > { %14098 = vmatprep.mubr.msk.f32.mxu0 %vm3839_vm2, %v17752_v29  ;;  %v8201_v29 = vld [vmem:[#allocation3 + $0x108] sm:$0xff] }
 0x676   : > { %14099 = vmatmul.mubr.msk.f32.gmra.mrb[46].mxu0 %vm3839_vm2, %v17756_v30  ;;  %v8200_v30 = vld [vmem:[#allocation3 + $0xf0] sm:$0xff] }
 0x677   : > { %14101 = vmatprep.mubr.msk.f32.mxu0 %vm3839_vm2, %v17760_v58  ;;  %v8199_v58 = vld [vmem:[#allocation3 + $0xe8] sm:$0xff] }
 0x67a   : > { %14102 = vmatmul.mubr.msk.f32.gmra.mrb[48].mxu0 %vm3839_vm2, %v17764_v21  ;;  %v8198_v21 = vld [vmem:[#allocation3 + $0xd0] sm:$0xff] }
 0x67b   : > { %14104 = vmatprep.mubr.msk.f32.mxu0 %vm3839_vm2, %v17768_v7  ;;  %v8197_v7 = vld [vmem:[#allocation3 + $0xc8] sm:$0xff] }
 0x67e   : > { %14105 = vmatmul.mubr.msk.f32.gmra.mrb[50].mxu0 %vm3839_vm2, %v17772_v52  ;;  %v8196_v52 = vld [vmem:[#allocation3 + $0xb0] sm:$0xff] }
 0x67f   : > { %14107 = vmatprep.mubr.msk.f32.mxu0 %vm3839_vm2, %v17776_v46  ;;  %v8195_v46 = vld [vmem:[#allocation3 + $0xa8] sm:$0xff] }
 0x682   : > { %14108 = vmatmul.mubr.msk.f32.gmra.mrb[52].mxu0 %vm3839_vm2, %v17780_v45  ;;  %v8194_v45 = vld [vmem:[#allocation3 + $0x90] sm:$0xff] }
 0x683   : > { %14110 = vmatprep.mubr.msk.f32.mxu0 %vm3839_vm2, %v17784_v43  ;;  %v8193_v43 = vld [vmem:[#allocation3 + $0x88] sm:$0xff] }
 0x686   : > { %14111 = vmatmul.mubr.msk.f32.gmra.mrb[54].mxu0 %vm3839_vm2, %v17788_v11  ;;  %v8191_v11 = vld [vmem:[#allocation3 + $0x68] sm:$0xff] }
 0x687   : > { %14113 = vmatprep.mubr.msk.f32.mxu0 %vm3839_vm2, %v17792_v32  ;;  %v11627_v32 = vld [vmem:[%s18351_s5 + $0xd0] sm:$0xff] }
 0x68a   : > { %14114 = vmatmul.mubr.msk.f32.gmra.mrb[56].mxu0 %vm3839_vm2, %v17796_v10  ;;  %v8188_v10 = vld [vmem:[#allocation3 + $0x30] sm:$0xff] }
 0x68b   : > { %14116 = vmatprep.mubr.msk.f32.mxu0 %vm3839_vm2, %v17800_v28  ;;  %v11628_v28 = vld [vmem:[%s18351_s5 + $0xd8] sm:$0xff] }
 0x68e   : > { %14117 = vmatmul.mubr.msk.f32.gmra.mrb[58].mxu0 %vm3839_vm2, %v17804_v6  ;;  %v8187_v6 = vld [vmem:[#allocation3 + $0x28] sm:$0xff] }
 0x68f   : > { %14119 = vmatprep.mubr.msk.f32.mxu0 %vm3839_vm2, %v17808_v39  ;;  %v14377_v39 = vpack.c.bf16 %v11628_v28, %v11627_v32 }
 0x692   : > { %14120 = vmatmul.mubr.msk.f32.gmra.mrb[60].mxu0 %vm3839_vm2, %v17812_v31  ;;  %v8189_v31 = vld [vmem:[#allocation3 + $0x48] sm:$0xff] }
 0x693   : > { %14122 = vmatprep.mubr.msk.f32.mxu0 %vm3839_vm2, %v17816_v18  ;;  %v8190_v18 = vld [vmem:[#allocation3 + $0x50] sm:$0xff] }
 0x696   : > { %14123 = vmatmul.mubr.msk.f32.gmra.mrb[62].mxu0 %vm3839_vm2, %v17820_v44  ;;  %v8192_v44 = vld [vmem:[#allocation3 + $0x70] sm:$0xff] }
 0x697   : > { %14133 = vmatprep.mubr.msk.f32.mxu0 %vm3839_vm2, %v8187_v6 }
 0x69a   : > { %14134 = vmatmul.mubr.msk.f32.vlgmr.msra.gmra.mrb[32].mxu0 %vm3839_vm2, %v8188_v10 }
 0x69b   : > { %14376 = vmatpush3.bf16.msra.mxu0 %v14373_v41  ;;  %14136 = vmatprep.mubr.msk.f32.mxu0 %vm3839_vm2, %v8189_v31 }
 0x69c   : > { %14378 = vmatprep.subr.bf16.mxu0 %v14377_v39 }
 0x69e   : > { %14137 = vmatmul.mubr.msk.f32.gmra.mrb[34].mxu0 %vm3839_vm2, %v8190_v18 }
 0x69f   : > { %14139 = vmatprep.mubr.msk.f32.mxu0 %vm3839_vm2, %v8191_v11  ;;  %14380 = vmatpush3.bf16.msra.mxu0 %v14377_v39 }
 0x6a2   : > { %14140 = vmatmul.mubr.msk.f32.gmra.mrb[36].mxu0 %vm3839_vm2, %v8192_v44 }
 0x6a3   : > { %14142 = vmatprep.mubr.msk.f32.mxu0 %vm3839_vm2, %v8193_v43 }
 0x6a6   : > { %14143 = vmatmul.mubr.msk.f32.gmra.mrb[38].mxu0 %vm3839_vm2, %v8194_v45 }
 0x6a7   : > { %14145 = vmatprep.mubr.msk.f32.mxu0 %vm3839_vm2, %v8195_v46 }
 0x6aa   : > { %14146 = vmatmul.mubr.msk.f32.gmra.mrb[40].mxu0 %vm3839_vm2, %v8196_v52 }
 0x6ab   : > { %14148 = vmatprep.mubr.msk.f32.mxu0 %vm3839_vm2, %v8197_v7 }
 0x6ae   : > { %14149 = vmatmul.mubr.msk.f32.gmra.mrb[42].mxu0 %vm3839_vm2, %v8198_v21 }
 0x6af   : > { %14151 = vmatprep.mubr.msk.f32.mxu0 %vm3839_vm2, %v8199_v58 }
 0x6b2   : > { %14152 = vmatmul.mubr.msk.f32.gmra.mrb[44].mxu0 %vm3839_vm2, %v8200_v30 }
 0x6b3   : > { %14154 = vmatprep.mubr.msk.f32.mxu0 %vm3839_vm2, %v8201_v29 }
 0x6b6   : > { %14155 = vmatmul.mubr.msk.f32.gmra.mrb[46].mxu0 %vm3839_vm2, %v8202_v8 }
 0x6b7   : > { %14157 = vmatprep.mubr.msk.f32.mxu0 %vm3839_vm2, %v8203_v27 }
 0x6ba   : > { %14158 = vmatmul.mubr.msk.f32.gmra.mrb[48].mxu0 %vm3839_vm2, %v8204_v57 }
 0x6bb   : > { %14160 = vmatprep.mubr.msk.f32.mxu0 %vm3839_vm2, %v8205_v59 }
 0x6be   : > { %14161 = vmatmul.mubr.msk.f32.gmra.mrb[50].mxu0 %vm3839_vm2, %v8206_v38 }
 0x6bf   : > { %14163 = vmatprep.mubr.msk.f32.mxu0 %vm3839_vm2, %v8207_v36 }
 0x6c2   : > { %14164 = vmatmul.mubr.msk.f32.gmra.mrb[52].mxu0 %vm3839_vm2, %v8208_v53 }
 0x6c3   : > { %14166 = vmatprep.mubr.msk.f32.mxu0 %vm3839_vm2, %v8209_v56 }
 0x6c6   : > { %14167 = vmatmul.mubr.msk.f32.gmra.mrb[54].mxu0 %vm3839_vm2, %v8210_v47 }
 0x6c7   : > { %14169 = vmatprep.mubr.msk.f32.mxu0 %vm3839_vm2, %v8211_v23 }
 0x6ca   : > { %14170 = vmatmul.mubr.msk.f32.gmra.mrb[56].mxu0 %vm3839_vm2, %v8212_v0 }
 0x6cb   : > { %14172 = vmatprep.mubr.msk.f32.mxu0 %vm3839_vm2, %v8213_v60 }
 0x6ce   : > { %14173 = vmatmul.mubr.msk.f32.gmra.mrb[58].mxu0 %vm3839_vm2, %v8214_v20 }
 0x6cf   : > { %14175 = vmatprep.mubr.msk.f32.mxu0 %vm3839_vm2, %v8215_v55 }
 0x6d2   : > { %14176 = vmatmul.mubr.msk.f32.gmra.mrb[60].mxu0 %vm3839_vm2, %v8216_v61 }
 0x6d3   : > { %14178 = vmatprep.mubr.msk.f32.mxu0 %vm3839_vm2, %v17901_v2  ;;  %v18683_v2 = vld [vmem:[#allocation28_spill] sm:$0xff] }
 0x6d6   : > { %14179 = vmatmul.mubr.msk.f32.gmra.mrb[62].mxu0 %vm3839_vm2, %v17905_v3  ;;  %v18684_v3 = vld [vmem:[#allocation36_spill] sm:$0xff] }
 0x6d7   : > { %14189 = vmatprep.mubr.msk.f32.mxu0 %vm3839_vm2, %v18653_v48  ;;  %v18685_v48 = vld [vmem:[#allocation37_spill] sm:$0xff] }
 0x6da   : > { %14190 = vmatmul.mubr.msk.f32.vlgmr.msra.gmra.mrb[32].mxu0 %vm3839_vm2, %v18654_v26  ;;  %v18686_v26 = vld [vmem:[#allocation29_spill] sm:$0xff] }
 0x6db   : > { %14192 = vmatprep.mubr.msk.f32.mxu0 %vm3839_vm2, %v18655_v63  ;;  %v18687_v63 = vld [vmem:[#allocation30_spill] sm:$0xff] }
 0x6de   : > { %14193 = vmatmul.mubr.msk.f32.gmra.mrb[34].mxu0 %vm3839_vm2, %v18656_v51  ;;  %v18688_v51 = vld [vmem:[#allocation31_spill] sm:$0xff] }
 0x6df   : > { %14195 = vmatprep.mubr.msk.f32.mxu0 %vm3839_vm2, %v18657_v22  ;;  %v8612_v22 = vld [vmem:[#allocation3 + $0x227] sm:$0xff] }
 0x6e2   : > { %14196 = vmatmul.mubr.msk.f32.gmra.mrb[36].mxu0 %vm3839_vm2, %v18658_v13  ;;  %v18689_v13 = vld [vmem:[#allocation32_spill] sm:$0xff] }
 0x6e3   : > { %14198 = vmatprep.mubr.msk.f32.mxu0 %vm3839_vm2, %v18659_v34  ;;  %v8613_v34 = vld [vmem:[#allocation3 + $0x22f] sm:$0xff] }
 0x6e6   : > { %14199 = vmatmul.mubr.msk.f32.gmra.mrb[38].mxu0 %vm3839_vm2, %v18660_v40  ;;  %v18238_v40 = vld [vmem:[%s18352_s6] ss:$0 sm:$0xff] }
 0x6e7   : > { %14201 = vmatprep.mubr.msk.f32.mxu0 %vm3839_vm2, %v18661_v5 }
 0x6ea   : > { %14202 = vmatmul.mubr.msk.f32.gmra.mrb[40].mxu0 %vm3839_vm2, %v18662_v4 }
 0x6eb   : > { %14204 = vmatprep.mubr.msk.f32.mxu0 %vm3839_vm2, %v18663_v49 }
 0x6ee   : > { %14205 = vmatmul.mubr.msk.f32.gmra.mrb[42].mxu0 %vm3839_vm2, %v18664_v9 }
 0x6ef   : > { %14207 = vmatprep.mubr.msk.f32.mxu0 %vm3839_vm2, %v18665_v15 }
 0x6f2   : > { %14208 = vmatmul.mubr.msk.f32.gmra.mrb[44].mxu0 %vm3839_vm2, %v18666_v37 }
 0x6f3   : > { %14210 = vmatprep.mubr.msk.f32.mxu0 %vm3839_vm2, %v18667_v1 }
 0x6f6   : > { %14211 = vmatmul.mubr.msk.f32.gmra.mrb[46].mxu0 %vm3839_vm2, %v18668_v35 }
 0x6f7   : > { %14213 = vmatprep.mubr.msk.f32.mxu0 %vm3839_vm2, %v18669_v62 }
 0x6fa   : > { %14214 = vmatmul.mubr.msk.f32.gmra.mrb[48].mxu0 %vm3839_vm2, %v18670_v14 }
 0x6fb   : > { %14216 = vmatprep.mubr.msk.f32.mxu0 %vm3839_vm2, %v18671_v12 }
 0x6fe   : > { %14217 = vmatmul.mubr.msk.f32.gmra.mrb[50].mxu0 %vm3839_vm2, %v18672_v42 }
 0x6ff   : > { %14219 = vmatprep.mubr.msk.f32.mxu0 %vm3839_vm2, %v18673_v19 }
 0x702   : > { %14220 = vmatmul.mubr.msk.f32.gmra.mrb[52].mxu0 %vm3839_vm2, %v18674_v25 }
 0x703   : > { %14222 = vmatprep.mubr.msk.f32.mxu0 %vm3839_vm2, %v18675_v24 }
 0x706   : > { %14223 = vmatmul.mubr.msk.f32.gmra.mrb[54].mxu0 %vm3839_vm2, %v18683_v2 }
 0x707   : > { %14225 = vmatprep.mubr.msk.f32.mxu0 %vm3839_vm2, %v18684_v3 }
 0x70a   : > { %14226 = vmatmul.mubr.msk.f32.gmra.mrb[56].mxu0 %vm3839_vm2, %v18685_v48 }
 0x70b   : > { %14228 = vmatprep.mubr.msk.f32.mxu0 %vm3839_vm2, %v18686_v26 }
 0x70e   : > { %14229 = vmatmul.mubr.msk.f32.gmra.mrb[58].mxu0 %vm3839_vm2, %v18687_v63 }
 0x70f   : > { %14231 = vmatprep.mubr.msk.f32.mxu0 %vm3839_vm2, %v18688_v51 }
 0x712   : > { %14232 = vmatmul.mubr.msk.f32.gmra.mrb[60].mxu0 %vm3839_vm2, %v18689_v13 }
 0x713   : > { %14234 = vmatprep.mubr.msk.f32.mxu0 %vm3839_vm2, %v8612_v22 }
 0x716   : > { %14235 = vmatmul.mubr.msk.f32.gmra.mrb[62].mxu0 %vm3839_vm2, %v8613_v34 }
 0x7ad   : > { %v14191_v5 = vpop.f32.mrb[32].mxu0 }
 0x7ae   : > { %v10755_v4 = vadd.f32 %v14191_v5, %v18238_v40  ;;  %v10460_v49 = vpop.f32.mrb[33].mxu0 }
 0x7af   : > { %v10754_v9 = vadd.f32 %v18238_v40, %v10460_v49 }
 0x7b0   : > { %10787 = vst.msk [vmem:[%s18245_s18 + $0x8] sm:$0xff] %vm3839_vm2, %v10755_v4 }
 0x7b1   : > { %10786 = vst.msk [vmem:[%s18245_s18] sm:$0xff] %vm3839_vm2, %v10754_v9  ;;  %v14194_v15 = vpop.f32.mrb[34].mxu0 }
 0x7b2   : > { %v10757_v37 = vadd.f32 %v14194_v15, %v18238_v40  ;;  %v10470_v1 = vpop.f32.mrb[35].mxu0 }
 0x7b3   : > { %v10756_v35 = vadd.f32 %v18238_v40, %v10470_v1 }
 0x7b4   : > { %10789 = vst.msk [vmem:[%s18245_s18 + $0x18] sm:$0xff] %vm3839_vm2, %v10757_v37 }
 0x7b5   : > { %10788 = vst.msk [vmem:[%s18245_s18 + $0x10] sm:$0xff] %vm3839_vm2, %v10756_v35  ;;  %v14197_v62 = vpop.f32.mrb[36].mxu0 }
 0x7b6   : > { %v10759_v14 = vadd.f32 %v14197_v62, %v18238_v40  ;;  %v10480_v12 = vpop.f32.mrb[37].mxu0 }
 0x7b7   : > { %v10758_v42 = vadd.f32 %v18238_v40, %v10480_v12 }
 0x7b8   : > { %10791 = vst.msk [vmem:[%s18245_s18 + $0x28] sm:$0xff] %vm3839_vm2, %v10759_v14 }
 0x7b9   : > { %10790 = vst.msk [vmem:[%s18245_s18 + $0x20] sm:$0xff] %vm3839_vm2, %v10758_v42  ;;  %v14200_v19 = vpop.f32.mrb[38].mxu0 }
 0x7ba   : > { %v10761_v25 = vadd.f32 %v14200_v19, %v18238_v40  ;;  %v10490_v24 = vpop.f32.mrb[39].mxu0 }
 0x7bb   : > { %v10760_v17 = vadd.f32 %v18238_v40, %v10490_v24 }
 0x7bc   : > { %10793 = vst.msk [vmem:[%s18245_s18 + $0x38] sm:$0xff] %vm3839_vm2, %v10761_v25 }
 0x7bd   : > { %10792 = vst.msk [vmem:[%s18245_s18 + $0x30] sm:$0xff] %vm3839_vm2, %v10760_v17  ;;  %v14203_v33 = vpop.f32.mrb[40].mxu0 }
 0x7be   : > { %v10763_v54 = vadd.f32 %v14203_v33, %v18238_v40  ;;  %v10500_v41 = vpop.f32.mrb[41].mxu0 }
 0x7bf   : > { %v10762_v16 = vadd.f32 %v18238_v40, %v10500_v41 }
 0x7c0   : > { %10795 = vst.msk [vmem:[%s18245_s18 + $0x48] sm:$0xff] %vm3839_vm2, %v10763_v54 }
 0x7c1   : > { %10794 = vst.msk [vmem:[%s18245_s18 + $0x40] sm:$0xff] %vm3839_vm2, %v10762_v16  ;;  %v14206_v50 = vpop.f32.mrb[42].mxu0 }
 0x7c2   : > { %v10765_v32 = vadd.f32 %v14206_v50, %v18238_v40  ;;  %v10510_v28 = vpop.f32.mrb[43].mxu0 }
 0x7c3   : > { %v10764_v6 = vadd.f32 %v18238_v40, %v10510_v28 }
 0x7c4   : > { %10797 = vst.msk [vmem:[%s18245_s18 + $0x58] sm:$0xff] %vm3839_vm2, %v10765_v32 }
 0x7c5   : > { %10796 = vst.msk [vmem:[%s18245_s18 + $0x50] sm:$0xff] %vm3839_vm2, %v10764_v6  ;;  %v14209_v39 = vpop.f32.mrb[44].mxu0 }
 0x7c6   : > { %v10767_v10 = vadd.f32 %v14209_v39, %v18238_v40  ;;  %v10520_v31 = vpop.f32.mrb[45].mxu0 }
 0x7c7   : > { %v10766_v18 = vadd.f32 %v18238_v40, %v10520_v31 }
 0x7c8   : > { %10799 = vst.msk [vmem:[%s18245_s18 + $0x68] sm:$0xff] %vm3839_vm2, %v10767_v10 }
 0x7c9   : > { %10798 = vst.msk [vmem:[%s18245_s18 + $0x60] sm:$0xff] %vm3839_vm2, %v10766_v18  ;;  %v14212_v11 = vpop.f32.mrb[46].mxu0 }
 0x7ca   : > { %v10769_v44 = vadd.f32 %v14212_v11, %v18238_v40  ;;  %v10530_v43 = vpop.f32.mrb[47].mxu0 }
 0x7cb   : > { %v10768_v45 = vadd.f32 %v18238_v40, %v10530_v43 }
 0x7cc   : > { %10801 = vst.msk [vmem:[%s18245_s18 + $0x78] sm:$0xff] %vm3839_vm2, %v10769_v44 }
 0x7cd   : > { %10800 = vst.msk [vmem:[%s18245_s18 + $0x70] sm:$0xff] %vm3839_vm2, %v10768_v45  ;;  %v14215_v46 = vpop.f32.mrb[48].mxu0 }
 0x7ce   : > { %v10771_v52 = vadd.f32 %v14215_v46, %v18238_v40  ;;  %v10540_v7 = vpop.f32.mrb[49].mxu0 }
 0x7cf   : > { %v10770_v21 = vadd.f32 %v18238_v40, %v10540_v7 }
 0x7d0   : > { %10803 = vst.msk [vmem:[%s18245_s18 + $0x88] sm:$0xff] %vm3839_vm2, %v10771_v52 }
 0x7d1   : > { %10802 = vst.msk [vmem:[%s18245_s18 + $0x80] sm:$0xff] %vm3839_vm2, %v10770_v21  ;;  %v14218_v58 = vpop.f32.mrb[50].mxu0 }
 0x7d2   : > { %v10773_v30 = vadd.f32 %v14218_v58, %v18238_v40  ;;  %v10550_v29 = vpop.f32.mrb[51].mxu0 }
 0x7d3   : > { %v10772_v8 = vadd.f32 %v18238_v40, %v10550_v29 }
 0x7d4   : > { %10805 = vst.msk [vmem:[%s18245_s18 + $0x98] sm:$0xff] %vm3839_vm2, %v10773_v30 }
 0x7d5   : > { %10804 = vst.msk [vmem:[%s18245_s18 + $0x90] sm:$0xff] %vm3839_vm2, %v10772_v8  ;;  %v14221_v27 = vpop.f32.mrb[52].mxu0 }
 0x7d6   : > { %v10775_v57 = vadd.f32 %v14221_v27, %v18238_v40  ;;  %v10560_v59 = vpop.f32.mrb[53].mxu0 }
 0x7d7   : > { %v10774_v38 = vadd.f32 %v18238_v40, %v10560_v59 }
 0x7d8   : > { %10807 = vst.msk [vmem:[%s18245_s18 + $0xa8] sm:$0xff] %vm3839_vm2, %v10775_v57 }
 0x7d9   : > { %10806 = vst.msk [vmem:[%s18245_s18 + $0xa0] sm:$0xff] %vm3839_vm2, %v10774_v38  ;;  %v14224_v36 = vpop.f32.mrb[54].mxu0 }
 0x7da   : > { %v10777_v53 = vadd.f32 %v14224_v36, %v18238_v40  ;;  %v10570_v56 = vpop.f32.mrb[55].mxu0 }
 0x7db   : > { %v10776_v47 = vadd.f32 %v18238_v40, %v10570_v56 }
 0x7dc   : > { %10809 = vst.msk [vmem:[%s18245_s18 + $0xb8] sm:$0xff] %vm3839_vm2, %v10777_v53 }
 0x7dd   : > { %10808 = vst.msk [vmem:[%s18245_s18 + $0xb0] sm:$0xff] %vm3839_vm2, %v10776_v47  ;;  %v14227_v23 = vpop.f32.mrb[56].mxu0 }
 0x7de   : > { %v10779_v0 = vadd.f32 %v14227_v23, %v18238_v40  ;;  %v10580_v60 = vpop.f32.mrb[57].mxu0 }
 0x7df   : > { %v10778_v20 = vadd.f32 %v18238_v40, %v10580_v60 }
 0x7e0   : > { %10811 = vst.msk [vmem:[%s18245_s18 + $0xc8] sm:$0xff] %vm3839_vm2, %v10779_v0 }
 0x7e1   : > { %10810 = vst.msk [vmem:[%s18245_s18 + $0xc0] sm:$0xff] %vm3839_vm2, %v10778_v20  ;;  %v14230_v55 = vpop.f32.mrb[58].mxu0 }
 0x7e2   : > { %v10781_v61 = vadd.f32 %v14230_v55, %v18238_v40  ;;  %v10590_v2 = vpop.f32.mrb[59].mxu0 }
 0x7e3   : > { %v10780_v3 = vadd.f32 %v18238_v40, %v10590_v2 }
 0x7e4   : > { %10813 = vst.msk [vmem:[%s18245_s18 + $0xd8] sm:$0xff] %vm3839_vm2, %v10781_v61 }
 0x7e5   : > { %10812 = vst.msk [vmem:[%s18245_s18 + $0xd0] sm:$0xff] %vm3839_vm2, %v10780_v3  ;;  %v14233_v48 = vpop.f32.mrb[60].mxu0 }
 0x7e6   : > { %v10783_v26 = vadd.f32 %v14233_v48, %v18238_v40  ;;  %v10600_v63 = vpop.f32.mrb[61].mxu0 }
 0x7e7   : > { %v10782_v51 = vadd.f32 %v18238_v40, %v10600_v63 }
 0x7e8   : > { %10815 = vst.msk [vmem:[%s18245_s18 + $0xe8] sm:$0xff] %vm3839_vm2, %v10783_v26 }
 0x7e9   : > { %10814 = vst.msk [vmem:[%s18245_s18 + $0xe0] sm:$0xff] %vm3839_vm2, %v10782_v51  ;;  %v14236_v22 = vpop.f32.mrb[62].mxu0 }
 0x7ea   : > { %v10785_v13 = vadd.f32 %v14236_v22, %v18238_v40  ;;  %v10610_v34 = vpop.f32.mrb[63].mxu0 }
 0x7eb   : > { %v10784_v5 = vadd.f32 %v18238_v40, %v10610_v34 }
 0x7ec   : > { %10817 = vst.msk [vmem:[%s18245_s18 + $0xf8] sm:$0xff] %vm3839_vm2, %v10785_v13 }
 0x7ed   : > { %10816 = vst.msk [vmem:[%s18245_s18 + $0xf0] sm:$0xff] %vm3839_vm2, %v10784_v5 }
 0x7ee PF: > { %s17_s24 = sadd.s32 1, %s15166_s24  }
 0x7ef   : > { %p14_p4 = scmp.ge.s32.totalorder %s17_s24, 4  }
 0x7f1   :  { %16 = sbr.rel (!%p14_p4) target bundleno = 1 (0x1), region = 106 }

</bundles_post_ra>
